<compile_context>
chip_gen: v7x
topology: tpu7x:2x2x1
jax: 0.10.0
libtpu: 0.0.40
codegen_flags: <defaults>
</compile_context>

<pallas_src>
import functools

import jax
import jax.numpy as jnp
from jax import lax
from jax.experimental import pallas as pl
from jax.experimental.pallas import tpu as pltpu


# ------------------------------ fused kernel --------------------------------

def _fire_kernel(x_ref, w_sq_ref, b_sq_ref, w_f_ref, b_f_ref, o_ref,
                 s_pad_ref, cols_ref, *, W, PAD, Csq):
    """Fused squeeze(1x1)+BN+ReLU -> {expand1x1, expand3x3}(+BN+ReLU) -> concat."""
    t = pl.program_id(1)                    # HW-tile index ("arbitrary" axis)
    HW = x_ref.shape[1]
    R = o_ref.shape[1]                      # flattened output rows per tile

    # ---- stage 1, once per image (t == 0): squeeze + im2col, VMEM-resident ----
    @pl.when(t == 0)
    def _():
        # squeeze 1x1 conv + folded BN + ReLU into a zero-padded scratch.
        s_pad_ref[...] = jnp.zeros_like(s_pad_ref)
        s = jnp.dot(x_ref[0], w_sq_ref[...],
                    preferred_element_type=jnp.float32)
        s = jnp.maximum(s + b_sq_ref[...], 0.0)
        s_pad_ref[pl.ds(PAD, HW), :] = s.astype(s_pad_ref.dtype)

        # Lane-packed (HW, 9*Csq) im2col of the squeeze output.  Left/right
        # column boundary masks are folded in HERE (once per image) so the hot
        # per-tile path has no selects/iotas; vertical out-of-image taps read
        # the zeroed pad rows and need no mask.
        col = lax.broadcasted_iota(jnp.int32, (HW, 1), 0) % W
        left_ok = col > 0
        right_ok = col < (W - 1)
        taps = []
        for k in range(9):                  # static unroll, once per image
            oh, ow = k // 3 - 1, k % 3 - 1
            src = s_pad_ref[pl.ds(PAD + oh * W + ow, HW), :]
            if ow == -1:
                src = jnp.where(left_ok, src, jnp.zeros_like(src))
            elif ow == 1:
                src = jnp.where(right_ok, src, jnp.zeros_like(src))
            taps.append(src)
        cols_ref[...] = jnp.concatenate(taps, axis=-1)   # one full-width store

    # ---- stage 2, per HW tile: ONE (R, 9*Csq) x (9*Csq, Ce1+Ce3) matmul ----
    # expand1x1 weights occupy the center-tap rows of the fused weight, so a
    # single matmul fills every output lane; bias+ReLU stay in f32; one
    # unmasked lane-dense bf16 store.
    r0 = pl.multiple_of(t * R, R)
    lhs = cols_ref[pl.ds(r0, R), :]
    y = jnp.dot(lhs, w_f_ref[...], preferred_element_type=jnp.float32)
    y = jnp.maximum(y + b_f_ref[...], 0.0)
    o_ref[0] = y.astype(o_ref.dtype)


# --------------------------- pallas_call wrapper -----------------------------

def _round_up(x, m):
    return -(-x // m) * m


def _phys_bytes(rows, cols, itemsize):
    """Physical VMEM bytes of a (rows, cols) buffer (sublane/lane padded)."""
    sub = 8 * (4 // itemsize)               # 8 rows for f32, 16 for bf16
    return _round_up(rows, sub) * _round_up(cols, 128) * itemsize


def _pick_tile_h(H, W, target_rows=512):
    th = min(H, max(1, _round_up(target_rows, max(W, 1)) // max(W, 1)))
    while H % th:
        th -= 1
    return th


def fire_block_forward_nhwc(x_nhwc, params, tile_h=None):
    """Fused fire block on an NHWC input; returns NHWC bf16."""
    N, H, W, Cin = x_nhwc.shape
    Csq = params["w_sq"].shape[1]
    Ce1 = params["w_e1"].shape[1]
    Ce3 = params["w_e3_taps"].shape[2]
    Cout = Ce1 + Ce3
    HW = H * W

    if tile_h is None:
        tile_h = _pick_tile_h(H, W)
    assert H % tile_h == 0, "tile_h must divide H"
    R = tile_h * W
    T = H // tile_h
    assert R % 8 == 0, "flattened tile rows must be sublane aligned"
    PAD = _round_up(W + 1, 16)              # >= W+1, bf16-sublane aligned

    x2d = x_nhwc.reshape(N, HW, Cin).astype(jnp.bfloat16)

    # Fused expand weight: (9*Csq, Ce1+Ce3).  3x3 taps fill the right Ce3
    # columns; the 1x1 expand weights live in the center-tap rows of the left
    # Ce1 columns (other taps' Ce1 columns are exact zeros -> exact result).
    w_e3_flat = params["w_e3_taps"].reshape(9 * Csq, Ce3)
    w_fused = jnp.zeros((9 * Csq, Cout), jnp.bfloat16)
    w_fused = w_fused.at[:, Ce1:].set(w_e3_flat)
    w_fused = w_fused.at[4 * Csq:5 * Csq, :Ce1].set(params["w_e1"])
    b_fused = jnp.concatenate([params["b_e1"], params["b_e3"]], axis=-1)

    kernel = functools.partial(_fire_kernel, W=W, PAD=PAD, Csq=Csq)

    # Lane/sublane-padding-aware VMEM budget (v7x has 64 MiB/TC -> cap 48 MiB).
    need = 2 * _phys_bytes(HW, Cin, 2)                  # x block (dbl-buffered)
    need += 2 * _phys_bytes(R, Cout, 2)                 # out block (dbl-buffered)
    need += 2 * (_phys_bytes(Cin, Csq, 2) + _phys_bytes(1, Csq, 4)
                 + _phys_bytes(9 * Csq, Cout, 2) + _phys_bytes(1, Cout, 4))
    need += _phys_bytes(2 * PAD + HW, Csq, 2)           # padded squeeze scratch
    need += _phys_bytes(HW, 9 * Csq, 2)                 # im2col scratch
    vmem_limit = int(min(48 << 20, max(32 << 20, need + (4 << 20))))

    out2d = pl.pallas_call(
        kernel,
        out_shape=jax.ShapeDtypeStruct((N, HW, Cout), jnp.bfloat16),
        grid=(N, T),
        in_specs=[
            # full image stays VMEM-resident across the t axis for each n
            pl.BlockSpec((1, HW, Cin), lambda n, t: (n, 0, 0)),
            pl.BlockSpec((Cin, Csq), lambda n, t: (0, 0)),
            pl.BlockSpec((1, Csq), lambda n, t: (0, 0)),
            pl.BlockSpec((9 * Csq, Cout), lambda n, t: (0, 0)),
            pl.BlockSpec((1, Cout), lambda n, t: (0, 0)),
        ],
        out_specs=pl.BlockSpec((1, R, Cout), lambda n, t: (n, t, 0)),
        scratch_shapes=[
            pltpu.VMEM((2 * PAD + HW, Csq), jnp.bfloat16),   # padded squeeze out
            pltpu.VMEM((HW, 9 * Csq), jnp.bfloat16),         # lane-packed im2col
        ],
        compiler_params=pltpu.CompilerParams(
            dimension_semantics=("parallel", "arbitrary"),
            vmem_limit_bytes=vmem_limit),
    )(x2d, params["w_sq"], params["b_sq"], w_fused, b_fused)

    return out2d.reshape(N, H, W, Cout)


def fire_block_forward(x_nchw, params, tile_h=None):
    """_FireBlock.forward on an NCHW input; returns NCHW bf16.

    NOTE: in a real network keep activations NHWC/bf16 end-to-end and call
    fire_block_forward_nhwc directly — the transposes here are extra HBM
    passes kept only to match the PyTorch NCHW interface.
    """
    x_nhwc = jnp.transpose(x_nchw, (0, 2, 3, 1)).astype(jnp.bfloat16)
    y = fire_block_forward_nhwc(x_nhwc, params, tile_h=tile_h)
    return jnp.transpose(y, (0, 3, 1, 2))


# ------------------------------ parameter init -------------------------------

def _fold_conv_bn(key, w_shape, cout):
    k1, k2, k3, k4 = jax.random.split(key, 4)
    w = 0.25 * jax.random.normal(k1, w_shape, jnp.float32)
    b = 0.10 * jax.random.normal(k2, (cout,), jnp.float32)
    gamma = 1.0 + 0.1 * jax.random.normal(k3, (cout,), jnp.float32)
    beta = 0.1 * jax.random.normal(k4, (cout,), jnp.float32)
    # eval-mode BN (running_mean=0, running_var=1, eps=1e-5) folded into conv
    scale = gamma / jnp.sqrt(1.0 + 1e-5)
    return w * scale, (b * scale + beta).reshape(1, cout)


def init_fire_params(key, inplanes, squeeze_planes, e1_planes, e3_planes):
    ks, k1, k3 = jax.random.split(key, 3)
    w_sq, b_sq = _fold_conv_bn(ks, (inplanes, squeeze_planes), squeeze_planes)
    w_e1, b_e1 = _fold_conv_bn(k1, (squeeze_planes, e1_planes), e1_planes)
    w_e3, b_e3 = _fold_conv_bn(k3, (3, 3, squeeze_planes, e3_planes), e3_planes)
    w_e3_bf = w_e3.astype(jnp.bfloat16)
    return dict(
        w_sq=w_sq.astype(jnp.bfloat16), b_sq=b_sq,
        w_e1=w_e1.astype(jnp.bfloat16), b_e1=b_e1,
        w_e3_taps=w_e3_bf.reshape(9, squeeze_planes, e3_planes), b_e3=b_e3,
        w_e3_hwio=w_e3_bf,   # same bf16 values, HWIO layout for the reference
    )


# ------------------------------- pure-JAX ref --------------------------------

def reference_fire_block(x_nchw, p):
    x = jnp.transpose(x_nchw, (0, 2, 3, 1)).astype(jnp.bfloat16)
    s = jnp.einsum("nhwc,cs->nhws", x, p["w_sq"],
                   preferred_element_type=jnp.float32)
    s = jax.nn.relu(s + p["b_sq"][0]).astype(jnp.bfloat16)
    e1 = jnp.einsum("nhwc,co->nhwo", s, p["w_e1"],
                    preferred_element_type=jnp.float32)
    e1 = jax.nn.relu(e1 + p["b_e1"][0])
    e3 = lax.conv_general_dilated(
        s, p["w_e3_hwio"], window_strides=(1, 1), padding=((1, 1), (1, 1)),
        dimension_numbers=("NHWC", "HWIO", "NHWC"),
        preferred_element_type=jnp.float32)
    e3 = jax.nn.relu(e3 + p["b_e3"][0])
    y = jnp.concatenate([e1, e3], axis=-1)
    return jnp.transpose(y, (0, 3, 1, 2))


# ----------------------------------- main ------------------------------------

if __name__ == "__main__":
    N, Cin, H, W = 2, 64, 16, 16
    squeeze_planes, e1_planes, e3_planes = 16, 64, 64   # Cout = 128 (lane-dense)

    key = jax.random.PRNGKey(0)
    kx, kp = jax.random.split(key)
    x = jax.random.normal(kx, (N, Cin, H, W), jnp.float32)   # NCHW like PyTorch
    params = init_fire_params(kp, Cin, squeeze_planes, e1_planes, e3_planes)

    fwd = jax.jit(fire_block_forward)
    out = jax.block_until_ready(fwd(x, params))
    assert out.shape == (N, e1_planes + e3_planes, H, W)

    ref = reference_fire_block(x, params)                     # f32 reference
    out_f32 = out.astype(jnp.float32)
    rel_err = float(jnp.max(jnp.abs(out_f32 - ref) / (1.0 + jnp.abs(ref))))
    assert rel_err < 2e-2, f"mismatch vs reference: {rel_err}"

    print("KERNEL_OK")
</pallas_src>

<mosaic_0001>
module attributes {stable_mosaic.version = 11 : i64} {
  func.func @_fire_kernel(%arg0: i32, %arg1: i32, %arg2: memref<1x256x64xbf16, #tpu.memory_space<vmem>>, %arg3: memref<64x16xbf16, #tpu.memory_space<vmem>>, %arg4: memref<1x16xf32, #tpu.memory_space<vmem>>, %arg5: memref<144x128xbf16, #tpu.memory_space<vmem>>, %arg6: memref<1x128xf32, #tpu.memory_space<vmem>>, %arg7: memref<1x256x128xbf16, #tpu.memory_space<vmem>>, %arg8: memref<320x16xbf16, #tpu.memory_space<vmem>>, %arg9: memref<256x144xbf16, #tpu.memory_space<vmem>>) attributes {dimension_semantics = [#tpu.dimension_semantics<parallel>, #tpu.dimension_semantics<arbitrary>], iteration_bounds = array<i64: 2, 1>, scalar_prefetch = 0 : i64, scratch_operands = 2 : i64, tpu.core_type = #tpu.core_type<tc>, window_params = [{transform_indices = @transform_0, window_bounds = array<i64: 1, 256, 64>}, {pipeline_mode = #tpu.pipeline_mode<synchronous>, transform_indices = @transform_1, window_bounds = array<i64: 64, 16>}, {pipeline_mode = #tpu.pipeline_mode<synchronous>, transform_indices = @transform_2, window_bounds = array<i64: 1, 16>}, {pipeline_mode = #tpu.pipeline_mode<synchronous>, transform_indices = @transform_3, window_bounds = array<i64: 144, 128>}, {pipeline_mode = #tpu.pipeline_mode<synchronous>, transform_indices = @transform_4, window_bounds = array<i64: 1, 128>}, {transform_indices = @transform_5, window_bounds = array<i64: 1, 256, 128>}]} {
    %c0_i32 = arith.constant 0 : i32
    %0 = arith.cmpi eq, %arg1, %c0_i32 : i32
    %1 = arith.extui %0 : i1 to i32
    %c0_i32_0 = arith.constant 0 : i32
    %2 = arith.cmpi ne, %1, %c0_i32_0 : i32
    scf.if %2 {
      %cst_9 = arith.constant 0.000000e+00 : bf16
      %18 = vector.broadcast %cst_9 : bf16 to vector<320x16xbf16>
      %c0_10 = arith.constant 0 : index
      %c0_11 = arith.constant 0 : index
      %19 = vector.load %arg8[%c0_10, %c0_11] : memref<320x16xbf16, #tpu.memory_space<vmem>>, vector<320x16xbf16>
      tpu.vector_store %arg8[%c0_10, %c0_11], %18 {strides = array<i32>} : memref<320x16xbf16, #tpu.memory_space<vmem>>, vector<320x16xbf16>,
      %c0_12 = arith.constant 0 : index
      %c0_13 = arith.constant 0 : index
      %c0_14 = arith.constant 0 : index
      %20 = vector.load %arg2[%c0_12, %c0_13, %c0_14] : memref<1x256x64xbf16, #tpu.memory_space<vmem>>, vector<1x256x64xbf16>
      %21 = vector.shape_cast %20 : vector<1x256x64xbf16> to vector<256x64xbf16>
      %c0_15 = arith.constant 0 : index
      %c0_16 = arith.constant 0 : index
      %22 = vector.load %arg3[%c0_15, %c0_16] : memref<64x16xbf16, #tpu.memory_space<vmem>>, vector<64x16xbf16>
      %cst_17 = arith.constant dense<0.000000e+00> : vector<256x16xf32>
      %23 = tpu.matmul %21, %22, %cst_17 {dimension_numbers = #tpu.dot_dimension_numbers<[1], [0], [0], [1], [0, 0, 1, 1], [], []>} : vector<256x64xbf16>, vector<64x16xbf16>, vector<256x16xf32> -> vector<256x16xf32>
      %c0_18 = arith.constant 0 : index
      %c0_19 = arith.constant 0 : index
      %24 = vector.load %arg4[%c0_18, %c0_19] : memref<1x16xf32, #tpu.memory_space<vmem>>, vector<1x16xf32>
      %25 = vector.broadcast %24 : vector<1x16xf32> to vector<256x16xf32>
      %26 = arith.addf %23, %25 : vector<256x16xf32>
      %cst_20 = arith.constant 0.000000e+00 : f32
      %27 = vector.broadcast %cst_20 : f32 to vector<256x16xf32>
      %28 = arith.maximumf %26, %27 : vector<256x16xf32>
      %29 = arith.truncf %28 : vector<256x16xf32> to vector<256x16xbf16>
      %c32 = arith.constant 32 : index
      %c0_21 = arith.constant 0 : index
      %30 = vector.load %arg8[%c32, %c0_21] : memref<320x16xbf16, #tpu.memory_space<vmem>>, vector<256x16xbf16>
      tpu.vector_store %arg8[%c32, %c0_21], %29 {strides = array<i32>} : memref<320x16xbf16, #tpu.memory_space<vmem>>, vector<256x16xbf16>,
      %31 = tpu.iota {dimensions = array<i32: 0>} : vector<256x1xi32>
      %c16_i32 = arith.constant 16 : i32
      %c0_i32_22 = arith.constant 0 : i32
      %32 = arith.cmpi eq, %c16_i32, %c0_i32_22 : i32
      %c1_i32 = arith.constant 1 : i32
      %33 = arith.select %32, %c1_i32, %c16_i32 : i32
      %34 = vector.broadcast %33 : i32 to vector<256x1xi32>
      %35 = arith.remsi %31, %34 : vector<256x1xi32>
      %c0_i32_23 = arith.constant 0 : i32
      %36 = vector.broadcast %c0_i32_23 : i32 to vector<256x1xi32>
      %37 = arith.cmpi ne, %35, %36 : vector<256x1xi32>
      %c0_i32_24 = arith.constant 0 : i32
      %38 = vector.broadcast %c0_i32_24 : i32 to vector<256x1xi32>
      %39 = arith.cmpi slt, %35, %38 : vector<256x1xi32>
      %c0_i32_25 = arith.constant 0 : i32
      %40 = arith.cmpi slt, %33, %c0_i32_25 : i32
      %41 = vector.broadcast %40 : i1 to vector<256x1xi1>
      %42 = vector.broadcast %41 : vector<256x1xi1> to vector<256x1xi1>
      %43 = arith.xori %39, %42 : vector<256x1xi1>
      %44 = arith.andi %43, %37 : vector<256x1xi1>
      %45 = vector.broadcast %33 : i32 to vector<256x1xi32>
      %46 = arith.addi %35, %45 : vector<256x1xi32>
      %47 = arith.select %44, %46, %35 : vector<256x1xi1>, vector<256x1xi32>
      %c0_i32_26 = arith.constant 0 : i32
      %48 = vector.broadcast %c0_i32_26 : i32 to vector<256x1xi32>
      %49 = arith.cmpi sgt, %47, %48 : vector<256x1xi32>
      %c15_i32 = arith.constant 15 : i32
      %50 = vector.broadcast %c15_i32 : i32 to vector<256x1xi32>
      %51 = arith.cmpi slt, %47, %50 : vector<256x1xi32>
      %c15 = arith.constant 15 : index
      %c0_27 = arith.constant 0 : index
      %52 = vector.load %arg8[%c15, %c0_27] : memref<320x16xbf16, #tpu.memory_space<vmem>>, vector<256x16xbf16>
      %cst_28 = arith.constant 0.000000e+00 : bf16
      %53 = vector.broadcast %cst_28 : bf16 to vector<256x16xbf16>
      %54 = vector.shape_cast %49 : vector<256x1xi1> to vector<256x1xi1>
      %55 = vector.broadcast %54 : vector<256x1xi1> to vector<256x16xi1>
      %56 = arith.select %55, %52, %53 : vector<256x16xi1>, vector<256x16xbf16>
      %c16 = arith.constant 16 : index
      %c0_29 = arith.constant 0 : index
      %57 = vector.load %arg8[%c16, %c0_29] : memref<320x16xbf16, #tpu.memory_space<vmem>>, vector<256x16xbf16>
      %c17 = arith.constant 17 : index
      %c0_30 = arith.constant 0 : index
      %58 = vector.load %arg8[%c17, %c0_30] : memref<320x16xbf16, #tpu.memory_space<vmem>>, vector<256x16xbf16>
      %cst_31 = arith.constant 0.000000e+00 : bf16
      %59 = vector.broadcast %cst_31 : bf16 to vector<256x16xbf16>
      %60 = vector.shape_cast %51 : vector<256x1xi1> to vector<256x1xi1>
      %61 = vector.broadcast %60 : vector<256x1xi1> to vector<256x16xi1>
      %62 = arith.select %61, %58, %59 : vector<256x16xi1>, vector<256x16xbf16>
      %c31 = arith.constant 31 : index
      %c0_32 = arith.constant 0 : index
      %63 = vector.load %arg8[%c31, %c0_32] : memref<320x16xbf16, #tpu.memory_space<vmem>>, vector<256x16xbf16>
      %cst_33 = arith.constant 0.000000e+00 : bf16
      %64 = vector.broadcast %cst_33 : bf16 to vector<256x16xbf16>
      %65 = vector.shape_cast %49 : vector<256x1xi1> to vector<256x1xi1>
      %66 = vector.broadcast %65 : vector<256x1xi1> to vector<256x16xi1>
      %67 = arith.select %66, %63, %64 : vector<256x16xi1>, vector<256x16xbf16>
      %c32_34 = arith.constant 32 : index
      %c0_35 = arith.constant 0 : index
      %68 = vector.load %arg8[%c32_34, %c0_35] : memref<320x16xbf16, #tpu.memory_space<vmem>>, vector<256x16xbf16>
      %c33 = arith.constant 33 : index
      %c0_36 = arith.constant 0 : index
      %69 = vector.load %arg8[%c33, %c0_36] : memref<320x16xbf16, #tpu.memory_space<vmem>>, vector<256x16xbf16>
      %cst_37 = arith.constant 0.000000e+00 : bf16
      %70 = vector.broadcast %cst_37 : bf16 to vector<256x16xbf16>
      %71 = vector.shape_cast %51 : vector<256x1xi1> to vector<256x1xi1>
      %72 = vector.broadcast %71 : vector<256x1xi1> to vector<256x16xi1>
      %73 = arith.select %72, %69, %70 : vector<256x16xi1>, vector<256x16xbf16>
      %c47 = arith.constant 47 : index
      %c0_38 = arith.constant 0 : index
      %74 = vector.load %arg8[%c47, %c0_38] : memref<320x16xbf16, #tpu.memory_space<vmem>>, vector<256x16xbf16>
      %cst_39 = arith.constant 0.000000e+00 : bf16
      %75 = vector.broadcast %cst_39 : bf16 to vector<256x16xbf16>
      %76 = vector.shape_cast %49 : vector<256x1xi1> to vector<256x1xi1>
      %77 = vector.broadcast %76 : vector<256x1xi1> to vector<256x16xi1>
      %78 = arith.select %77, %74, %75 : vector<256x16xi1>, vector<256x16xbf16>
      %c48 = arith.constant 48 : index
      %c0_40 = arith.constant 0 : index
      %79 = vector.load %arg8[%c48, %c0_40] : memref<320x16xbf16, #tpu.memory_space<vmem>>, vector<256x16xbf16>
      %c49 = arith.constant 49 : index
      %c0_41 = arith.constant 0 : index
      %80 = vector.load %arg8[%c49, %c0_41] : memref<320x16xbf16, #tpu.memory_space<vmem>>, vector<256x16xbf16>
      %cst_42 = arith.constant 0.000000e+00 : bf16
      %81 = vector.broadcast %cst_42 : bf16 to vector<256x16xbf16>
      %82 = vector.shape_cast %51 : vector<256x1xi1> to vector<256x1xi1>
      %83 = vector.broadcast %82 : vector<256x1xi1> to vector<256x16xi1>
      %84 = arith.select %83, %80, %81 : vector<256x16xi1>, vector<256x16xbf16>
      %85 = tpu.concatenate %56, %57, %62, %67, %68, %73, %78, %79, %84 in 1 : vector<256x16xbf16>, vector<256x16xbf16>, vector<256x16xbf16>, vector<256x16xbf16>, vector<256x16xbf16>, vector<256x16xbf16>, vector<256x16xbf16>, vector<256x16xbf16>, vector<256x16xbf16> -> vector<256x144xbf16>
      %c0_43 = arith.constant 0 : index
      %c0_44 = arith.constant 0 : index
      %86 = vector.load %arg9[%c0_43, %c0_44] : memref<256x144xbf16, #tpu.memory_space<vmem>>, vector<256x144xbf16>
      tpu.vector_store %arg9[%c0_43, %c0_44], %85 {strides = array<i32>} : memref<256x144xbf16, #tpu.memory_space<vmem>>, vector<256x144xbf16>,
    } else {
    }
    %c256_i32 = arith.constant 256 : i32
    %3 = arith.muli %arg1, %c256_i32 : i32
    %4 = tpu.assume_multiple %3, 256 : i32
    %5 = arith.index_cast %4 : i32 to index
    %c0 = arith.constant 0 : index
    %6 = vector.load %arg9[%5, %c0] : memref<256x144xbf16, #tpu.memory_space<vmem>>, vector<256x144xbf16>
    %c0_1 = arith.constant 0 : index
    %c0_2 = arith.constant 0 : index
    %7 = vector.load %arg5[%c0_1, %c0_2] : memref<144x128xbf16, #tpu.memory_space<vmem>>, vector<144x128xbf16>
    %cst = arith.constant dense<0.000000e+00> : vector<256x128xf32>
    %8 = tpu.matmul %6, %7, %cst {dimension_numbers = #tpu.dot_dimension_numbers<[1], [0], [0], [1], [0, 0, 1, 1], [], []>} : vector<256x144xbf16>, vector<144x128xbf16>, vector<256x128xf32> -> vector<256x128xf32>
    %c0_3 = arith.constant 0 : index
    %c0_4 = arith.constant 0 : index
    %9 = vector.load %arg6[%c0_3, %c0_4] : memref<1x128xf32, #tpu.memory_space<vmem>>, vector<1x128xf32>
    %10 = vector.broadcast %9 : vector<1x128xf32> to vector<256x128xf32>
    %11 = arith.addf %8, %10 : vector<256x128xf32>
    %cst_5 = arith.constant 0.000000e+00 : f32
    %12 = vector.broadcast %cst_5 : f32 to vector<256x128xf32>
    %13 = arith.maximumf %11, %12 : vector<256x128xf32>
    %14 = arith.truncf %13 : vector<256x128xf32> to vector<256x128xbf16>
    %c0_6 = arith.constant 0 : index
    %c0_7 = arith.constant 0 : index
    %c0_8 = arith.constant 0 : index
    %15 = vector.load %arg7[%c0_6, %c0_7, %c0_8] : memref<1x256x128xbf16, #tpu.memory_space<vmem>>, vector<1x256x128xbf16>
    %16 = vector.shape_cast %15 : vector<1x256x128xbf16> to vector<256x128xbf16>
    %17 = vector.shape_cast %14 : vector<256x128xbf16> to vector<1x256x128xbf16>
    tpu.vector_store %arg7[%c0_6, %c0_7, %c0_8], %17 {strides = array<i32>} : memref<1x256x128xbf16, #tpu.memory_space<vmem>>, vector<1x256x128xbf16>,
    return
  }
  func.func @transform_0(%arg0: i32, %arg1: i32) -> (i32, i32, i32) {
    %c0_i32 = arith.constant 0 : i32
    %c0_i32_0 = arith.constant 0 : i32
    %c0_i32_1 = arith.constant 0 : i32
    return %arg0, %c0_i32, %c0_i32_0 : i32, i32, i32
  }
  func.func @transform_1(%arg0: i32, %arg1: i32) -> (i32, i32) {
    %c0_i32 = arith.constant 0 : i32
    %c0_i32_0 = arith.constant 0 : i32
    %c0_i32_1 = arith.constant 0 : i32
    return %c0_i32, %c0_i32_0 : i32, i32
  }
  func.func @transform_2(%arg0: i32, %arg1: i32) -> (i32, i32) {
    %c0_i32 = arith.constant 0 : i32
    %c0_i32_0 = arith.constant 0 : i32
    %c0_i32_1 = arith.constant 0 : i32
    return %c0_i32, %c0_i32_0 : i32, i32
  }
  func.func @transform_3(%arg0: i32, %arg1: i32) -> (i32, i32) {
    %c0_i32 = arith.constant 0 : i32
    %c0_i32_0 = arith.constant 0 : i32
    %c0_i32_1 = arith.constant 0 : i32
    return %c0_i32, %c0_i32_0 : i32, i32
  }
  func.func @transform_4(%arg0: i32, %arg1: i32) -> (i32, i32) {
    %c0_i32 = arith.constant 0 : i32
    %c0_i32_0 = arith.constant 0 : i32
    %c0_i32_1 = arith.constant 0 : i32
    return %c0_i32, %c0_i32_0 : i32, i32
  }
  func.func @transform_5(%arg0: i32, %arg1: i32) -> (i32, i32, i32) {
    %c0_i32 = arith.constant 0 : i32
    %c0_i32_0 = arith.constant 0 : i32
    return %arg0, %arg1, %c0_i32 : i32, i32, i32
  }
}

</mosaic_0001>

<bundles_post_ra>
// kernel: fire_block_forward.1
= control target key start
LH: loop header
LB: loop body
LE: loop exit
PB: predicated region body
PF: predicated region fallthrough
CT: control target
= control target key end

     0   :  { %10 = vsyncpa [#allocation5], 0  ;;  %s6578_s0 = inlined_call_operand.vmem [shape: bf16[2,256,64], index: 0, kind: input, shape index: {}]   ;;  %s6579_s1 = inlined_call_operand.vmem [shape: bf16[64,16], index: 1, kind: input, shape index: {}]   ;;  %s6580_s2 = inlined_call_operand.vmem [shape: f32[1,16], index: 2, kind: input, shape index: {}]   ;;  %s6581_s3 = inlined_call_operand.vmem [shape: bf16[144,128], index: 3, kind: input, shape index: {}]   ;;  %s6582_s4 = inlined_call_operand.vmem [shape: f32[1,128], index: 4, kind: input, shape index: {}]   ;;  %s6583_s5 = inlined_call_operand.hbm [shape: bf16[2,256,128], index: 5, kind: output, shape index: {}]  }
   0x1   :  { %12 = vsyncpa [#allocation5 + $0x1], 0  ;;  %s4262_s18 = smov 0   ;;  %s4264_s19 = smov 0  }
   0x2   :  { %s4266_s20 = smov 0   ;;  %s4268_s21 = smov 0  }
   0x3   :  { %s4270_s22 = smov 0   ;;  %s4272_s23 = smov 0  }
   0x4 LB: > { %s3687_s24 = sadd.s32 4294967295, %s4219_s23   ;;  %s3688_s25 = sadd.s32 4294967294, %s4219_s23   ;;  %s4219_s23 = sphi %s4272_s23, %s18_s23   ;;  %s4215_s22 = sphi %s4270_s22, %s6837_s22   ;;  %s4211_s21 = sphi %s4268_s21, %s6836_s21   ;;  %s4207_s20 = sphi %s4266_s20, %s6835_s20   ;;  %s4203_s19 = sphi %s4264_s19, %s6834_s19   ;;  %s4199_s18 = sphi %s4262_s18, %s6833_s18  }
   0x5   : > { %s30_s26 = sadd.s32 1, %s4215_s22  ;;  %s149_s27 = sadd.s32 1, %s4207_s20 }
   0x6   : > { %p32_p0 = scmp.ge.s32.totalorder %s30_s26, 2  ;;  %p159_p1 = scmp.ne.s32.totalorder %s4207_s20, %s4203_s19 }
   0x7   : > { %p160_p2 = scmp.eq.s32.totalorder %s3687_s24, 1  ;;  %p165_p3 = scmp.ne.s32.totalorder %s4203_s19, %s4199_s18 }
   0x8   : > { %s6839_s26 = smov (%p32_p0, %s30_s26), 0  ;;  %p166_p5 = scmp.eq.s32.totalorder %s3688_s25, 1 }
   0x9   : > { %p4302_p4 = por %p160_p2, %p159_p1  ;;  %s144_s29 = ssub.s32 %s4215_s22, %s6839_s26 }
   0xa   : > { %p3691_p6 = scmp.ge.s32.totalorder %s4219_s23, 1  ;;  %p147_p7 = scmp.eq.s32.totalorder %s144_s29, 0 }
   0xb   : > { %p4309_p8 = por %p166_p5, %p165_p3  ;;  %p204_p9 = scmp.lt.s32.totalorder %s4219_s23, 3 }
   0xc   : > { %s4315_s6 = scalar_select %p147_p7, %s4207_s20, %s149_s27  }
   0xd   : > { %p205_p10 = pnand %p3691_p6, %p204_p9 }
   0xf   : > { %208 = sbr.rel (%p205_p10) target bundleno = 860 (0x35c), region = 40 }
  0x16   : > { %v4099_v0 = vld [vmem:[%s6579_s1] sm:$0xff]   ;;  %p232_p11 = scmp.lt.s32.totalorder %s4211_s21, 1  ;;  %v4100_v1 = vld [vmem:[%s6579_s1 + $0x8] sm:$0xff]   ;;  %vm6584_vm0 = vcmask 523264   ;;  %v4101_v2 = vld [vmem:[%s6579_s1 + $0x10] sm:$0xff]   ;;  %v691_v20 = vlaneseq  ;;  %vm245_vm1 = vcmask 130048  }
  0x17   : > { %3976 = vmatprep.subr.bf16.mxu0 %v4099_v0  ;;  %v4102_v4 = vld [vmem:[%s6579_s1 + $0x18] sm:$0xff]   ;;  %v6592_v24 = vmov 0   ;;  %vm4222_vm3 = vmmov 1   ;;  %s4223_s27 = smov 16   ;;  %s4224_s29 = smov 48  }
  0x18   : > { %s233_s11 = scalar_select %p232_p11, %s4211_s21, 1  ;;  %3977 = vmatpush3.bf16.msra.mxu0 %v4099_v0  ;;  %v4368_v21 = vshrl.u32 %v691_v20, 7  ;;  %249 = vst.msk [vmem:[#allocation2 + $0x18] sm:$0xff] %vm245_vm1, %v6592_v24  ;;  %246 = vst.msk [vmem:[#allocation2] sm:$0xff] %vm245_vm1, %v6592_v24  ;;  %4016 = vmatprep.subr.bf16.mxu1 %v6592_v24 }
  0x19   : > { %3978 = vmatprep.subr.bf16.mxu0 %v4100_v1  ;;  %247 = vst.msk [vmem:[#allocation2 + $0x8] sm:$0xff] %vm245_vm1, %v6592_v24  ;;  %248 = vst.msk [vmem:[#allocation2 + $0x10] sm:$0xff] %vm245_vm1, %v6592_v24  ;;  %s4225_s7 = smov 32   ;;  %s4226_s10 = smov 96  }
  0x1a   : > { %s3827_s14 = sshll.u32 %s233_s11, 7  ;;  %v693_v22 = vadd.s32 8, %v4368_v21  ;;  %250 = vst.msk [vmem:[#allocation2 + $0x20] sm:$0xff] %vm245_vm1, %v6592_v24  ;;  %251 = vst.msk [vmem:[#allocation2 + $0x28] sm:$0xff] %vm245_vm1, %v6592_v24  ;;  %v728_v25 = vand.u32 15, %v4368_v21  ;;  %v694_v46 = vadd.s32 16, %v4368_v21 }
  0x1b   : > { %s4331_s17 = scalar_lea.vmem %s6578_s0, %s3827_s14  ;;  %252 = vst.msk [vmem:[#allocation2 + $0x30] sm:$0xff] %vm245_vm1, %v6592_v24  ;;  %253 = vst.msk [vmem:[#allocation2 + $0x38] sm:$0xff] %vm245_vm1, %v6592_v24  ;;  %v695_v48 = vadd.s32 24, %v4368_v21  ;;  %v696_v49 = vadd.s32 32, %v4368_v21  ;;  %v697_v52 = vadd.s32 40, %v4368_v21  ;;  %v699_v55 = vadd.s32 56, %v4368_v21 }
  0x1c   : > { %v4103_v3 = vld [vmem:[%s4331_s17] sm:$0xff]   ;;  %3979 = vmatpush3.bf16.msra.mxu0 %v4100_v1  ;;  %v4104_v5 = vld [vmem:[%s4331_s17 + $0x8] sm:$0xff]   ;;  %v4105_v6 = vld [vmem:[%s4331_s17 + $0x10] sm:$0xff]   ;;  %v735_v23 = vand.u32 15, %v693_v22  ;;  %254 = vst.msk [vmem:[#allocation2 + $0x40] sm:$0xff] %vm245_vm1, %v6592_v24  ;;  %vm1108_vm6 = vcmp.gt.s32.totalorder %v728_v25, 0 }
  0x1d   : > { %3980 = vmatprep.subr.bf16.mxu0 %v4101_v2  ;;  %3984 = vmatprep.mubr.msk.bf16.mxu0 %vm6584_vm0, %v4103_v3  ;;  %v4106_v7 = vld [vmem:[%s4331_s17 + $0x18] sm:$0xff]   ;;  %v4107_v8 = vld [vmem:[%s4331_s17 + $0x20] sm:$0xff]   ;;  %v4108_v9 = vld [vmem:[%s4331_s17 + $0x28] sm:$0xff]   ;;  %255 = vst.msk [vmem:[#allocation2 + $0x48] sm:$0xff] %vm245_vm1, %v6592_v24  ;;  %v742_v47 = vand.u32 15, %v694_v46  ;;  %v749_v50 = vand.u32 15, %v695_v48 }
  0x1e   : > { %v4109_v10 = vld [vmem:[%s4331_s17 + $0x30] sm:$0xff]   ;;  %v4110_v11 = vld [vmem:[%s4331_s17 + $0x38] sm:$0xff]   ;;  %v4111_v12 = vld [vmem:[%s4331_s17 + $0x40] sm:$0xff]   ;;  %256 = vst.msk [vmem:[#allocation2 + $0x50] sm:$0xff] %vm245_vm1, %v6592_v24  ;;  %vm1141_vm2 = vcmp.lt.s32.totalorder %v735_v23, 15  ;;  %v756_v51 = vand.u32 15, %v696_v49 }
  0x1f   : > { %v4112_v13 = vld [vmem:[%s4331_s17 + $0x48] sm:$0xff]   ;;  %v4113_v14 = vld [vmem:[%s4331_s17 + $0x50] sm:$0xff]   ;;  %v4114_v15 = vld [vmem:[%s4331_s17 + $0x58] sm:$0xff]   ;;  %257 = vst.msk [vmem:[#allocation2 + $0x58] sm:$0xff] %vm245_vm1, %v6592_v24  ;;  %vm1110_vm10 = vcmp.gt.s32.totalorder %v742_v47, 0  ;;  %vm1143_vm12 = vcmp.lt.s32.totalorder %v749_v50, 15 }
  0x20   : > { %3981 = vmatpush3.bf16.msra.mxu0 %v4101_v2  ;;  %v4115_v16 = vld [vmem:[%s4331_s17 + $0x60] sm:$0xff]   ;;  %v4116_v17 = vld [vmem:[%s4331_s17 + $0x68] sm:$0xff]   ;;  %v4117_v18 = vld [vmem:[%s4331_s17 + $0x70] sm:$0xff]   ;;  %258 = vst.msk [vmem:[#allocation2 + $0x60] sm:$0xff] %vm245_vm1, %v6592_v24  ;;  %vm1112_vm13 = vcmp.gt.s32.totalorder %v756_v51, 0  ;;  %v763_v54 = vand.u32 15, %v697_v52 }
  0x21   : > { %3982 = vmatprep.subr.bf16.mxu0 %v4102_v4  ;;  %v4118_v19 = vld [vmem:[%s4331_s17 + $0x78] sm:$0xff]   ;;  %259 = vst.msk [vmem:[#allocation2 + $0x68] sm:$0xff] %vm245_vm1, %v6592_v24  ;;  %260 = vst.msk [vmem:[#allocation2 + $0x70] sm:$0xff] %vm245_vm1, %v6592_v24  ;;  %v4419_v29 = vld [vmem:[#allocation2 + $0x8] sm:$0xff]  ;;  %v698_v57 = vadd.s32 48, %v4368_v21  ;;  %v777_v59 = vand.u32 15, %v699_v55 }
  0x22   : > { %261 = vst.msk [vmem:[#allocation2 + $0x78] sm:$0xff] %vm245_vm1, %v6592_v24  ;;  %262 = vst.msk [vmem:[#allocation2 + $0x80] sm:$0xff] %vm245_vm1, %v6592_v24  ;;  %v1941_v32 = vshll.u32 %v4419_v29, 16  ;;  %v1866_v41 = vld [vmem:[#allocation2 + $0x8] sm:$0x80]  ;;  %v700_v61 = vadd.s32 64, %v4368_v21 }
  0x23   : > { %263 = vst.msk [vmem:[#allocation2 + $0x88] sm:$0xff] %vm245_vm1, %v6592_v24  ;;  %264 = vst.msk [vmem:[#allocation2 + $0x90] sm:$0xff] %vm245_vm1, %v6592_v24  ;;  %v770_v0 = vand.u32 15, %v698_v57  ;;  %v703_v1 = vadd.s32 88, %v4368_v21  ;;  %v701_v3 = vadd.s32 72, %v4368_v21  ;;  %v705_v22 = vadd.s32 104, %v4368_v21 }
  0x24   : > { %3983 = vmatpush3.bf16.msra.mxu0 %v4102_v4  ;;  %265 = vst.msk [vmem:[#allocation2 + $0x98] sm:$0xff] %vm245_vm1, %v6592_v24  ;;  %vm1254_vm4 = vmpackc.low %vm4222_vm3, %vm4222_vm3  ;;  %v4426_v36 = vrot.slane %v1941_v32, 1  ;;  %v707_v32 = vadd.s32 120, %v4368_v21  ;;  %v709_v52 = vadd.s32 136, %v4368_v21  ;;  %s4227_s11 = smov 80   ;;  %s4228_s12 = smov 112  }
  0x25   : > { %3243 = vmatprep.subr.bf16.mxu0 %v6592_v24  ;;  %v4415_v26 = vsel %vm1254_vm4, 65537, %v6592_v24  ;;  %vm1593_vm5 = vmpackc.low %vm1141_vm2, %vm1141_vm2  ;;  %vm1145_vm2 = vcmp.lt.s32.totalorder %v763_v54, 15  ;;  %vm4469_vm4 = vcmp.lt.s32.totalorder %v777_v59, 15  ;;  %v819_v47 = vand.u32 15, %v705_v22  ;;  %s4229_s13 = smov 64  }
  0x26   : > { %v1625_v27 = vsel %vm1593_vm5, 65537, %v6592_v24  ;;  %vm1253_vm7 = vmpackc.low %vm1108_vm6, %vm1108_vm6  ;;  %2067 = vrot.lane.b32.xlu1 %v4426_v36, %s4223_s27  ;;  %vm4475_vm5 = vcmp.gt.s32.totalorder %v770_v0, 0  ;;  %v833_v51 = vand.u32 15, %v707_v32  ;;  %v708_v59 = vadd.s32 128, %v4368_v21 }
  0x27   : > { %3985 = vmatmul.mubr.msk.bf16.vlgmr.msra.gmra.mrb[0].mxu0 %vm6584_vm0, %v4104_v5  ;;  %v3748_v28 = vcombine.low %v4415_v26, %v1625_v27  ;;  %v1285_v30 = vsel %vm1253_vm7, 65537, %v6592_v24  ;;  %vm1255_vm11 = vmpackc.low %vm1110_vm10, %vm1110_vm10  ;;  %v711_v0 = vadd.s32 152, %v4368_v21 }
  0x28   : > { %3988 = vmatprep.mubr.msk.bf16.mxu0 %vm6584_vm0, %v4105_v6  ;;  %v3732_v33 = vcombine.low %v1285_v30, %v4415_v26  ;;  %v1287_v53 = vsel %vm1255_vm11, 65537, %v6592_v24  ;;  %vm1595_vm14 = vmpackc.low %vm1143_vm12, %vm1143_vm12  ;;  %v784_v6 = vand.u32 15, %v700_v61  ;;  %vm1365_vm11 = vsmask.f32 7424 }
  0x29   : > { %v1706_v31 = vshrl.u32 %v3748_v28, 16  ;;  %v1709_v34 = vshll.u32 %v3748_v28, 16  ;;  %v3733_v56 = vcombine.low %v1287_v53, %v4415_v26  ;;  %vm1257_vm15 = vmpackc.low %vm1112_vm13, %vm1112_vm13  ;;  %v1627_v58 = vsel %vm1595_vm14, 65537, %v6592_v24 }
  0x2a   : > { %v1367_v37 = vshll.u32 %v3732_v33, 16  ;;  %v1370_v40 = vshrl.u32 %v3732_v33, 16  ;;  %v1289_v60 = vsel %vm1257_vm15, 65537, %v6592_v24  ;;  %vm1597_vm3 = vmpackc.low %vm1145_vm2, %vm1145_vm2  ;;  %v3749_v63 = vcombine.low %v4415_v26, %v1627_v58 }
  0x2b   : > { %v4424_v35 = vrot.slane %v1706_v31, 7  ;;  %v1374_v62 = vshll.u32 %v3733_v56, 16  ;;  %v4466_v2 = vcombine.low %v1289_v60, %v4415_v26  ;;  %v1629_v5 = vsel %vm1597_vm3, 65537, %v6592_v24  ;;  %vm1599_vm6 = vmpackc.low %vm4469_vm4, %vm4469_vm4 }
  0x2c   : > { %v4433_v39 = vrot.slane %v1367_v37, 1  ;;  %vm4484_vm7 = vcmp.gt.s32.totalorder %v784_v6, 0  ;;  %vm1259_vm10 = vmpackc.low %vm4475_vm5, %vm4475_vm5  ;;  %v1631_v23 = vsel %vm1599_vm6, 65537, %v6592_v24  ;;  %v1716_v27 = vshll.u32 %v3749_v63, 16 }
  0x2d   : > { %v4429_v38 = vor.u32 %v1709_v34, %v4424_v35  ;;  %vm1261_vm13 = vmpackc.low %vm4484_vm7, %vm4484_vm7  ;;  %v1291_v33 = vsel %vm1259_vm10, 65537, %v6592_v24  ;;  %vm1704_vm3 = vsmask.f32 256  ;;  %vm4549_vm7 = vcmp.lt.s32.totalorder %v819_v47, 15 }
  0x2e   : > { %6653 = vst [vmem:[#allocation7_spill] sm:$0xff] %v4433_v39  ;;  %vm6586_vm9 = vcmp.ne.s16.totalorder %v4433_v39, 0  ;;  %v4443_v43 = vor.u32 %v1370_v40, %v4433_v39  ;;  %v3751_v40 = vcombine.low %v4415_v26, %v1631_v23  ;;  %v1293_v49 = vsel %vm1261_vm13, 65537, %v6592_v24  ;;  %vm1605_vm13 = vmpackc.low %vm4549_vm7, %vm4549_vm7 }
  0x2f   : > { %3989 = vmatmul.mubr.msk.bf16.gmra.mrb[4].mxu0 %vm6584_vm0, %v4106_v7  ;;  %vm1832_vm8 = vcmp.ne.s16.totalorder %v4429_v38, 0  ;;  %v1868_v44 = vsel %vm6586_vm9, %v1866_v41, 0  ;;  %v702_v7 = vadd.s32 80, %v4368_v21  ;;  %v3735_v50 = vcombine.low %v1291_v33, %v4415_v26 }
  0x30   : > { %3992 = vmatprep.mubr.msk.bf16.mxu0 %vm6584_vm0, %v4107_v8  ;;  %v4440_v42 = vsel %vm1832_vm8, %v4419_v29, 0  ;;  %2203 = vrot.lane.b32.xlu1 %v1868_v44, %s4224_s29  ;;  %v1376_v8 = vrot.slane %v1374_v62, 1  ;;  %v4547_v57 = vcombine.low %v1293_v49, %v4415_v26  ;;  %v1386_v61 = vshrl.u32 %v4466_v2, 16 }
  0x31   : > { %v2119_v45 = vrot.slane %v4440_v42, 1  ;;  %v1390_v6 = vshll.u32 %v3735_v50, 16 }
  0x32   : > { %v4520_v44 = vsel %vm1365_vm11, %v4443_v43, %v1376_v8 }
  0x33   : > { %2152 = vrot.lane.b32.xlu0 %v2119_v45, %s4225_s7  ;;  %6666 = vst [vmem:[#allocation8_spill] sm:$0xff] %v4520_v44  ;;  %v1392_v23 = vrot.slane %v1390_v6, 1 }
  0x37   : > { %3993 = vmatmul.mubr.msk.bf16.gmra.mrb[8].mxu0 %vm6584_vm0, %v4108_v9  ;;  %v1378_v9 = vshrl.u32 %v3733_v56, 16  ;;  %v1729_v56 = vshrl.u32 %v3751_v40, 16 }
  0x38   : > { %3996 = vmatprep.mubr.msk.bf16.mxu0 %vm6584_vm0, %v4109_v10  ;;  %v1713_v10 = vshrl.u32 %v3749_v63, 16 }
  0x39   : > { %v1380_v20 = vor.u32 %v1378_v9, %v1376_v8  ;;  %v1398_v8 = vshll.u32 %v4547_v57, 16 }
  0x3a   : > { %v4495_v25 = vrot.slane %v1713_v10, 7  ;;  %v840_v10 = vand.u32 15, %v708_v59 }
  0x3b   : > { %v4619_v37 = vrot.slane %v1398_v8, 1 }
  0x3c   : > { %v1718_v48 = vor.u32 %v1716_v27, %v4495_v25 }
  0x3f   : > { %3997 = vmatmul.mubr.msk.bf16.gmra.mrb[12].mxu0 %vm6584_vm0, %v4110_v11  ;;  %v1732_v11 = vshll.u32 %v3751_v40, 16 }
  0x40   : > { %4000 = vmatprep.mubr.msk.bf16.mxu0 %vm6584_vm0, %v4111_v12  ;;  %v805_v12 = vand.u32 15, %v703_v1  ;;  %v4560_v1 = vsel %vm1704_vm3, %v4424_v35, %v1718_v48 }
  0x42   : > { %vm4497_vm12 = vcmp.lt.s32.totalorder %v805_v12, 15  ;;  %v1394_v12 = vshrl.u32 %v3735_v50, 16 }
  0x43   : > { %vm1603_vm2 = vmpackc.low %vm4497_vm12, %vm4497_vm12  ;;  %vm4566_vm12 = vcmp.lt.s32.totalorder %v833_v51, 15 }
  0x44   : > { %v1635_v55 = vsel %vm1603_vm2, 65537, %v6592_v24 }
  0x47   : > { %4001 = vmatmul.mubr.msk.bf16.gmra.mrb[16].mxu0 %vm6584_vm0, %v4112_v13  ;;  %v1382_v13 = vshll.u32 %v4466_v2, 16  ;;  %v847_v2 = vand.u32 15, %v709_v52 }
  0x48   : > { %4004 = vmatprep.mubr.msk.bf16.mxu0 %vm6584_vm0, %v4113_v14  ;;  %v3750_v14 = vcombine.low %v4415_v26, %v1629_v5 }
  0x49   : > { %v1384_v30 = vrot.slane %v1382_v13, 1  ;;  %vm4589_vm2 = vcmp.lt.s32.totalorder %v847_v2, 15 }
  0x4a   : > { %v1721_v31 = vshrl.u32 %v3750_v14, 16  ;;  %v1724_v43 = vshll.u32 %v3750_v14, 16 }
  0x4b   : > { %v4523_v46 = vsel %vm1365_vm11, %v1380_v20, %v1384_v30  ;;  %v1388_v22 = vor.u32 %v1386_v61, %v1384_v30 }
  0x4c   : > { %6667 = vst [vmem:[#allocation9_spill] sm:$0xff] %v4523_v46  ;;  %v4539_v53 = vrot.slane %v1721_v31, 7 }
  0x4d   : > { %v4633_v51 = vsel %vm1365_vm11, %v1388_v22, %v1392_v23 }
  0x4e   : > { %v1726_v5 = vor.u32 %v1724_v43, %v4539_v53  ;;  %6682 = vst [vmem:[#allocation10_spill] sm:$0xff] %v4633_v51 }
  0x4f   : > { %4005 = vmatmul.mubr.msk.bf16.gmra.mrb[20].mxu0 %vm6584_vm0, %v4114_v15  ;;  %v791_v15 = vand.u32 15, %v701_v3  ;;  %v3753_v3 = vcombine.low %v4415_v26, %v1635_v55 }
  0x50   : > { %4008 = vmatprep.mubr.msk.bf16.mxu0 %vm6584_vm0, %v4115_v16  ;;  %v1637_v16 = vsel %vm1605_vm13, 65537, %v6592_v24  ;;  %v4595_v20 = vsel %vm1704_vm3, %v4495_v25, %v1726_v5  ;;  %v1396_v25 = vor.u32 %v1394_v12, %v1392_v23 }
  0x51   : > { %vm4504_vm14 = vcmp.lt.s32.totalorder %v791_v15, 15  ;;  %v861_v15 = vand.u32 15, %v711_v0  ;;  %v4610_v30 = vcombine.low %v4415_v26, %v1637_v16  ;;  %v1748_v47 = vshll.u32 %v3753_v3, 16 }
  0x52   : > { %vm1601_vm4 = vmpackc.low %vm4504_vm14, %vm4504_vm14  ;;  %v4647_v58 = vsel %vm1365_vm11, %v1396_v25, %v4619_v37 }
  0x53   : > { %v1633_v60 = vsel %vm1601_vm4, 65537, %v6592_v24  ;;  %vm4615_vm7 = vcmp.lt.s32.totalorder %v861_v15, 15  ;;  %6683 = vst [vmem:[#allocation11_spill] sm:$0xff] %v4647_v58  ;;  %v1756_v15 = vshll.u32 %v4610_v30, 16 }
  0x54   : > { %v3752_v35 = vcombine.low %v4415_v26, %v1633_v60  ;;  %v1753_v60 = vshrl.u32 %v4610_v30, 16 }
  0x56   : > { %v1737_v27 = vshrl.u32 %v3752_v35, 16  ;;  %v1740_v43 = vshll.u32 %v3752_v35, 16  ;;  %v4677_v14 = vrot.slane %v1753_v60, 7 }
  0x57   : > { %4009 = vmatmul.mubr.msk.bf16.gmra.mrb[24].mxu0 %vm6584_vm0, %v4116_v17  ;;  %v704_v17 = vadd.s32 96, %v4368_v21 }
  0x58   : > { %4012 = vmatprep.mubr.msk.bf16.mxu0 %vm6584_vm0, %v4117_v18  ;;  %v798_v18 = vand.u32 15, %v702_v7  ;;  %v4575_v7 = vrot.slane %v1729_v56, 7  ;;  %v4643_v56 = vld [vmem:[%s6580_s2] ss:$0 sm:$0xff] }
  0x59   : > { %v812_v34 = vand.u32 15, %v704_v17  ;;  %v1745_v17 = vshrl.u32 %v3753_v3, 16 }
  0x5a   : > { %vm4510_vm15 = vcmp.gt.s32.totalorder %v798_v18, 0  ;;  %v710_v18 = vadd.s32 144, %v4368_v21 }
  0x5b   : > { %vm1263_vm5 = vmpackc.low %vm4510_vm15, %vm4510_vm15  ;;  %vm4541_vm6 = vcmp.gt.s32.totalorder %v812_v34, 0  ;;  %v4621_v40 = vrot.slane %v1745_v17, 7 }
  0x5c   : > { %v1295_v62 = vsel %vm1263_vm5, 65537, %v6592_v24  ;;  %vm1265_vm10 = vmpackc.low %vm4541_vm6, %vm4541_vm6  ;;  %vm4603_vm5 = vcmp.gt.s32.totalorder %v840_v10, 0  ;;  %v854_v48 = vand.u32 15, %v710_v18 }
  0x5d   : > { %v3737_v9 = vcombine.low %v1295_v62, %v4415_v26  ;;  %v1297_v13 = vsel %vm1265_vm10, 65537, %v6592_v24  ;;  %vm1607_vm15 = vmpackc.low %vm4566_vm12, %vm4566_vm12  ;;  %v4659_v0 = vor.u32 %v1748_v47, %v4621_v40 }
  0x5e   : > { %v4598_v28 = vcombine.low %v1297_v13, %v4415_v26  ;;  %v1639_v32 = vsel %vm1607_vm15, 65537, %v6592_v24  ;;  %vm1609_vm6 = vmpackc.low %vm4589_vm2, %vm4589_vm2  ;;  %vm4661_vm13 = vcmp.gt.s32.totalorder %v854_v48, 0  ;;  %vm6585_vm15 = vcmp.ne.s16.totalorder %v4520_v44, 0 }
  0x5f   : > { %4013 = vmatmul.mubr.msk.bf16.gmra.mrb[28].mxu0 %vm6584_vm0, %v4118_v19  ;;  %v1944_v19 = vshrl.u32 %v4419_v29, 16  ;;  %v1734_v29 = vor.u32 %v1732_v11, %v4575_v7  ;;  %v1406_v33 = vshll.u32 %v3737_v9, 16  ;;  %vm1269_vm10 = vmpackc.low %vm4603_vm5, %vm4603_vm5  ;;  %v4630_v50 = vcombine.low %v4415_v26, %v1639_v32 }
  0x60   : > { %v1410_v52 = vshrl.u32 %v3737_v9, 16  ;;  %v1414_v54 = vshll.u32 %v4598_v28, 16  ;;  %v1641_v55 = vsel %vm1609_vm6, 65537, %v6592_v24  ;;  %vm1611_vm12 = vmpackc.low %vm4615_vm7, %vm4615_vm7  ;;  %v712_v11 = vadd.s32 160, %v4368_v21 }
  0x61   : > { %v4516_v41 = vor.u32 %v1944_v19, %v4426_v36  ;;  %v706_v36 = vadd.s32 112, %v4368_v21  ;;  %v4649_v59 = vrot.slane %v1406_v33, 1  ;;  %v4654_v61 = vsel %vm1704_vm3, %v4539_v53, %v1734_v29 }
  0x62   : > { %v1761_v5 = vshrl.u32 %v4630_v50, 16  ;;  %v4670_v53 = vcombine.low %v4415_v26, %v1641_v55  ;;  %v1643_v6 = vsel %vm1611_vm12, 65537, %v6592_v24  ;;  %v1416_v10 = vrot.slane %v1414_v54, 1 }
  0x63   : > { %v826_v63 = vand.u32 15, %v706_v36  ;;  %v4627_v36 = vrot.slane %v1737_v27, 7  ;;  %v1412_v9 = vor.u32 %v1410_v52, %v4649_v59  ;;  %v1418_v19 = vshrl.u32 %v4598_v28, 16 }
  0x64   : > { %v3757_v23 = vcombine.low %v4415_v26, %v1643_v6  ;;  %v4690_v31 = vrot.slane %v1761_v5, 7  ;;  %v1764_v29 = vshll.u32 %v4630_v50, 16  ;;  %v1769_v32 = vshrl.u32 %v4670_v53, 16 }
  0x65   : > { %vm4580_vm14 = vcmp.gt.s32.totalorder %v826_v63, 0  ;;  %v1301_v63 = vsel %vm1269_vm10, 65537, %v6592_v24  ;;  %v4666_v2 = vor.u32 %v1740_v43, %v4627_v36  ;;  %v868_v34 = vand.u32 15, %v712_v11 }
  0x66   : > { %vm1267_vm4 = vmpackc.low %vm4580_vm14, %vm4580_vm14  ;;  %v4681_v16 = vcombine.low %v1301_v63, %v4415_v26  ;;  %vm6619_vm2 = vcmp.ne.s16.totalorder %v4523_v46, 0  ;;  %v1758_v50 = vor.u32 %v1756_v15, %v4677_v14  ;;  %v1777_v54 = vshrl.u32 %v3757_v23, 16 }
  0x67   : > { %v1299_v49 = vsel %vm1267_vm4, 65537, %v6592_v24  ;;  %vm1271_vm14 = vmpackc.low %vm4661_vm13, %vm4661_vm13  ;;  %v4702_v3 = vrot.slane %v1769_v32, 7  ;;  %v1420_v6 = vor.u32 %v1418_v19, %v1416_v10  ;;  %vm4708_vm4 = vcmp.gt.s32.totalorder %v868_v34, 0 }
  0x68   : > { %v3739_v62 = vcombine.low %v1299_v49, %v4415_v26  ;;  %v1303_v30 = vsel %vm1271_vm14, 65537, %v6592_v24  ;;  %v1430_v49 = vshll.u32 %v4681_v16, 16  ;;  %vm1833_vm5 = vcmp.ne.s16.totalorder %v4560_v1, 0  ;;  %vm1273_vm6 = vmpackc.low %vm4708_vm4, %vm4708_vm4 }
  0x69   : > { %v4700_v63 = vcombine.low %v1303_v30, %v4415_v26  ;;  %v1402_v15 = vshrl.u32 %v4547_v57, 16  ;;  %v4728_v57 = vsel %vm1365_vm11, %v1412_v9, %v1416_v10  ;;  %v4733_v34 = vsel %vm1704_vm3, %v4575_v7, %v4666_v2 }
  0x6a   : > { %v1422_v22 = vshll.u32 %v3739_v62, 16  ;;  %v1426_v28 = vshrl.u32 %v3739_v62, 16  ;;  %6688 = vst [vmem:[#allocation12_spill] sm:$0xff] %v4728_v57  ;;  %vm1834_vm7 = vcmp.ne.s16.totalorder %v4595_v20, 0  ;;  %vm2118_vm10 = vcmask 1046528  }
  0x6b   : > { %vm6587_vm12 = vcmp.ne.s16.totalorder %v4733_v34, 0  ;;  %vm1835_vm13 = vcmp.ne.s16.totalorder %v4654_v61, 0  ;;  %vm6590_vm4 = vcmp.ne.s16.totalorder %v4633_v51, 0  ;;  %vm6618_vm0 = vcmp.ne.s16.totalorder %v4647_v58, 0 }
  0x6c   : > { %v1424_v52 = vrot.slane %v1422_v22, 1  ;;  %v4719_v22 = vrot.slane %v1777_v54, 7 }
  0xfa   : > { %v3986_v4 = vpop.f32.mrb[0].mxu0 }
  0xfb   : > { %v509_v35 = vadd.f32 %v3986_v4, %v4643_v56  ;;  %v500_v8 = vpop.f32.mrb[1].mxu0  ;;  %v1772_v4 = vshll.u32 %v4670_v53, 16  ;;  %v1428_v53 = vor.u32 %v1426_v28, %v1424_v52  ;;  %v4745_v28 = vsel %vm1704_vm3, %v4621_v40, %v1758_v50 }
  0xfc   : > { %v501_v12 = vadd.f32 %v4643_v56, %v500_v8  ;;  %v3987_v13 = vpop.f32.mrb[2].mxu0  ;;  %vm6588_vm14 = vcmp.ne.s16.totalorder %v4745_v28, 0 }
  0xfd   : > { %v512_v17 = vadd.f32 %v3987_v13, %v4643_v56  ;;  %v503_v18 = vpop.f32.mrb[3].mxu0  ;;  %v629_v25 = vmax.f32 %v509_v35, 0.0  ;;  %v1766_v35 = vor.u32 %v1764_v29, %v4690_v31  ;;  %v4715_v13 = vrot.slane %v1430_v49, 1 }
  0xfe   : > { %v504_v27 = vadd.f32 %v4643_v56, %v503_v18  ;;  %v627_v47 = vmax.f32 %v501_v12, 0.0 }
  0xff   : > { %v630_v33 = vmax.f32 %v512_v17, 0.0  ;;  %v4749_v9 = vsel %vm1704_vm3, %v4677_v14, %v1766_v35  ;;  %v4753_v7 = vsel %vm1365_vm11, %v1428_v53, %v4715_v13  ;;  %v4763_v14 = vor.u32 %v1402_v15, %v4619_v37 }
 0x100   : > { %v628_v48 = vmax.f32 %v504_v27, 0.0  ;;  %v1780_v27 = vshll.u32 %v3757_v23, 16  ;;  %v4738_v23 = vsel %vm1704_vm3, %v4627_v36, %v4659_v0  ;;  %6690 = vst [vmem:[#allocation14_spill] sm:$0xff] %v4753_v7  ;;  %v1305_v36 = vsel %vm1273_vm6, 65537, %v6592_v24 }
 0x101   : > { %v660_v43 = vpack.c.bf16 %v630_v33, %v629_v25  ;;  %v1438_v25 = vshll.u32 %v4700_v63, 16  ;;  %v1774_v33 = vor.u32 %v1772_v4, %v4702_v3  ;;  %v1442_v37 = vshrl.u32 %v4700_v63, 16 }
 0x102   : > { %v659_v55 = vpack.c.bf16 %v628_v48, %v627_v47  ;;  %v3990_v60 = vpop.f32.mrb[4].mxu0  ;;  %v4741_v48 = vsel %vm1365_vm11, %v1420_v6, %v1424_v52  ;;  %v1782_v0 = vor.u32 %v1780_v27, %v4719_v22  ;;  %v4788_v6 = vcombine.low %v1305_v36, %v4415_v26 }
 0x103   : > { %676 = vst.msk [vmem:[#allocation2 + $0x18] sm:$0xff] %vm245_vm1, %v660_v43  ;;  %v525_v62 = vadd.f32 %v3990_v60, %v4643_v56  ;;  %v516_v5 = vpop.f32.mrb[5].mxu0  ;;  %6689 = vst [vmem:[#allocation13_spill] sm:$0xff] %v4741_v48  ;;  %v4760_v40 = vrot.slane %v1438_v25, 1  ;;  %v4767_v52 = vsel %vm1704_vm3, %v4690_v31, %v1774_v33  ;;  %v713_v35 = vadd.s32 168, %v4368_v21 }
 0x104   : > { %675 = vst.msk [vmem:[#allocation2 + $0x10] sm:$0xff] %vm245_vm1, %v659_v55  ;;  %v517_v11 = vadd.f32 %v4643_v56, %v516_v5  ;;  %v3991_v12 = vpop.f32.mrb[6].mxu0  ;;  %v4794_v53 = vsel %vm1704_vm3, %v4702_v3, %v1782_v0  ;;  %v4821_v0 = vadd.s32 176, %v4368_v21 }
 0x105   : > { %v633_v17 = vmax.f32 %v525_v62, 0.0  ;;  %v528_v18 = vadd.f32 %v3991_v12, %v4643_v56  ;;  %v519_v19 = vpop.f32.mrb[7].mxu0  ;;  %6691 = vst [vmem:[#allocation15_spill] sm:$0xff] %v4760_v40  ;;  %v4817_v33 = vor.u32 %v1442_v37, %v4760_v40  ;;  %v6701_v40 = vmov 0  }
 0x106   : > { %v631_v29 = vmax.f32 %v517_v11, 0.0  ;;  %v520_v32 = vadd.f32 %v4643_v56, %v519_v19 }
 0x107   : > { %v634_v30 = vmax.f32 %v528_v18, 0.0 }
 0x108   : > { %v632_v47 = vmax.f32 %v520_v32, 0.0 }
 0x109   : > { %v662_v10 = vpack.c.bf16 %v634_v30, %v633_v17 }
 0x10a   : > { %v661_v2 = vpack.c.bf16 %v632_v47, %v631_v29  ;;  %v4757_v49 = vld [vmem:[#allocation2 + $0x18] sm:$0xff]  ;;  %v3994_v43 = vpop.f32.mrb[8].mxu0  ;;  %v875_v47 = vand.u32 15, %v713_v35 }
 0x10b   : > { %678 = vst.msk [vmem:[#allocation2 + $0x28] sm:$0xff] %vm245_vm1, %v662_v10  ;;  %v1906_v50 = vsel %vm6585_vm15, %v4757_v49, 0  ;;  %v1870_v54 = vsel %vm6619_vm2, %v4757_v49, 0  ;;  %v541_v55 = vadd.f32 %v3994_v43, %v4643_v56  ;;  %v532_v60 = vpop.f32.mrb[9].mxu0  ;;  %v4777_v4 = vld [vmem:[#allocation2 + $0x10] sm:$0xff]  ;;  %v1923_v15 = vsel %vm1832_vm8, %v4757_v49, 0 }
 0x10c   : > { %677 = vst.msk [vmem:[#allocation2 + $0x20] sm:$0xff] %vm245_vm1, %v661_v2  ;;  %2382 = vrot.lane.b32.xlu1 %v1906_v50, %s4226_s10  ;;  %2207 = vrot.lane.b32.xlu0 %v1870_v54, %s4224_s29  ;;  %v533_v31 = vadd.f32 %v4643_v56, %v532_v60  ;;  %v3995_v62 = vpop.f32.mrb[10].mxu0  ;;  %v1886_v5 = vsel %vm1832_vm8, %v4777_v4, 0  ;;  %v1956_v19 = vshll.u32 %v4757_v49, 16  ;;  %v1869_v29 = vsel %vm6585_vm15, %v4777_v4, 0 }
 0x10d   : > { %v637_v63 = vmax.f32 %v541_v55, 0.0  ;;  %v544_v8 = vadd.f32 %v3995_v62, %v4643_v56  ;;  %v535_v11 = vpop.f32.mrb[11].mxu0  ;;  %v2296_v12 = vrot.slane %v1886_v5, 1  ;;  %v4807_v32 = vsel %vm1833_vm5, %v4757_v49, 0  ;;  %v1903_v25 = vld [vmem:[#allocation2 + $0x10] sm:$0x80] }
 0x10e   : > { %v635_v17 = vmax.f32 %v533_v31, 0.0  ;;  %v536_v18 = vadd.f32 %v4643_v56, %v535_v11  ;;  %v4812_v38 = vsel %vm1833_vm5, %v4777_v4, 0  ;;  %v2473_v10 = vrot.slane %v1923_v15, 1 }
 0x10f   : > { %v638_v27 = vmax.f32 %v544_v8, 0.0  ;;  %v4824_v2 = vadd.s32 184, %v4368_v21  ;;  %v4826_v50 = vrot.slane %v1956_v19, 1  ;;  %v6591_v55 = vrot.slane %v4807_v32, 1 }
 0x110   : > { %v636_v3 = vmax.f32 %v536_v18, 0.0  ;;  %2329 = vrot.lane.b32.xlu1 %v2296_v12, %s4227_s11  ;;  %2205 = vrot.lane.b32.xlu0 %v1869_v29, %s4224_s29  ;;  %v2120_v60 = vrot.slane %v4812_v38, 1  ;;  %v1905_v31 = vsel %vm6586_vm9, %v1903_v25, 0  ;;  %vm4853_vm8 = vcmp.lt.s32.totalorder %v875_v47, 15 }
 0x111   : > { %v664_v36 = vpack.c.bf16 %v638_v27, %v637_v63  ;;  %v1948_v63 = vshll.u32 %v4777_v4, 16  ;;  %v2777_v27 = vshrl.u32 %v2473_v10, 16  ;;  %v2298_v1 = vsel %vm2118_vm10, %v2296_v12, %v6591_v55  ;;  %vm1613_vm6 = vmpackc.low %vm4853_vm8, %vm4853_vm8 }
 0x112   : > { %v663_v43 = vpack.c.bf16 %v636_v3, %v635_v17  ;;  %v3998_v54 = vpop.f32.mrb[12].mxu0  ;;  %v4830_v37 = vld [vmem:[#allocation2 + $0x28] sm:$0xff]  ;;  %v2121_v47 = vsel %vm2118_vm10, %v2119_v45, %v2120_v60  ;;  %v4878_v45 = vsel %vm1834_vm7, %v4757_v49, 0  ;;  %vm1837_vm15 = vcmp.ne.s16.totalorder %v4738_v23, 0 }
 0x113   : > { %680 = vst.msk [vmem:[#allocation2 + $0x38] sm:$0xff] %vm245_vm1, %v664_v36  ;;  %v557_v62 = vadd.f32 %v3998_v54, %v4643_v56  ;;  %v548_v5 = vpop.f32.mrb[13].mxu0  ;;  %v4836_v35 = vld [vmem:[#allocation2 + $0x20] sm:$0xff]  ;;  %v4842_v8 = vsel %vm1834_vm7, %v4830_v37, 0  ;;  %vm1839_vm9 = vcmp.ne.s16.totalorder %v4749_v9, 0  ;;  %v6710_v61 = vrot.slane %v4807_v32, 1 }
 0x114   : > { %679 = vst.msk [vmem:[#allocation2 + $0x30] sm:$0xff] %vm245_vm1, %v663_v43  ;;  %2422 = vrot.lane.b32.xlu1 %v4826_v50, %s4228_s12  ;;  %2380 = vrot.lane.b32.xlu0 %v1905_v31, %s4226_s10  ;;  %v549_v11 = vadd.f32 %v4643_v56, %v548_v5  ;;  %v1924_v15 = vsel %vm1833_vm5, %v4836_v35, 0  ;;  %v3999_v17 = vpop.f32.mrb[14].mxu0  ;;  %v2476_v18 = vrot.slane %v4842_v8, 1  ;;  %v1950_v5 = vrot.slane %v1948_v63, 1 }
 0x115   : > { %v641_v29 = vmax.f32 %v557_v62, 0.0  ;;  %v2474_v3 = vrot.slane %v1924_v15, 1  ;;  %v560_v25 = vadd.f32 %v3999_v17, %v4643_v56  ;;  %v551_v36 = vpop.f32.mrb[15].mxu0  ;;  %v1952_v17 = vshrl.u32 %v4777_v4, 16 }
 0x116   : > { %v639_v43 = vmax.f32 %v549_v11, 0.0  ;;  %v552_v54 = vadd.f32 %v4643_v56, %v551_v36  ;;  %vm6617_vm5 = vcmp.ne.s16.totalorder %v4728_v57, 0  ;;  %v1951_v4 = vsel %vm1365_vm11, %v4516_v41, %v1950_v5 }
 0x117   : > { %v2475_v31 = vsel %vm2118_vm10, %v2473_v10, %v2474_v3  ;;  %v642_v62 = vmax.f32 %v560_v25, 0.0  ;;  %v2477_v11 = vsel %vm2118_vm10, %v2474_v3, %v2476_v18  ;;  %v889_v3 = vand.u32 15, %v4824_v2 }
 0x118   : > { %v2781_v15 = vshrl.u32 %v2475_v31, 16  ;;  %2331 = vrot.lane.b32.xlu0 %v2298_v1, %s4227_s11  ;;  %2154 = vrot.lane.b32.xlu1 %v2121_v47, %s4225_s7  ;;  %v640_v42 = vmax.f32 %v552_v54, 0.0  ;;  %v2796_v12 = vshrl.u32 %v2477_v11, 16  ;;  %v2799_v63 = vshll.u32 %v2477_v11, 16 }
 0x119   : > { %v666_v10 = vpack.c.bf16 %v642_v62, %v641_v29  ;;  %v2784_v36 = vshll.u32 %v2475_v31, 16  ;;  %v6589_v2 = vrot.slane %v4878_v45, 1  ;;  %v1954_v31 = vor.u32 %v1952_v17, %v1950_v5 }
 0x11a   : > { %v2783_v25 = vrot.slane %v2781_v15, 7  ;;  %v665_v1 = vpack.c.bf16 %v640_v42, %v639_v43  ;;  %v4002_v47 = vpop.f32.mrb[16].mxu0  ;;  %v4884_v54 = vrot.slane %v2796_v12, 7  ;;  %v2779_v62 = vrot.slane %v2777_v27, 7  ;;  %v4903_v17 = vld [vmem:[#allocation2 + $0x38] sm:$0xff] }
 0x11b   : > { %682 = vst.msk [vmem:[#allocation2 + $0x48] sm:$0xff] %vm245_vm1, %v666_v10  ;;  %v573_v29 = vadd.f32 %v4002_v47, %v4643_v56  ;;  %v564_v43 = vpop.f32.mrb[17].mxu0  ;;  %v1959_v19 = vsel %vm1365_vm11, %v1954_v31, %v4826_v50  ;;  %v1927_v38 = vsel %vm6587_vm12, %v4903_v17, 0  ;;  %vm4935_vm8 = vcmp.lt.s32.totalorder %v889_v3, 15 }
 0x11c   : > { %v2786_v11 = vor.u32 %v2784_v36, %v2783_v25  ;;  %681 = vst.msk [vmem:[#allocation2 + $0x40] sm:$0xff] %vm245_vm1, %v665_v1  ;;  %2245 = vrot.lane.b32.xlu0 %v1950_v5, %s4229_s13  ;;  %2069 = vrot.lane.b32.xlu1 %v1951_v4, %s4223_s27  ;;  %v2801_v15 = vor.u32 %v2799_v63, %v4884_v54  ;;  %v4003_v41 = vpop.f32.mrb[18].mxu0  ;;  %v4905_v36 = vld [vmem:[#allocation2 + $0x30] sm:$0xff]  ;;  %v882_v5 = vand.u32 15, %v4821_v0  ;;  %v1645_v63 = vsel %vm1613_vm6, 65537, %v6592_v24  ;;  %vm1615_vm12 = vmpackc.low %vm4935_vm8, %vm4935_vm8 }
 0x11d   : > { %v565_v42 = vadd.f32 %v4643_v56, %v564_v43  ;;  %v645_v12 = vmax.f32 %v573_v29, 0.0  ;;  %v576_v27 = vadd.f32 %v4003_v41, %v4643_v56  ;;  %v567_v10 = vpop.f32.mrb[19].mxu0  ;;  %6694 = vst [vmem:[#allocation16_spill] sm:$0xff] %v4905_v36  ;;  %v2123_v0 = vsel %vm2118_vm10, %v2120_v60, %v6589_v2 }
 0x11e   : > { %v2787_v1 = vsel %vm1704_vm3, %v2779_v62, %v2786_v11  ;;  %v2802_v47 = vsel %vm1704_vm3, %v2783_v25, %v2801_v15  ;;  %v568_v29 = vadd.f32 %v4643_v56, %v567_v10  ;;  %v1972_v62 = vshll.u32 %v4830_v37, 16 }
 0x11f   : > { %v643_v4 = vmax.f32 %v565_v42, 0.0  ;;  %3046 = vst.msk [vmem:[#allocation3 + $0x8] sm:$0xff] %vm245_vm1, %v2787_v1  ;;  %3048 = vst.msk [vmem:[#allocation3 + $0x18] sm:$0xff] %vm245_vm1, %v2802_v47  ;;  %v646_v43 = vmax.f32 %v576_v27, 0.0  ;;  %v1926_v11 = vsel %vm1835_vm13, %v4905_v36, 0  ;;  %vm4939_vm6 = vcmp.gt.s32.totalorder %v882_v5, 0 }
 0x120   : > { %2156 = vrot.lane.b32.xlu0 %v2123_v0, %s4225_s7  ;;  %2247 = vrot.lane.b32.xlu1 %v1959_v19, %s4229_s13  ;;  %v644_v25 = vmax.f32 %v568_v29, 0.0  ;;  %v2478_v15 = vrot.slane %v1926_v11, 1  ;;  %v4944_v41 = vcombine.low %v4415_v26, %v1645_v63  ;;  %v1908_v10 = vsel %vm6590_vm4, %v4830_v37, 0 }
 0x121   : > { %v668_v31 = vpack.c.bf16 %v646_v43, %v645_v12  ;;  %v1976_v1 = vshrl.u32 %v4830_v37, 16  ;;  %v2480_v47 = vrot.slane %v1927_v38, 1  ;;  %v4119_v12 = vld [vmem:[%s6581_s3] sm:$0xff]   ;;  %v4958_v5 = vrot.slane %v1972_v62, 1 }
 0x122   : > { %v667_v27 = vpack.c.bf16 %v644_v25, %v643_v4  ;;  %v4950_v3 = vld [vmem:[#allocation2 + $0x48] sm:$0xff]  ;;  %v4952_v29 = vpop.f32.mrb[20].mxu0  ;;  %v1980_v63 = vshll.u32 %v4905_v36, 16  ;;  %v2479_v0 = vsel %vm2118_vm10, %v2476_v18, %v2478_v15  ;;  %3244 = vmatpush1.bf16.msra.mxu0 %v4119_v12  ;;  %4025 = vmatpush1.bf16.msra.mxu1 %v4119_v12  ;;  %vm1501_vm4 = vcmp.ne.s16.totalorder %v4753_v7, 0 }
 0x123   : > { %684 = vst.msk [vmem:[#allocation2 + $0x58] sm:$0xff] %vm245_vm1, %v668_v31  ;;  %v4964_v4 = vsel %vm6588_vm14, %v4950_v3, 0  ;;  %v4969_v43 = vld [vmem:[#allocation2 + $0x40] sm:$0xff]  ;;  %v4972_v25 = vpop.f32.mrb[21].mxu0  ;;  %vm1500_vm14 = vcmp.ne.s16.totalorder %v4741_v48, 0  ;;  %v2481_v18 = vsel %vm2118_vm10, %v2478_v15, %v2480_v47  ;;  %v2811_v62 = vshrl.u32 %v2479_v0, 16  ;;  %3245 = vmatprep.subr.bf16.mxu0 %v6592_v24  ;;  %4017 = vmatprep.subr.bf16.mxu1 %v6592_v24 }
 0x124   : > { %683 = vst.msk [vmem:[#allocation2 + $0x50] sm:$0xff] %vm245_vm1, %v667_v27  ;;  %2386 = vrot.lane.b32.xlu0 %v1908_v10, %s4226_s10  ;;  %2071 = vrot.lane.b32.xlu1 %v1959_v19, %s4223_s27  ;;  %v2814_v11 = vshll.u32 %v2479_v0, 16  ;;  %v4983_v38 = vpop.f32.mrb[22].mxu0  ;;  %v1874_v31 = vsel %vm6617_vm5, %v4903_v17, 0  ;;  %v2826_v30 = vshrl.u32 %v2481_v18, 16  ;;  %v2829_v27 = vshll.u32 %v2481_v18, 16 }
 0x125   : > { %v1928_v19 = vsel %vm1837_vm15, %v4969_v43, 0  ;;  %v4991_v10 = vpop.f32.mrb[23].mxu0  ;;  %v2813_v15 = vrot.slane %v2811_v62, 7  ;;  %v1785_v55 = vshrl.u32 %v4944_v41, 16  ;;  %v1647_v18 = vsel %vm1615_vm12, 65537, %v6592_v24  ;;  %v4120_v12 = vld [vmem:[%s6581_s3 + $0x8] sm:$0xff]   ;;  %vm1275_vm12 = vmpackc.low %vm4939_vm6, %vm4939_vm6 }
 0x126   : > { %v3084_v2 = vld [vmem:[#allocation3 + $0x8] sm:$0xff]  ;;  %v2482_v0 = vrot.slane %v1928_v19, 1  ;;  %v1872_v62 = vsel %vm6618_vm0, %v4830_v37, 0  ;;  %v1978_v19 = vor.u32 %v1976_v1, %v4958_v5  ;;  %v5011_v8 = vrot.slane %v1980_v63, 1  ;;  %3246 = vmatpush1.bf16.msra.mxu0 %v4120_v12  ;;  %4026 = vmatpush1.bf16.msra.mxu1 %v4120_v12 }
 0x127   : > { %3774 = vmatprep.mubr.msk.bf16.mxu0 %vm245_vm1, %v3084_v2  ;;  %v5013_v60 = vrot.slane %v2826_v30, 7  ;;  %v2816_v24 = vor.u32 %v2814_v11, %v2813_v15  ;;  %v6700_v58 = vrot.slane %v4964_v4, 1  ;;  %v716_v1 = vadd.s32 192, %v4368_v21  ;;  %3247 = vmatprep.subr.bf16.mxu0 %v6701_v40 }
 0x128   : > { %2211 = vrot.lane.b32.xlu0 %v1872_v62, %s4224_s29  ;;  %2215 = vrot.lane.b32.xlu1 %v1874_v31, %s4224_s29  ;;  %v2483_v2 = vsel %vm2118_vm10, %v2480_v47, %v2482_v0  ;;  %v5027_v36 = vcombine.low %v4415_v26, %v1647_v18  ;;  %v5065_v12 = vsel %vm1834_vm7, %v4836_v35, 0  ;;  %vm1840_vm7 = vcmp.ne.s16.totalorder %v4767_v52, 0  ;;  %v6728_v52 = vld [vmem:[#allocation16_spill] sm:$0xff] }
 0x129   : > { %6699 = vst [vmem:[#allocation17_spill] sm:$0xff] %v5013_v60  ;;  %v2485_v44 = vsel %vm2118_vm10, %v2482_v0, %v6700_v58  ;;  %v2831_v30 = vor.u32 %v2829_v27, %v5013_v60  ;;  %v2817_v11 = vsel %vm1704_vm3, %v4884_v54, %v2816_v24  ;;  %v2844_v31 = vshll.u32 %v2483_v2, 16  ;;  %4018 = vmatprep.subr.bf16.mxu1 %v6701_v40 }
 0x12a   : > { %v2856_v63 = vshrl.u32 %v2485_v44, 16  ;;  %v2859_v39 = vshll.u32 %v2485_v44, 16  ;;  %v2841_v47 = vshrl.u32 %v2483_v2, 16  ;;  %v5031_v62 = vpop.f32.mrb[24].mxu0  ;;  %v1307_v58 = vsel %vm1275_vm12, 65537, %v6701_v40  ;;  %v4121_v44 = vld [vmem:[%s6581_s3 + $0x10] sm:$0xff]  }
 0x12b   : > { %v1907_v24 = vsel %vm6619_vm2, %v4836_v35, 0  ;;  %v5049_v54 = vsel %vm1365_vm11, %v1978_v19, %v5011_v8  ;;  %v2832_v42 = vsel %vm1704_vm3, %v2813_v15, %v2831_v30  ;;  %3050 = vst.msk [vmem:[#allocation3 + $0x28] sm:$0xff] %vm245_vm1, %v2817_v11  ;;  %v5055_v0 = vld [vmem:[#allocation2 + $0x50] sm:$0xff]  ;;  %v5057_v18 = vpop.f32.mrb[25].mxu0  ;;  %v896_v30 = vand.u32 15, %v716_v1  ;;  %3248 = vmatpush1.bf16.msra.mxu0 %v4121_v44  ;;  %4027 = vmatpush1.bf16.msra.mxu1 %v4121_v44 }
 0x12c   : > { %6702 = vst [vmem:[#allocation18_spill] sm:$0xff] %v5049_v54  ;;  %v5053_v27 = vrot.slane %v2856_v63, 7  ;;  %2384 = vrot.lane.b32.xlu0 %v1907_v24, %s4226_s10  ;;  %2077 = vrot.lane.b32.xlu1 %v5049_v54, %s4223_s27  ;;  %3052 = vst.msk [vmem:[#allocation3 + $0x38] sm:$0xff] %vm245_vm1, %v2832_v42  ;;  %v2843_v15 = vrot.slane %v2841_v47, 7  ;;  %v5071_v19 = vsel %vm1839_vm9, %v5055_v0, 0  ;;  %v5073_v2 = vpop.f32.mrb[26].mxu0  ;;  %v5084_v47 = vcombine.low %v1307_v58, %v4415_v26 }
 0x12d   : > { %v1912_v63 = vsel %vm1500_vm14, %v4950_v3, 0  ;;  %v5081_v24 = vpop.f32.mrb[27].mxu0  ;;  %v5089_v1 = vsel %vm1835_vm13, %v4836_v35, 0  ;;  %v5093_v46 = vrot.slane %v1785_v55, 7  ;;  %3249 = vmatprep.subr.bf16.mxu0 %v6701_v40  ;;  %v4122_v58 = vld [vmem:[%s6581_s3 + $0x18] sm:$0xff]   ;;  %4019 = vmatprep.subr.bf16.mxu1 %v6701_v40  ;;  %vm6704_vm8 = vcmp.ne.s16.totalorder %v4633_v51, 0 }
 0x12e   : > { %v2861_v11 = vor.u32 %v2859_v39, %v5053_v27  ;;  %v5091_v42 = vor.u32 %v2844_v31, %v2843_v15  ;;  %v1871_v44 = vsel %vm6704_vm8, %v4836_v35, 0  ;;  %v6606_v20 = vrot.slane %v5065_v12, 1 }
 0x12f   : > { %v6705_v55 = vrot.slane %v5071_v19, 1  ;;  %v6706_v39 = vrot.slane %v4964_v4, 1  ;;  %vm5114_vm6 = vcmp.gt.s32.totalorder %v896_v30, 0  ;;  %v1876_v4 = vsel %vm1501_vm4, %v4950_v3, 0  ;;  %3250 = vmatpush1.bf16.msra.mxu0 %v4122_v58  ;;  %4028 = vmatpush1.bf16.msra.mxu1 %v4122_v58 }
 0x130   : > { %6703 = vst [vmem:[#allocation19_spill] sm:$0xff] %v5091_v42  ;;  %v2862_v31 = vsel %vm1704_vm3, %v2843_v15, %v2861_v11  ;;  %2209 = vrot.lane.b32.xlu0 %v1871_v44, %s4224_s29  ;;  %2394 = vrot.lane.b32.xlu1 %v1912_v63, %s4226_s10  ;;  %v1793_v15 = vshrl.u32 %v5027_v36, 16  ;;  %v581_v63 = vadd.f32 %v4643_v56, %v4972_v25  ;;  %vm6715_vm12 = vcmp.ne.s16.totalorder %v4733_v34, 0 }
 0x131   : > { %v2487_v60 = vsel %vm2118_vm10, %v6706_v39, %v6705_v55  ;;  %3056 = vst.msk [vmem:[#allocation3 + $0x58] sm:$0xff] %vm245_vm1, %v2862_v31  ;;  %v589_v39 = vadd.f32 %v4952_v29, %v4643_v56  ;;  %v592_v44 = vadd.f32 %v4983_v38, %v4643_v56  ;;  %v584_v31 = vadd.f32 %v4643_v56, %v4991_v10  ;;  %v4123_v29 = vld [vmem:[%s6581_s3 + $0x20] sm:$0xff]  }
 0x132   : > { %v2871_v42 = vshrl.u32 %v2487_v60, 16  ;;  %v2874_v54 = vshll.u32 %v2487_v60, 16  ;;  %v5130_v60 = vsel %vm1835_vm13, %v4830_v37, 0  ;;  %v5138_v55 = vpop.f32.mrb[28].mxu0  ;;  %3251 = vmatprep.subr.bf16.mxu0 %v6701_v40  ;;  %4020 = vmatprep.subr.bf16.mxu1 %v6701_v40  ;;  %v2300_v25 = vsel %vm2118_vm10, %v6710_v61, %v6606_v20 }
 0x133   : > { %6709 = vst [vmem:[#allocation20_spill] sm:$0xff] %v5130_v60  ;;  %v5153_v38 = vsel %vm1837_vm15, %v4903_v17, 0  ;;  %v649_v10 = vmax.f32 %v589_v39, 0.0  ;;  %v5155_v58 = vpop.f32.mrb[29].mxu0  ;;  %vm6711_vm13 = vcmp.ne.s16.totalorder %v4745_v28, 0  ;;  %v650_v61 = vmax.f32 %v592_v44, 0.0  ;;  %3252 = vmatpush1.bf16.msra.mxu0 %v4123_v29  ;;  %4029 = vmatpush1.bf16.msra.mxu1 %v4123_v29 }
 0x134   : > { %v5132_v30 = vrot.slane %v2871_v42, 7  ;;  %v647_v42 = vmax.f32 %v581_v63, 0.0  ;;  %2333 = vrot.lane.b32.xlu0 %v2300_v25, %s4227_s11  ;;  %2219 = vrot.lane.b32.xlu1 %v1876_v4, %s4224_s29  ;;  %v5162_v11 = vsel %vm6711_vm13, %v4969_v43, 0  ;;  %v648_v20 = vmax.f32 %v584_v31, 0.0  ;;  %v5165_v7 = vpop.f32.mrb[30].mxu0  ;;  %v5181_v44 = vld [vmem:[#allocation2 + $0x58] sm:$0xff]  ;;  %vm6716_vm8 = vmmov %vm6711_vm13 }
 0x135   : > { %6712 = vst [vmem:[#allocation21_spill] sm:$0xff] %v5162_v11  ;;  %v6713_v39 = vrot.slane %v5089_v1, 1  ;;  %v6714_v63 = vrot.slane %v4878_v45, 1  ;;  %v1911_v4 = vsel %vm6617_vm5, %v4969_v43, 0  ;;  %v5183_v31 = vpop.f32.mrb[31].mxu0  ;;  %v5188_v45 = vsel %vm6716_vm8, %v4903_v17, 0  ;;  %vm1277_vm13 = vmpackc.low %vm5114_vm6, %vm5114_vm6  ;;  %3253 = vmatprep.subr.bf16.mxu0 %v6701_v40  ;;  %4021 = vmatprep.subr.bf16.mxu1 %v6701_v40 }
 0x136   : > { %v2876_v32 = vor.u32 %v2874_v54, %v5132_v30  ;;  %v5179_v54 = vsel %vm6715_vm12, %v4830_v37, 0  ;;  %v669_v25 = vpack.c.bf16 %v648_v20, %v647_v42  ;;  %v6613_v57 = vrot.slane %v5153_v38, 1 }
 0x137   : > { %v2125_v48 = vsel %vm2118_vm10, %v6714_v63, %v6713_v39  ;;  %v670_v63 = vpack.c.bf16 %v650_v61, %v649_v10  ;;  %v6612_v29 = vrot.slane %v5162_v11, 1  ;;  %v5201_v28 = vsel %vm1839_vm9, %v4969_v43, 0 }
 0x138   : > { %v2877_v39 = vsel %vm1704_vm3, %v5053_v27, %v2876_v32  ;;  %v3094_v37 = vld [vmem:[#allocation3 + $0x58] sm:$0xff]  ;;  %v1988_v27 = vshll.u32 %v4903_v17, 16  ;;  %vm1841_vm12 = vcmp.ne.s16.totalorder %v4794_v53, 0  ;;  %2158 = vrot.lane.b32.xlu0 %v2125_v48, %s4225_s7  ;;  %2392 = vrot.lane.b32.xlu1 %v1911_v4, %s4226_s10  ;;  %v6616_v20 = vrot.slane %v5179_v54, 1  ;;  %685 = vst.msk [vmem:[#allocation2 + $0x60] sm:$0xff] %vm245_vm1, %v669_v25 }
 0x139   : > { %3058 = vst.msk [vmem:[#allocation3 + $0x68] sm:$0xff] %vm245_vm1, %v2877_v39  ;;  %686 = vst.msk [vmem:[#allocation2 + $0x68] sm:$0xff] %vm245_vm1, %v670_v63  ;;  %v1931_v10 = vsel %vm1840_vm7, %v5181_v44, 0  ;;  %v6717_v42 = vshll.u32 %v4944_v41, 16  ;;  %v1796_v61 = vshll.u32 %v5027_v36, 16  ;;  %3779 = vmatprep.mubr.msk.bf16.mxu1 %vm245_vm1, %v3094_v37  ;;  %v6718_v48 = vrot.slane %v5130_v60, 1 }
 0x13a   : > { %v6719_v4 = vrot.slane %v5065_v12, 1  ;;  %v1309_v41 = vsel %vm1277_vm13, 65537, %v6701_v40  ;;  %v5232_v63 = vrot.slane %v1793_v15, 7  ;;  %v1964_v37 = vshll.u32 %v4836_v35, 16 }
 0x13b   : > { %v1790_v32 = vor.u32 %v6717_v42, %v5093_v46  ;;  %v2488_v42 = vrot.slane %v1931_v10, 1  ;;  %v605_v12 = vadd.f32 %v5031_v62, %v4643_v56  ;;  %v1992_v51 = vshrl.u32 %v4903_v17, 16 }
 0x13c   : > { %v2302_v39 = vsel %vm2118_vm10, %v6719_v4, %v6718_v48  ;;  %v2308_v48 = vsel %vm2118_vm10, %v6613_v57, %v6612_v29  ;;  %v5243_v4 = vrot.slane %v1988_v27, 1  ;;  %v1996_v15 = vshll.u32 %v4969_v43, 16 }
 0x13d   : > { %2335 = vrot.lane.b32.xlu0 %v2302_v39, %s4227_s11  ;;  %2341 = vrot.lane.b32.xlu1 %v2308_v48, %s4227_s11  ;;  %v6720_v62 = vrot.slane %v5089_v1, 1  ;;  %v1960_v25 = vshrl.u32 %v4757_v49, 16  ;;  %v6721_v29 = vrot.slane %v5071_v19, 1  ;;  %v597_v57 = vadd.f32 %v4643_v56, %v5057_v18 }
 0x13e   : > { %v653_v39 = vmax.f32 %v605_v12, 0.0  ;;  %v608_v48 = vadd.f32 %v5073_v2, %v4643_v56  ;;  %v6722_v11 = vrot.slane %v5201_v28, 1  ;;  %v6723_v1 = vrot.slane %v5188_v45, 1 }
 0x13f   : > { %v2127_v10 = vsel %vm2118_vm10, %v6720_v62, %v6616_v20  ;;  %v2489_v27 = vsel %vm2118_vm10, %v6721_v29, %v2488_v42  ;;  %v5267_v49 = vrot.slane %v1964_v37, 1  ;;  %v651_v19 = vmax.f32 %v597_v57, 0.0  ;;  %v5274_v12 = vld [vmem:[#allocation2 + $0x60] sm:$0xff] }
 0x140   : > { %v2886_v36 = vshrl.u32 %v2489_v27, 16  ;;  %v2889_v60 = vshll.u32 %v2489_v27, 16  ;;  %v2133_v62 = vsel %vm2118_vm10, %v6723_v1, %v6722_v11  ;;  %v600_v29 = vadd.f32 %v4643_v56, %v5081_v24 }
 0x141   : > { %v1994_v18 = vor.u32 %v1992_v51, %v5243_v4  ;;  %v1998_v20 = vrot.slane %v1996_v15, 1  ;;  %v654_v2 = vmax.f32 %v608_v48, 0.0  ;;  %2160 = vrot.lane.b32.xlu0 %v2127_v10, %s4225_s7  ;;  %2166 = vrot.lane.b32.xlu1 %v2133_v62, %s4225_s7  ;;  %v1962_v11 = vor.u32 %v1960_v25, %v4826_v50 }
 0x142   : > { %v5272_v27 = vrot.slane %v2886_v36, 7  ;;  %v1932_v57 = vsel %vm1841_vm12, %v5274_v12, 0  ;;  %v652_v37 = vmax.f32 %v600_v29, 0.0  ;;  %v5284_v24 = vsel %vm1704_vm3, %v4719_v22, %v1790_v32  ;;  %v4124_v36 = vld [vmem:[%s6581_s3 + $0x28] sm:$0xff]   ;;  %v4125_v32 = vld [vmem:[%s6581_s3 + $0x30] sm:$0xff]  }
 0x143   : > { %v2490_v15 = vrot.slane %v1932_v57, 1  ;;  %v672_v10 = vpack.c.bf16 %v654_v2, %v653_v39  ;;  %v5291_v48 = vcombine.low %v1309_v41, %v4415_v26  ;;  %v5295_v50 = vsel %vm1365_vm11, %v1962_v11, %v5267_v49  ;;  %3254 = vmatpush1.bf16.msra.mxu0 %v4124_v36  ;;  %4030 = vmatpush1.bf16.msra.mxu1 %v4124_v36 }
 0x144   : > { %v2891_v51 = vor.u32 %v2889_v60, %v5272_v27  ;;  %v1434_v25 = vshrl.u32 %v4681_v16, 16  ;;  %v671_v1 = vpack.c.bf16 %v652_v37, %v651_v19  ;;  %v1798_v22 = vor.u32 %v1796_v61, %v5232_v63  ;;  %3255 = vmatprep.subr.bf16.mxu0 %v6701_v40  ;;  %4022 = vmatprep.subr.bf16.mxu1 %v6701_v40 }
 0x145   : > { %v5303_v60 = vsel %vm1365_vm11, %v1994_v18, %v1998_v20  ;;  %v2000_v41 = vshrl.u32 %v4969_v43, 16  ;;  %v2491_v62 = vsel %vm2118_vm10, %v2488_v42, %v2490_v15  ;;  %688 = vst.msk [vmem:[#allocation2 + $0x78] sm:$0xff] %vm245_vm1, %v672_v10  ;;  %2424 = vrot.lane.b32.xlu0 %v5295_v50, %s4228_s12  ;;  %v6724_v61 = vshll.u32 %v4788_v6, 16  ;;  %v5320_v42 = vld [vmem:[#allocation2 + $0x68] sm:$0xff] }
 0x146   : > { %v2892_v39 = vsel %vm1704_vm3, %v5132_v30, %v2891_v51  ;;  %2257 = vrot.lane.b32.xlu1 %v5303_v60, %s4229_s13  ;;  %v2901_v30 = vshrl.u32 %v2491_v62, 16  ;;  %v2904_v29 = vshll.u32 %v2491_v62, 16  ;;  %687 = vst.msk [vmem:[#allocation2 + $0x70] sm:$0xff] %vm245_vm1, %v671_v1  ;;  %vm1842_vm6 = vcmp.ne.s16.totalorder %v5284_v24, 0 }
 0x147   : > { %v1448_v19 = vrot.slane %v6724_v61, 1  ;;  %3060 = vst.msk [vmem:[#allocation3 + $0x78] sm:$0xff] %vm245_vm1, %v2892_v39  ;;  %v2004_v18 = vshll.u32 %v4950_v3, 16  ;;  %v1968_v2 = vshrl.u32 %v4836_v35, 16  ;;  %v1450_v11 = vshrl.u32 %v4788_v6, 16  ;;  %3256 = vmatpush1.bf16.msra.mxu0 %v4125_v32  ;;  %v4126_v35 = vld [vmem:[%s6581_s3 + $0x38] sm:$0xff]   ;;  %4031 = vmatpush1.bf16.msra.mxu1 %v4125_v32 }
 0x148   : > { %v621_v57 = vadd.f32 %v5138_v55, %v4643_v56  ;;  %v5328_v37 = vrot.slane %v2901_v30, 7  ;;  %v1454_v36 = vshll.u32 %v5084_v47, 16  ;;  %v1458_v51 = vshrl.u32 %v5084_v47, 16  ;;  %3257 = vmatprep.subr.bf16.mxu0 %v6701_v40  ;;  %4023 = vmatprep.subr.bf16.mxu1 %v6701_v40 }
 0x149   : > { %v5334_v10 = vsel %vm1704_vm3, %v5093_v46, %v1798_v22  ;;  %v2002_v6 = vor.u32 %v2000_v41, %v1998_v20  ;;  %v1462_v1 = vshll.u32 %v5291_v48, 16  ;;  %v1933_v39 = vsel %vm1842_vm6, %v5320_v42, 0  ;;  %2249 = vrot.lane.b32.xlu0 %v5295_v50, %s4229_s13 }
 0x14a   : > { %v657_v55 = vmax.f32 %v621_v57, 0.0  ;;  %2081 = vrot.lane.b32.xlu1 %v5303_v60, %s4223_s27  ;;  %v2906_v46 = vor.u32 %v2904_v29, %v5328_v37  ;;  %v2492_v47 = vrot.slane %v1933_v39, 1  ;;  %v613_v20 = vadd.f32 %v4643_v56, %v5155_v58 }
 0x14b   : > { %v624_v22 = vadd.f32 %v5165_v7, %v4643_v56  ;;  %v5354_v32 = vrot.slane %v2004_v18, 1  ;;  %v1970_v41 = vor.u32 %v1968_v2, %v5267_v49  ;;  %v616_v62 = vadd.f32 %v4643_v56, %v5183_v31  ;;  %3258 = vmatpush1.bf16.msra.mxu0 %v4126_v35  ;;  %4032 = vmatpush1.bf16.msra.mxu1 %v4126_v35  ;;  %v4127_v31 = vld [vmem:[%s6581_s3 + $0x40] sm:$0xff]  }
 0x14c   : > { %vm1843_vm8 = vcmp.ne.s16.totalorder %v5334_v10, 0  ;;  %v2907_v61 = vsel %vm1704_vm3, %v5272_v27, %v2906_v46  ;;  %v2493_v30 = vsel %vm2118_vm10, %v2490_v15, %v2492_v47  ;;  %v655_v29 = vmax.f32 %v613_v20, 0.0  ;;  %3259 = vmatprep.subr.bf16.mxu0 %v6701_v40  ;;  %4024 = vmatprep.subr.bf16.mxu1 %v6701_v40 }
 0x14d   : > { %v658_v57 = vmax.f32 %v624_v22, 0.0  ;;  %v2007_v7 = vsel %vm1365_vm11, %v2002_v6, %v5354_v32  ;;  %3062 = vst.msk [vmem:[#allocation3 + $0x88] sm:$0xff] %vm245_vm1, %v2907_v61  ;;  %v2916_v58 = vshrl.u32 %v2493_v30, 16  ;;  %v2919_v49 = vshll.u32 %v2493_v30, 16  ;;  %v5366_v56 = vld [vmem:[#allocation2 + $0x70] sm:$0xff]  ;;  %2073 = vrot.lane.b32.xlu0 %v5295_v50, %s4223_s27 }
 0x14e   : > { %v656_v18 = vmax.f32 %v616_v62, 0.0  ;;  %2434 = vrot.lane.b32.xlu1 %v2007_v7, %s4228_s12  ;;  %v1436_v27 = vor.u32 %v1434_v25, %v4715_v13  ;;  %v1456_v15 = vrot.slane %v1454_v36, 1  ;;  %v5382_v35 = vsel %vm1843_vm8, %v5366_v56, 0 }
 0x14f   : > { %v674_v2 = vpack.c.bf16 %v658_v57, %v657_v55  ;;  %v5387_v6 = vsel %vm1365_vm11, %v4763_v14, %v4649_v59  ;;  %v2918_v39 = vrot.slane %v2916_v58, 7  ;;  %v2494_v46 = vrot.slane %v5382_v35, 1  ;;  %3260 = vmatpush1.bf16.msra.mxu0 %v4127_v31  ;;  %4033 = vmatpush1.bf16.msra.mxu1 %v4127_v31 }
 0x150   : > { %v673_v50 = vpack.c.bf16 %v656_v18, %v655_v29  ;;  %v5392_v16 = vsel %vm1365_vm11, %v4817_v33, %v1448_v19  ;;  %v1452_v13 = vor.u32 %v1450_v11, %v1448_v19  ;;  %v1460_v25 = vor.u32 %v1458_v51, %v1456_v15  ;;  %v6725_v33 = vld [vmem:[#allocation15_spill] sm:$0xff] }
 0x151   : > { %690 = vst.msk [vmem:[#allocation2 + $0x88] sm:$0xff] %vm245_vm1, %v674_v2  ;;  %v1975_v36 = vsel %vm1365_vm11, %v1970_v41, %v4958_v5  ;;  %v5397_v55 = vrot.slane %v1462_v1, 1  ;;  %v2921_v59 = vor.u32 %v2919_v49, %v2918_v39  ;;  %v2495_v14 = vsel %vm2118_vm10, %v2492_v47, %v2494_v46 }
 0x152   : > { %689 = vst.msk [vmem:[#allocation2 + $0x80] sm:$0xff] %vm245_vm1, %v673_v50  ;;  %2426 = vrot.lane.b32.xlu0 %v1975_v36, %s4228_s12  ;;  %2259 = vrot.lane.b32.xlu1 %v2007_v7, %s4229_s13  ;;  %v5407_v19 = vsel %vm1365_vm11, %v1436_v27, %v6725_v33  ;;  %v2931_v11 = vshrl.u32 %v2495_v14, 16  ;;  %v2934_v51 = vshll.u32 %v2495_v14, 16  ;;  %v5412_v5 = vsel %vm1839_vm9, %v4950_v3, 0 }
 0x153   : > { %v5417_v1 = vsel %vm1840_vm7, %v5055_v0, 0  ;;  %v2922_v47 = vsel %vm1704_vm3, %v5328_v37, %v2921_v59  ;;  %vm6621_vm13 = vcmp.ne.s16.totalorder %v5387_v6, 0  ;;  %vm6620_vm5 = vcmp.ne.s16.totalorder %v5392_v16, 0 }
 0x154   : > { %v5424_v20 = vsel %vm1365_vm11, %v1452_v13, %v1456_v15  ;;  %3064 = vst.msk [vmem:[#allocation3 + $0x98] sm:$0xff] %vm245_vm1, %v2922_v47  ;;  %v5427_v9 = vrot.slane %v2931_v11, 7  ;;  %vm1502_vm9 = vcmp.ne.s16.totalorder %v5407_v19, 0  ;;  %v5433_v22 = vsel %vm1840_vm7, %v4950_v3, 0 }
 0x155   : > { %6726 = vst [vmem:[#allocation15_spill] sm:$0xff] %v5424_v20  ;;  %v5438_v37 = vsel %vm1841_vm12, %v5055_v0, 0  ;;  %v5442_v41 = vsel %vm1365_vm11, %v1460_v25, %v5397_v55  ;;  %v6630_v62 = vrot.slane %v5412_v5, 1  ;;  %v6625_v61 = vrot.slane %v5417_v1, 1 }
 0x156   : > { %6727 = vst [vmem:[#allocation22_spill] sm:$0xff] %v5442_v41  ;;  %2251 = vrot.lane.b32.xlu0 %v1975_v36, %s4229_s13  ;;  %2083 = vrot.lane.b32.xlu1 %v2007_v7, %s4223_s27  ;;  %v1854_v3 = vsel %vm1837_vm15, %v6728_v52, 0  ;;  %v2936_v30 = vor.u32 %v2934_v51, %v5427_v9  ;;  %v1914_v29 = vsel %vm1502_vm9, %v5181_v44, 0  ;;  %v1910_v57 = vsel %vm6621_vm13, %v4903_v17, 0 }
 0x157   : > { %v1878_v7 = vsel %vm6620_vm5, %v5181_v44, 0  ;;  %vm6649_vm7 = vcmp.ne.s16.totalorder %v5424_v20, 0  ;;  %v6627_v58 = vrot.slane %v5433_v22, 1  ;;  %v6623_v23 = vrot.slane %v5438_v37, 1 }
 0x158   : > { %v2937_v49 = vsel %vm1704_vm3, %v2918_v39, %v2936_v30  ;;  %v717_v18 = vadd.s32 200, %v4368_v21  ;;  %v2128_v31 = vrot.slane %v1854_v3, 1  ;;  %v2012_v27 = vshll.u32 %v5055_v0, 16 }
 0x159   : > { %vm6648_vm15 = vcmp.ne.s16.totalorder %v5442_v41, 0  ;;  %3066 = vst.msk [vmem:[#allocation3 + $0xa8] sm:$0xff] %vm245_vm1, %v2937_v49  ;;  %v718_v17 = vadd.s32 208, %v4368_v21  ;;  %v719_v15 = vadd.s32 216, %v4368_v21  ;;  %v1873_v2 = vsel %vm6621_vm13, %v6728_v52, 0 }
 0x15a   : > { %2075 = vrot.lane.b32.xlu0 %v1975_v36, %s4223_s27  ;;  %2398 = vrot.lane.b32.xlu1 %v1914_v29, %s4226_s10  ;;  %v2312_v39 = vsel %vm2118_vm10, %v6630_v62, %v6625_v61  ;;  %v2020_v50 = vshll.u32 %v5181_v44, 16  ;;  %v903_v13 = vand.u32 15, %v717_v18  ;;  %v6729_v25 = vrot.slane %v5188_v45, 1 }
 0x15b   : > { %v2016_v36 = vshrl.u32 %v5055_v0, 16  ;;  %vm6730_vm0 = vcmp.ne.s16.totalorder %v4733_v34, 0  ;;  %v917_v33 = vand.u32 15, %v719_v15  ;;  %v2137_v11 = vsel %vm2118_vm10, %v6627_v58, %v6623_v23 }
 0x15c   : > { %v2131_v59 = vsel %vm2118_vm10, %v2128_v31, %v6729_v25  ;;  %v5489_v14 = vsel %vm6730_vm0, %v6728_v52, 0  ;;  %v1984_v51 = vshrl.u32 %v6728_v52, 16  ;;  %vm1165_vm2 = vcmp.lt.s32.totalorder %v903_v13, 15 }
 0x15d   : > { %6731 = vst [vmem:[#allocation16_spill] sm:$0xff] %v5489_v14  ;;  %v721_v45 = vadd.s32 232, %v4368_v21  ;;  %v6732_v47 = vrot.slane %v5179_v54, 1  ;;  %v5503_v34 = vrot.slane %v2012_v27, 1  ;;  %v910_v30 = vand.u32 15, %v718_v17  ;;  %vm1617_vm0 = vmpackc.low %vm1165_vm2, %vm1165_vm2 }
 0x15e   : > { %vm1167_vm5 = vcmp.lt.s32.totalorder %v917_v33, 15  ;;  %2390 = vrot.lane.b32.xlu0 %v1910_v57, %s4226_s10  ;;  %2223 = vrot.lane.b32.xlu1 %v1878_v7, %s4224_s29  ;;  %v5507_v29 = vrot.slane %v2020_v50, 1  ;;  %v6622_v52 = vrot.slane %v5489_v14, 1  ;;  %v720_v49 = vadd.s32 224, %v4368_v21 }
 0x15f   : > { %v5501_v3 = vsel %vm2118_vm10, %v6732_v47, %v2128_v31  ;;  %v1649_v54 = vsel %vm1617_vm0, 65537, %v6701_v40  ;;  %vm1619_vm13 = vmpackc.low %vm1167_vm5, %vm1167_vm5  ;;  %v2018_v18 = vor.u32 %v2016_v36, %v5503_v34  ;;  %v931_v17 = vand.u32 15, %v721_v45 }
 0x160   : > { %6733 = vst [vmem:[#allocation23_spill] sm:$0xff] %v5507_v29  ;;  %v3760_v31 = vcombine.low %v4415_v26, %v1649_v54  ;;  %v1651_v27 = vsel %vm1619_vm13, 65537, %v6701_v40  ;;  %v6734_v57 = vrot.slane %v5153_v38, 1  ;;  %v1986_v15 = vor.u32 %v1984_v51, %v5011_v8 }
 0x161   : > { %v5526_v50 = vsel %vm6649_vm7, %v5320_v42, 0  ;;  %v3761_v13 = vcombine.low %v4415_v26, %v1651_v27  ;;  %vm5529_vm2 = vcmp.gt.s32.totalorder %v910_v30, 0  ;;  %vm1169_vm5 = vcmp.lt.s32.totalorder %v931_v17, 15 }
 0x162   : > { %v5520_v7 = vsel %vm2118_vm10, %v6622_v52, %v6734_v57  ;;  %v1801_v36 = vshrl.u32 %v3760_v31, 16  ;;  %v1804_v38 = vshll.u32 %v3760_v31, 16  ;;  %2213 = vrot.lane.b32.xlu0 %v1873_v2, %s4224_s29  ;;  %2345 = vrot.lane.b32.xlu1 %v2312_v39, %s4227_s11  ;;  %v5538_v8 = vsel %vm1841_vm12, %v5181_v44, 0  ;;  %vm1621_vm13 = vmpackc.low %vm1169_vm5, %vm1169_vm5 }
 0x163   : > { %v924_v33 = vand.u32 15, %v720_v49  ;;  %v1809_v51 = vshrl.u32 %v3761_v13, 16  ;;  %v1812_v45 = vshll.u32 %v3761_v13, 16  ;;  %v5542_v47 = vsel %vm1365_vm11, %v2018_v18, %v5507_v29  ;;  %vm1279_vm12 = vmpackc.low %vm5529_vm2, %vm5529_vm2 }
 0x164   : > { %v5547_v30 = vsel %vm1842_vm6, %v5274_v12, 0  ;;  %v1803_v2 = vrot.slane %v1801_v36, 7  ;;  %v1653_v39 = vsel %vm1621_vm13, 65537, %v6701_v40  ;;  %v5553_v53 = vsel %vm6648_vm15, %v5320_v42, 0 }
 0x165   : > { %6737 = vst [vmem:[#allocation24_spill] sm:$0xff] %v5547_v30  ;;  %v5561_v49 = vsel %vm1843_vm8, %v5320_v42, 0  ;;  %v1811_v54 = vrot.slane %v1809_v51, 7  ;;  %v3762_v18 = vcombine.low %v4415_v26, %v1653_v39  ;;  %v5566_v31 = vsel %vm1365_vm11, %v1986_v15, %v5243_v4  ;;  %v5577_v51 = vld [vmem:[#allocation2 + $0x78] sm:$0xff] }
 0x166   : > { %6738 = vst [vmem:[#allocation25_spill] sm:$0xff] %v5561_v49  ;;  %6739 = vst [vmem:[#allocation26_spill] sm:$0xff] %v5566_v31  ;;  %v5571_v17 = vsel %vm1500_vm14, %v4969_v43, 0  ;;  %v6626_v57 = vrot.slane %v5538_v8, 1  ;;  %v1806_v13 = vor.u32 %v1804_v38, %v1803_v2  ;;  %2164 = vrot.lane.b32.xlu0 %v2131_v59, %s4225_s7  ;;  %2170 = vrot.lane.b32.xlu1 %v2137_v11, %s4225_s7  ;;  %v6624_v36 = vrot.slane %v5547_v30, 1 }
 0x167   : > { %vm5579_vm0 = vcmp.gt.s32.totalorder %v924_v33, 0  ;;  %v1814_v4 = vor.u32 %v1812_v45, %v1811_v54  ;;  %v1817_v15 = vshrl.u32 %v3762_v18, 16  ;;  %v5586_v43 = vsel %vm1842_vm6, %v5181_v44, 0  ;;  %v5599_v33 = vld [vmem:[#allocation2 + $0x80] sm:$0xff] }
 0x168   : > { %v1311_v59 = vsel %vm1279_vm12, 65537, %v6701_v40  ;;  %v5596_v11 = vsel %vm1704_vm3, %v5232_v63, %v1806_v13  ;;  %v6628_v38 = vrot.slane %v5561_v49, 1  ;;  %v1820_v45 = vshll.u32 %v3762_v18, 16  ;;  %vm1281_vm6 = vmpackc.low %vm5579_vm0, %vm5579_vm0 }
 0x169   : > { %vm1844_vm5 = vcmp.ne.s16.totalorder %v5596_v11, 0  ;;  %v5603_v44 = vsel %vm1704_vm3, %v1803_v2, %v1814_v4  ;;  %v5605_v24 = vrot.slane %v1817_v15, 7  ;;  %v5610_v25 = vsel %vm1843_vm8, %v5274_v12, 0 }
 0x16a   : > { %v5618_v63 = vsel %vm1844_vm5, %v5366_v56, 0  ;;  %v1935_v2 = vsel %vm1844_vm5, %v5577_v51, 0  ;;  %vm1845_vm2 = vcmp.ne.s16.totalorder %v5603_v44, 0  ;;  %2162 = vrot.lane.b32.xlu0 %v5501_v3, %s4225_s7  ;;  %2438 = vrot.lane.b32.xlu1 %v5542_v47, %s4228_s12  ;;  %v3745_v10 = vcombine.low %v1311_v59, %v4415_v26  ;;  %v5656_v3 = vld [vmem:[#allocation2 + $0x88] sm:$0xff] }
 0x16b   : > { %v6629_v18 = vrot.slane %v5618_v63, 1  ;;  %v2496_v13 = vrot.slane %v1935_v2, 1  ;;  %v1936_v39 = vsel %vm1845_vm2, %v5599_v33, 0  ;;  %v5638_v4 = vsel %vm2118_vm10, %v6626_v57, %v6624_v36 }
 0x16c   : > { %v2498_v15 = vrot.slane %v1936_v39, 1  ;;  %v722_v52 = vadd.s32 240, %v4368_v21  ;;  %v1313_v59 = vsel %vm1281_vm6, 65537, %v6701_v40  ;;  %v1822_v36 = vor.u32 %v1820_v45, %v5605_v24 }
 0x16d   : > { %v5648_v2 = vsel %vm2118_vm10, %v6628_v38, %v6629_v18  ;;  %v2497_v23 = vsel %vm2118_vm10, %v2494_v46, %v2496_v13  ;;  %v1470_v38 = vshll.u32 %v3745_v10, 16  ;;  %v5666_v45 = vcombine.low %v1313_v59, %v4415_v26  ;;  %v6743_v59 = vld [vmem:[#allocation18_spill] sm:$0xff] }
 0x16e   : > { %v2946_v39 = vshrl.u32 %v2497_v23, 16  ;;  %v2949_v57 = vshll.u32 %v2497_v23, 16  ;;  %v2499_v58 = vsel %vm2118_vm10, %v2496_v13, %v2498_v15  ;;  %2339 = vrot.lane.b32.xlu0 %v5520_v7, %s4227_s11  ;;  %2263 = vrot.lane.b32.xlu1 %v5542_v47, %s4229_s13  ;;  %v5663_v46 = vsel %vm1704_vm3, %v1811_v54, %v1822_v36 }
 0x16f   : > { %v2961_v35 = vshrl.u32 %v2499_v58, 16  ;;  %v2964_v18 = vshll.u32 %v2499_v58, 16  ;;  %vm1846_vm8 = vcmp.ne.s16.totalorder %v5663_v46, 0  ;;  %v938_v13 = vand.u32 15, %v722_v52 }
 0x170   : > { %v2948_v23 = vrot.slane %v2946_v39, 7  ;;  %v2028_v61 = vshll.u32 %v5274_v12, 16  ;;  %v2036_v7 = vshll.u32 %v5320_v42, 16  ;;  %v5674_v14 = vsel %vm1846_vm8, %v5656_v3, 0 }
 0x171   : > { %v2963_v62 = vrot.slane %v2961_v35, 7  ;;  %v1474_v58 = vshrl.u32 %v3745_v10, 16  ;;  %vm1138_vm13 = vcmp.gt.s32.totalorder %v938_v13, 0  ;;  %v6635_v36 = vrot.slane %v5674_v14, 1 }
 0x172   : > { %v2951_v54 = vor.u32 %v2949_v57, %v2948_v23  ;;  %2428 = vrot.lane.b32.xlu0 %v6743_v59, %s4228_s12  ;;  %2087 = vrot.lane.b32.xlu1 %v5542_v47, %s4223_s27  ;;  %v5681_v52 = vrot.slane %v1470_v38, 1  ;;  %v2044_v35 = vshll.u32 %v5366_v56, 16  ;;  %v2052_v27 = vshll.u32 %v5577_v51, 16  ;;  %vm1283_vm12 = vmpackc.low %vm1138_vm13, %vm1138_vm13  ;;  %v5692_v47 = vpop.permute.xlu1 %2067 }
 0x173   : > { %v2966_v39 = vor.u32 %v2964_v18, %v2963_v62  ;;  %v1478_v10 = vshll.u32 %v5666_v45, 16  ;;  %v1315_v13 = vsel %vm1283_vm12, 65537, %v6701_v40  ;;  %v2501_v59 = vsel %vm2118_vm10, %v2498_v15, %v6635_v36 }
 0x174   : > { %v2952_v57 = vsel %vm1704_vm3, %v5427_v9, %v2951_v54  ;;  %v5697_v18 = vcombine.low %v1315_v13, %v4415_v26  ;;  %v2976_v29 = vshrl.u32 %v2501_v59, 16  ;;  %v2979_v30 = vshll.u32 %v2501_v59, 16 }
 0x175   : > { %3068 = vst.msk [vmem:[#allocation3 + $0xb8] sm:$0xff] %vm245_vm1, %v2952_v57  ;;  %v2967_v38 = vsel %vm1704_vm3, %v2948_v23, %v2966_v39  ;;  %v2032_v49 = vshrl.u32 %v5274_v12, 16  ;;  %v5700_v9 = vrot.slane %v2036_v7, 1  ;;  %v5706_v15 = vsel %vm1846_vm8, %v5599_v33, 0 }
 0x176   : > { %3070 = vst.msk [vmem:[#allocation3 + $0xc8] sm:$0xff] %vm245_vm1, %v2967_v38  ;;  %v723_v54 = vadd.s32 248, %v4368_v21  ;;  %2079 = vrot.lane.b32.xlu0 %v5566_v31, %s4223_s27  ;;  %2402 = vrot.lane.b32.xlu1 %v5526_v50, %s4226_s10  ;;  %v1476_v23 = vor.u32 %v1474_v58, %v5681_v52  ;;  %v5714_v59 = vrot.slane %v2044_v35, 1  ;;  %v5716_v7 = vrot.slane %v2052_v27, 1 }
 0x177   : > { %v5718_v39 = vrot.slane %v2976_v29, 7  ;;  %v1480_v57 = vrot.slane %v1478_v10, 1  ;;  %v5723_v21 = vsel %vm6648_vm15, %v5366_v56, 0  ;;  %v2040_v38 = vshrl.u32 %v5320_v42, 16 }
 0x178   : > { %v945_v13 = vand.u32 15, %v723_v54  ;;  %6744 = vst [vmem:[#allocation27_spill] sm:$0xff] %v5723_v21  ;;  %v1482_v36 = vshrl.u32 %v5666_v45, 16  ;;  %v1486_v50 = vshll.u32 %v5697_v18, 16  ;;  %v2056_v27 = vshrl.u32 %v5577_v51, 16  ;;  %v5741_v45 = vpop.permute.xlu1 %2203 }
 0x179   : > { %v2981_v58 = vor.u32 %v2979_v30, %v5718_v39  ;;  %v2042_v35 = vor.u32 %v2040_v38, %v5700_v9  ;;  %v2060_v10 = vshll.u32 %v5599_v33, 16  ;;  %v2238_v54 = vshll.u32 %v5656_v3, 16  ;;  %6747 = vst [vmem:[#allocation28_spill] sm:$0xff] %v5741_v45  ;;  %v5743_v30 = vpop.permute.xlu0 %2152 }
 0x17a   : > { %vm5730_vm0 = vcmp.lt.s32.totalorder %v945_v13, 15  ;;  %2255 = vrot.lane.b32.xlu0 %v5566_v31, %s4229_s13  ;;  %2227 = vrot.lane.b32.xlu1 %v5553_v53, %s4224_s29  ;;  %6748 = vst [vmem:[#allocation29_spill] sm:$0xff] %v5743_v30  ;;  %v5745_v13 = vrot.slane %v2028_v61, 1  ;;  %v2058_v38 = vor.u32 %v2056_v27, %v5716_v7  ;;  %v2242_v21 = vshrl.u32 %v5656_v3, 16  ;;  %v5764_v27 = vld [vmem:[#allocation2 + $0x90] sm:$0xff] }
 0x17b   : > { %v2982_v41 = vsel %vm1704_vm3, %v2963_v62, %v2981_v58  ;;  %vm1623_vm6 = vmpackc.low %vm5730_vm0, %vm5730_vm0  ;;  %v5754_v31 = vsel %vm1365_vm11, %v1476_v23, %v1480_v57  ;;  %v5760_v61 = vsel %vm1365_vm11, %v2042_v35, %v5714_v59  ;;  %v2062_v62 = vrot.slane %v2060_v10, 1 }
 0x17c   : > { %3072 = vst.msk [vmem:[#allocation3 + $0xd8] sm:$0xff] %vm245_vm1, %v2982_v41  ;;  %v1655_v53 = vsel %vm1623_vm6, 65537, %v6701_v40  ;;  %6749 = vst [vmem:[#allocation30_spill] sm:$0xff] %v5760_v61  ;;  %v1466_v58 = vshrl.u32 %v5291_v48, 16  ;;  %v1484_v29 = vor.u32 %v1482_v36, %v1480_v57  ;;  %v2240_v45 = vrot.slane %v2238_v54, 1 }
 0x17d   : > { %v3763_v20 = vcombine.low %v4415_v26, %v1655_v53  ;;  %v5766_v30 = vrot.slane %v1486_v50, 1  ;;  %v5769_v23 = vsel %vm1365_vm11, %v2058_v38, %v2062_v62  ;;  %v2415_v40 = vshll.u32 %v5764_v27, 16  ;;  %v6753_v50 = vld [vmem:[#allocation21_spill] sm:$0xff] }
 0x17e   : > { %6750 = vst [vmem:[#allocation31_spill] sm:$0xff] %v5769_v23  ;;  %v2064_v41 = vshrl.u32 %v5599_v33, 16  ;;  %2217 = vrot.lane.b32.xlu0 %v5571_v17, %s4224_s29  ;;  %2349 = vrot.lane.b32.xlu1 %v5638_v4, %s4227_s11  ;;  %vm1507_vm13 = vcmp.ne.s16.totalorder %v5754_v31, 0  ;;  %v5778_v36 = vor.u32 %v2242_v21, %v2240_v45  ;;  %v6752_v57 = vrot.slane %v5412_v5, 1  ;;  %v1527_v17 = vld [vmem:[#allocation2 + $0x88] sm:$0x1]  ;;  %v5789_v53 = vpop.permute.xlu1 %2382  ;;  %v5791_v4 = vpop.permute.xlu0 %2207 }
 0x17f   : > { %v1825_v26 = vshrl.u32 %v3763_v20, 16  ;;  %v1828_v48 = vshll.u32 %v3763_v20, 16  ;;  %v6754_v35 = vrot.slane %v6753_v50, 1  ;;  %v5785_v54 = vrot.slane %v2415_v40, 1  ;;  %v1922_v40 = vld [vmem:[#allocation2 + $0x98] sm:$0x1] }
 0x180   : > { %6751 = vst [vmem:[#allocation32_spill] sm:$0xff] %v5778_v36  ;;  %v5787_v38 = vor.u32 %v2064_v41, %v2062_v62  ;;  %v6756_v23 = vrot.slane %v5610_v25, 1  ;;  %v6757_v20 = vrot.slane %v5586_v43, 1  ;;  %v2034_v5 = vor.u32 %v2032_v49, %v5745_v13 }
 0x181   : > { %v2310_v10 = vsel %vm2118_vm10, %v6754_v35, %v6752_v57  ;;  %6755 = vst [vmem:[#allocation21_spill] sm:$0xff] %v5785_v54  ;;  %v1468_v50 = vor.u32 %v1466_v58, %v5397_v55  ;;  %v1827_v57 = vrot.slane %v1825_v26, 7  ;;  %v1885_v35 = vld [vmem:[#allocation2 + $0x90] sm:$0x1]  ;;  %v5802_v62 = vsel %vm1365_vm11, %v1484_v29, %v5766_v30 }
 0x182   : > { %v2141_v21 = vsel %vm2118_vm10, %v6757_v20, %v6756_v23  ;;  %v5807_v41 = vsel %vm1365_vm11, %v5778_v36, %v5785_v54  ;;  %v5811_v61 = vsel %vm1365_vm11, %v5787_v38, %v2240_v45  ;;  %v5816_v55 = vsel %vm1507_vm13, %v5366_v56, 0  ;;  %2343 = vrot.lane.b32.xlu0 %v2310_v10, %s4227_s11  ;;  %v5825_v54 = vpop.permute.xlu1 %2329  ;;  %v5827_v36 = vpop.permute.xlu0 %2205 }
 0x183   : > { %6758 = vst [vmem:[#allocation33_spill] sm:$0xff] %v5816_v55  ;;  %2174 = vrot.lane.b32.xlu1 %v2141_v21, %s4225_s7  ;;  %v1830_v49 = vor.u32 %v1828_v48, %v1827_v57  ;;  %vm1848_vm12 = vcmp.ne.s16.totalorder %v1827_v57, 0  ;;  %v6759_v58 = vrot.slane %v5433_v22, 1  ;;  %v6760_v29 = vrot.slane %v5201_v28, 1 }
 0x184   : > { %v1865_v26 = vsel %vm1848_vm12, %v1527_v17, 0  ;;  %v1939_v45 = vsel %vm1848_vm12, %v1922_v40, 0  ;;  %v1902_v20 = vsel %vm1848_vm12, %v1885_v35, 0  ;;  %v5831_v10 = vsel %vm1365_vm11, %v2034_v5, %v5700_v9 }
 0x185   : > { %v2135_v23 = vsel %vm2118_vm10, %v6760_v29, %v6759_v58  ;;  %v5835_v48 = vsel %vm1365_vm11, %v1468_v50, %v5681_v52  ;;  %vm1508_vm0 = vcmp.ne.s16.totalorder %v5802_v62, 0  ;;  %v1831_v28 = vsel %vm1704_vm3, %v5605_v24, %v1830_v49  ;;  %v6762_v29 = vld [vmem:[#allocation19_spill] sm:$0xff] }
 0x186   : > { %v6645_v22 = vrot.slane %v5706_v15, 1  ;;  %vm1847_vm6 = vcmp.ne.s16.totalorder %v1831_v28, 0  ;;  %v2150_v17 = vrot.slane %v1865_v26, 1  ;;  %v2504_v21 = vrot.slane %v1939_v45, 1  ;;  %2168 = vrot.lane.b32.xlu0 %v2135_v23, %s4225_s7  ;;  %v5855_v49 = vpop.permute.xlu1 %2422  ;;  %v5857_v58 = vpop.permute.xlu0 %2380  ;;  %v6763_v23 = vld [vmem:[#allocation17_spill] sm:$0xff] }
 0x187   : > { %2442 = vrot.lane.b32.xlu1 %v5831_v10, %s4228_s12  ;;  %v5845_v9 = vsel %vm1847_vm6, %v5599_v33, 0  ;;  %v1938_v52 = vsel %vm1847_vm6, %v5764_v27, 0  ;;  %v1901_v5 = vsel %vm1847_vm6, %v5656_v3, 0  ;;  %v2327_v50 = vrot.slane %v1902_v20, 1 }
 0x188   : > { %v6644_v24 = vrot.slane %v5845_v9, 1  ;;  %v2502_v57 = vrot.slane %v1938_v52, 1  ;;  %v2325_v40 = vrot.slane %v1901_v5, 1  ;;  %v5853_v35 = vsel %vm1508_vm0, %v5577_v51, 0 }
 0x189   : > { %6761 = vst [vmem:[#allocation34_spill] sm:$0xff] %v5853_v35  ;;  %v2847_v26 = vsel %vm1704_vm3, %v6763_v23, %v6762_v29  ;;  %vm6647_vm12 = vcmp.ne.s16.totalorder %v5835_v48, 0  ;;  %v6764_v45 = vrot.slane %v5674_v14, 1  ;;  %v5906_v35 = vld [vmem:[#allocation2 + $0x50] sm:$0xff]  ;;  %v5979_v44 = vsel %vm1846_vm8, %v5577_v51, 0 }
 0x18a   : > { %v5869_v28 = vsel %vm2118_vm10, %v6645_v22, %v2325_v40  ;;  %v5874_v52 = vsel %vm2118_vm10, %v6644_v24, %v2150_v17  ;;  %3054 = vst.msk [vmem:[#allocation3 + $0x48] sm:$0xff] %vm245_vm1, %v2847_v26  ;;  %2432 = vrot.lane.b32.xlu0 %v5303_v60, %s4228_s12  ;;  %v2505_v29 = vsel %vm2118_vm10, %v2502_v57, %v2504_v21  ;;  %v1918_v17 = vsel %vm6647_vm12, %v5577_v51, 0  ;;  %v5888_v26 = vpop.permute.xlu0 %2331  ;;  %v5890_v22 = vpop.permute.xlu1 %2154 }
 0x18b   : > { %v2503_v20 = vsel %vm2118_vm10, %v6764_v45, %v2502_v57  ;;  %2267 = vrot.lane.b32.xlu1 %v5831_v10, %s4229_s13  ;;  %v5883_v23 = vsel %vm2118_vm10, %v2325_v40, %v2327_v50  ;;  %v3006_v45 = vshrl.u32 %v2505_v29, 16  ;;  %v3009_v24 = vshll.u32 %v2505_v29, 16 }
 0x18c   : > { %v2991_v14 = vshrl.u32 %v2503_v20, 16  ;;  %v2994_v5 = vshll.u32 %v2503_v20, 16  ;;  %v1913_v20 = vsel %vm1501_vm4, %v5055_v0, 0  ;;  %v1882_v50 = vsel %vm1507_vm13, %v5577_v51, 0 }
 0x18d   : > { %v3008_v55 = vrot.slane %v3006_v45, 7  ;;  %v1877_v0 = vsel %vm1502_vm9, %v5906_v35, 0  ;;  %v6650_v46 = vrot.slane %v5979_v44, 1  ;;  %vm2696_vm15 = vcmask 785408  }
 0x18e   : > { %v2993_v60 = vrot.slane %v2991_v14, 7  ;;  %2396 = vrot.lane.b32.xlu0 %v1913_v20, %s4226_s10  ;;  %v5900_v40 = vpop.permute.xlu0 %2245  ;;  %v5902_v29 = vpop.permute.xlu1 %2069  ;;  %v5928_v20 = vld [vmem:[#allocation2 + $0x48] sm:$0xff] }
 0x18f   : > { %2406 = vrot.lane.b32.xlu1 %v1918_v17, %s4226_s10  ;;  %v3011_v57 = vor.u32 %v3009_v24, %v3008_v55  ;;  %v6767_v17 = vrot.slane %v5417_v1, 1  ;;  %v1862_v1 = vsel %vm1845_vm2, %v5366_v56, 0 }
 0x190   : > { %v2996_v21 = vor.u32 %v2994_v5, %v2993_v60 }
 0x191   : > { %v3012_v5 = vsel %vm1704_vm3, %v2993_v60, %v3011_v57  ;;  %v1881_v60 = vsel %vm6647_vm12, %v5366_v56, 0  ;;  %vm6780_vm12 = vcmask 523264  }
 0x192   : > { %v2997_v14 = vsel %vm1704_vm3, %v5718_v39, %v2996_v21  ;;  %2221 = vrot.lane.b32.xlu0 %v1877_v0, %s4224_s29  ;;  %3076 = vst.msk [vmem:[#allocation3 + $0xf8] sm:$0xff] %vm245_vm1, %v3012_v5  ;;  %v5916_v55 = vpop.permute.xlu0 %2156  ;;  %v5918_v24 = vpop.permute.xlu1 %2247  ;;  %v6766_v39 = vrot.slane %v5538_v8, 1  ;;  %v2008_v21 = vshrl.u32 %v5928_v20, 16  ;;  %v5936_v8 = vsel %vm1844_vm5, %v5320_v42, 0 }
 0x193   : > { %3074 = vst.msk [vmem:[#allocation3 + $0xe8] sm:$0xff] %vm245_vm1, %v2997_v14  ;;  %2231 = vrot.lane.b32.xlu1 %v1882_v50, %s4224_s29  ;;  %v1490_v50 = vshrl.u32 %v5697_v18, 16  ;;  %v6768_v0 = vrot.slane %v5586_v43, 1  ;;  %v6769_v5 = vrot.slane %v5438_v37, 1  ;;  %v2142_v42 = vrot.slane %v5936_v8, 1 }
 0x194   : > { %v2314_v45 = vsel %vm2118_vm10, %v6767_v17, %v6766_v39  ;;  %v2010_v11 = vor.u32 %v2008_v21, %v5354_v32  ;;  %v2144_v17 = vrot.slane %v1862_v1, 1  ;;  %v5959_v18 = vsel %vm1845_vm2, %v5577_v51, 0 }
 0x195   : > { %v2139_v39 = vsel %vm2118_vm10, %v6769_v5, %v6768_v0  ;;  %v5962_v43 = vor.u32 %v1490_v50, %v5766_v30  ;;  %vm6770_vm2 = vcmp.ne.s16.totalorder %v5387_v6, 0  ;;  %v1172_v50 = vld [vmem:[#allocation2] sm:$0x80]  ;;  %v6771_v5 = vrot.slane %v5618_v63, 1 }
 0x196   : > { %2347 = vrot.lane.b32.xlu0 %v2314_v45, %s4227_s11  ;;  %v5942_v57 = vpop.permute.xlu0 %2386  ;;  %v5944_v14 = vpop.permute.xlu1 %2071  ;;  %v2015_v32 = vsel %vm1365_vm11, %v2010_v11, %v5503_v34  ;;  %v4130_v34 = vld [vmem:[#allocation2 + $0x28] sm:$0xff]  ;;  %v6772_v11 = vld [vmem:[#allocation7_spill] sm:$0xff] }
 0x197   : > { %2229 = vrot.lane.b32.xlu1 %v1881_v60, %s4224_s29  ;;  %v2145_v60 = vsel %vm2118_vm10, %v2142_v42, %v2144_v17  ;;  %vm1509_vm5 = vcmp.ne.s16.totalorder %v5962_v43, 0  ;;  %v1515_v21 = vsel %vm6770_vm2, %v4130_v34, 0  ;;  %vm6773_vm8 = vcmp.ne.s16.totalorder %v6772_v11, 0 }
 0x198   : > { %v6001_v6 = vsel %vm1509_vm5, %v5599_v33, 0  ;;  %vm2557_vm2 = vcmask 261120  }
 0x19a   : > { %2172 = vrot.lane.b32.xlu0 %v2139_v39, %s4225_s7  ;;  %v5964_v37 = vpop.permute.xlu0 %2211  ;;  %v5966_v45 = vpop.permute.xlu1 %2215  ;;  %v2048_v39 = vshrl.u32 %v5366_v56, 16  ;;  %v2147_v56 = vsel %vm2118_vm10, %v2144_v17, %v6650_v46 }
 0x19b   : > { %2353 = vrot.lane.b32.xlu1 %v5648_v2, %s4227_s11  ;;  %v6646_v2 = vrot.slane %v5959_v18, 1 }
 0x19d   : > { %v2322_v51 = vsel %vm2118_vm10, %v6771_v5, %v6646_v2  ;;  %v6774_v5 = vld [vmem:[#allocation8_spill] sm:$0xff] }
 0x19e   : > { %2436 = vrot.lane.b32.xlu0 %v2015_v32, %s4228_s12  ;;  %v5982_v30 = vpop.permute.xlu0 %2384  ;;  %v2078_v1 = vpop.permute.xlu1 %2077  ;;  %vm6775_vm6 = vcmp.ne.s16.totalorder %v6774_v5, 0 }
 0x19f   : > { %2178 = vrot.lane.b32.xlu1 %v2145_v60, %s4225_s7  ;;  %v5987_v0 = vsel %vm245_vm1, %v1515_v21, %v2078_v1  ;;  %v1510_v60 = vsel %vm6773_vm8, %v1172_v50, 0  ;;  %v2050_v21 = vor.u32 %v2048_v39, %v5714_v59  ;;  %v4131_v1 = vld [vmem:[#allocation2 + $0x8] sm:$0xff]  ;;  %vm6776_vm8 = vcmp.ne.s16.totalorder %v5392_v16, 0  ;;  %v6777_v39 = vld [vmem:[#allocation29_spill] sm:$0xff] }
 0x1a0   : > { %v2508_v50 = vsel %vm245_vm1, %v1510_v60, %v5692_v47  ;;  %v1915_v59 = vsel %vm6776_vm8, %v5274_v12, 0  ;;  %vm2661_vm8 = vcmask 654336  }
 0x1a2   : > { %2261 = vrot.lane.b32.xlu0 %v2015_v32, %s4229_s13  ;;  %v6005_v34 = vpop.permute.xlu0 %2209  ;;  %v6007_v63 = vpop.permute.xlu1 %2394 }
 0x1a3   : > { %2355 = vrot.lane.b32.xlu1 %v2322_v51, %s4227_s11  ;;  %v1511_v51 = vsel %vm6775_vm6, %v4131_v1, 0  ;;  %vm2592_vm6 = vcmask 392192   ;;  %v6778_v1 = vld [vmem:[#allocation28_spill] sm:$0xff] }
 0x1a4   : > { %v2511_v17 = vsel %vm245_vm1, %v1511_v51, %v5902_v29 }
 0x1a5   : > { %v2561_v47 = vsel %vm2557_vm2, %v2511_v17, %v5890_v22 }
 0x1a6   : > { %2085 = vrot.lane.b32.xlu0 %v2015_v32, %s4223_s27  ;;  %v6019_v11 = vpop.permute.xlu0 %2333  ;;  %v6021_v2 = vpop.permute.xlu1 %2219  ;;  %v2055_v32 = vsel %vm1365_vm11, %v2050_v21, %v5716_v7  ;;  %v6779_v7 = vld [vmem:[#allocation15_spill] sm:$0xff]  ;;  %v1879_v21 = vsel %vm6649_vm7, %v5274_v12, 0  ;;  %v2596_v22 = vsel %vm2592_vm6, %v2561_v47, %v5827_v36  ;;  %v6781_v12 = vld [vmem:[#allocation25_spill] sm:$0xff]  ;;  %vm2731_vm7 = vcmask 916480  }
 0x1a7   : > { %2180 = vrot.lane.b32.xlu1 %v2147_v56, %s4225_s7  ;;  %v2559_v56 = vsel %vm2557_vm2, %v2508_v50, %v6777_v39  ;;  %v6782_v39 = vrot.slane %v6781_v12, 1  ;;  %v2630_v36 = vsel %vm6780_vm12, %v2596_v22, %v5918_v24  ;;  %v6785_v24 = vrot.slane %v5610_v25, 1  ;;  %v6786_v22 = vld [vmem:[#allocation23_spill] sm:$0xff] }
 0x1a8   : > { %v2594_v5 = vsel %vm2592_vm6, %v2559_v56, %v6778_v1  ;;  %v6783_v56 = vld [vmem:[#allocation24_spill] sm:$0xff]  ;;  %v1919_v25 = vsel %vm1507_vm13, %v5599_v33, 0 }
 0x1a9   : > { %v2628_v51 = vsel %vm6780_vm12, %v2594_v5, %v5900_v40  ;;  %v6784_v1 = vrot.slane %v6783_v56, 1  ;;  %v6062_v5 = vld [vmem:[#allocation2 + $0x58] sm:$0xff] }
 0x1aa   : > { %2400 = vrot.lane.b32.xlu0 %v1915_v59, %s4226_s10  ;;  %v6036_v60 = vpop.permute.xlu0 %2158  ;;  %v6038_v29 = vpop.permute.xlu1 %2392  ;;  %v2663_v59 = vsel %vm2661_vm8, %v2628_v51, %v5825_v54  ;;  %v1920_v54 = vsel %vm1508_vm0, %v5656_v3, 0 }
 0x1ab   : > { %2446 = vrot.lane.b32.xlu1 %v2055_v32, %s4228_s12  ;;  %v2318_v40 = vsel %vm2118_vm10, %v6784_v1, %v6782_v39  ;;  %v2698_v47 = vsel %vm2696_vm15, %v2663_v59, %v5857_v58  ;;  %v2665_v39 = vsel %vm2661_vm8, %v2630_v36, %v5888_v26  ;;  %v4133_v1 = vld [vmem:[#allocation2 + $0x10] sm:$0xff] }
 0x1ac   : > { %v2733_v58 = vsel %vm2731_vm7, %v2698_v47, %v5855_v49 }
 0x1ae   : > { %2225 = vrot.lane.b32.xlu0 %v1879_v21, %s4224_s29  ;;  %v2024_v21 = vshrl.u32 %v6062_v5, 16 }
 0x1af   : > { %2271 = vrot.lane.b32.xlu1 %v2055_v32, %s4229_s13  ;;  %v6051_v50 = vpop.permute.xlu0 %2335  ;;  %v6053_v17 = vpop.permute.xlu1 %2341 }
 0x1b0   : > { %v2026_v56 = vor.u32 %v2024_v21, %v6786_v22 }
 0x1b2   : > { %2351 = vrot.lane.b32.xlu0 %v2318_v40, %s4227_s11  ;;  %v6787_v40 = vld [vmem:[#allocation9_spill] sm:$0xff]  ;;  %v2031_v36 = vsel %vm1365_vm11, %v2026_v56, %v5745_v13  ;;  %vm6790_vm11 = vcmask 523264  }
 0x1b3   : > { %2095 = vrot.lane.b32.xlu1 %v2055_v32, %s4223_s27  ;;  %v6074_v51 = vpop.permute.xlu0 %2160  ;;  %v2167_v12 = vpop.permute.xlu1 %2166  ;;  %v2143_v32 = vsel %vm2118_vm10, %v6785_v24, %v2142_v42  ;;  %vm6788_vm12 = vcmp.ne.s16.totalorder %v6787_v40, 0  ;;  %v2700_v42 = vsel %vm2696_vm15, %v2665_v39, %v5789_v53  ;;  %v4134_v53 = vld [vmem:[#allocation2 + $0x38] sm:$0xff] }
 0x1b4   : > { %v1512_v46 = vsel %vm6788_vm12, %v4133_v1, 0  ;;  %v1517_v24 = vsel %vm1500_vm14, %v4134_v53, 0 }
 0x1b5   : > { %v2514_v26 = vsel %vm245_vm1, %v1512_v46, %v5944_v14 }
 0x1b6   : > { %2176 = vrot.lane.b32.xlu0 %v2143_v32, %s4225_s7  ;;  %v2563_v49 = vsel %vm2557_vm2, %v2514_v26, %v5916_v55  ;;  %v1883_v55 = vsel %vm1508_vm0, %v5599_v33, 0  ;;  %v6791_v33 = vrot.slane %v5706_v15, 1  ;;  %vm6807_vm0 = vmmov %vm6790_vm11 }
 0x1b7   : > { %2410 = vrot.lane.b32.xlu1 %v1920_v54, %s4226_s10  ;;  %v2425_v8 = vpop.permute.xlu0 %2424  ;;  %v2766_v54 = vshrl.u32 %v2733_v58, 16  ;;  %v2598_v13 = vsel %vm2592_vm6, %v2563_v49, %v5791_v4 }
 0x1b8   : > { %v6097_v59 = vpop.permute.xlu1 %2257  ;;  %v2735_v21 = vsel %vm2731_vm7, %v2700_v42, %v2425_v8  ;;  %v6792_v8 = vrot.slane %v5959_v18, 1  ;;  %v6793_v18 = vrot.slane %v5845_v9, 1  ;;  %v6795_v9 = vld [vmem:[#allocation27_spill] sm:$0xff] }
 0x1b9   : > { %v2769_v14 = vshrl.u32 %v2735_v21, 16  ;;  %v2772_v46 = vshll.u32 %v2735_v21, 16  ;;  %v2768_v56 = vrot.slane %v2766_v54, 7 }
 0x1ba   : > { %2440 = vrot.lane.b32.xlu0 %v2031_v36, %s4228_s12  ;;  %v2324_v42 = vsel %vm2118_vm10, %v6792_v8, %v6791_v33  ;;  %v4136_v33 = vld [vmem:[#allocation2 + $0x18] sm:$0xff] }
 0x1bb   : > { %2408 = vrot.lane.b32.xlu1 %v1919_v25, %s4226_s10  ;;  %v2771_v31 = vrot.slane %v2769_v14, 7  ;;  %v2250_v47 = vpop.permute.xlu0 %2249  ;;  %v6800_v8 = vld [vmem:[#allocation10_spill] sm:$0xff] }
 0x1bc   : > { %v2082_v32 = vpop.permute.xlu1 %2081  ;;  %v2632_v40 = vsel %vm6790_vm11, %v2598_v13, %v2250_v47  ;;  %vm6801_vm13 = vcmp.ne.s16.totalorder %v6800_v8, 0  ;;  %v6810_v8 = vld [vmem:[#allocation12_spill] sm:$0xff]  ;;  %vm6813_vm11 = vmmov %vm6807_vm0 }
 0x1bd   : > { %v2529_v22 = vsel %vm245_vm1, %v1517_v24, %v2082_v32  ;;  %v2774_v1 = vor.u32 %v2772_v46, %v2771_v31  ;;  %v2667_v62 = vsel %vm2661_vm8, %v2632_v40, %v6019_v11  ;;  %v6794_v11 = vrot.slane %v5979_v44, 1  ;;  %v4135_v24 = vld [vmem:[#allocation2 + $0x20] sm:$0xff] }
 0x1be   : > { %2265 = vrot.lane.b32.xlu0 %v2031_v36, %s4229_s13  ;;  %v6118_v58 = vsel %vm2557_vm2, %v2529_v22, %v2167_v12  ;;  %v3086_v12 = vld [vmem:[#allocation3 + $0x18] sm:$0xff]  ;;  %v2702_v54 = vsel %vm2696_vm15, %v2667_v62, %v5982_v30 }
 0x1bf   : > { %2233 = vrot.lane.b32.xlu1 %v1883_v55, %s4224_s29  ;;  %v2775_v26 = vsel %vm1704_vm3, %v2768_v56, %v2774_v1  ;;  %v2074_v4 = vpop.permute.xlu0 %2073  ;;  %v2149_v14 = vsel %vm2118_vm10, %v6794_v11, %v6793_v18  ;;  %v6798_v1 = vld [vmem:[#allocation30_spill] sm:$0xff] }
 0x1c0   : > { %v6121_v25 = vpop.permute.xlu1 %2434  ;;  %3276 = vmatmul.mubr.bf16.vlgmr.msra.gmra.mrb[32].mxu0 %v2775_v26  ;;  %v6802_v18 = vld [vmem:[#allocation18_spill] sm:$0xff] }
 0x1c1   : > { %3775 = vmatprep.mubr.msk.bf16.mxu0 %vm245_vm1, %v3086_v12 }
 0x1c2   : > { %2089 = vrot.lane.b32.xlu0 %v2031_v36, %s4223_s27 }
 0x1c3   : > { %2357 = vrot.lane.b32.xlu1 %v2324_v42, %s4227_s11  ;;  %v1513_v42 = vsel %vm6801_vm13, %v4136_v33, 0  ;;  %vm6817_vm13 = vcmp.ne.s16.totalorder %v5392_v16, 0 }
 0x1c4   : > { %v2427_v21 = vpop.permute.xlu0 %2426  ;;  %v6135_v49 = vpop.permute.xlu1 %2259  ;;  %v2517_v12 = vsel %vm245_vm1, %v1513_v42, %v2074_v4 }
 0x1c5   : > { %v2737_v15 = vsel %vm2731_vm7, %v2702_v54, %v2427_v21 }
 0x1c6   : > { %v2788_v36 = vshrl.u32 %v2737_v15, 16  ;;  %2091 = vrot.lane.b32.xlu0 %v5831_v10, %s4223_s27  ;;  %v2791_v47 = vshll.u32 %v2737_v15, 16  ;;  %v6796_v10 = vld [vmem:[#allocation11_spill] sm:$0xff]  ;;  %v2565_v15 = vsel %vm2557_vm2, %v2517_v12, %v6036_v60 }
 0x1c7   : > { %2182 = vrot.lane.b32.xlu1 %v2149_v14, %s4225_s7  ;;  %vm6797_vm14 = vcmp.ne.s16.totalorder %v6796_v10, 0 }
 0x1c8   : > { %v6146_v46 = vrot.slane %v2788_v36, 7  ;;  %v2252_v30 = vpop.permute.xlu0 %2251  ;;  %v6148_v53 = vpop.permute.xlu1 %2083  ;;  %v1514_v32 = vsel %vm6797_vm14, %v4135_v24, 0  ;;  %v2600_v36 = vsel %vm2592_vm6, %v2565_v15, %v6005_v34  ;;  %v4137_v34 = vld [vmem:[#allocation2 + $0x30] sm:$0xff]  ;;  %vm6808_vm12 = vmmov %vm6797_vm14 }
 0x1c9   : > { %v2634_v60 = vsel %vm6807_vm0, %v2600_v36, %v2252_v30  ;;  %vm6816_vm14 = vmmov %vm6807_vm0 }
 0x1ca   : > { %v2793_v39 = vor.u32 %v2791_v47, %v6146_v46  ;;  %2404 = vrot.lane.b32.xlu0 %v6795_v9, %s4226_s10  ;;  %v6803_v47 = vld [vmem:[#allocation16_spill] sm:$0xff] }
 0x1cb   : > { %2359 = vrot.lane.b32.xlu1 %v5869_v28, %s4227_s11  ;;  %v6799_v28 = vld [vmem:[#allocation31_spill] sm:$0xff]  ;;  %v6804_v4 = vrot.slane %v6803_v47, 1  ;;  %v1921_v47 = vsel %vm1509_vm5, %v5764_v27, 0 }
 0x1cc   : > { %v2794_v44 = vsel %vm1704_vm3, %v2771_v31, %v2793_v39  ;;  %v2076_v13 = vpop.permute.xlu0 %2075  ;;  %v6158_v22 = vpop.permute.xlu1 %2398  ;;  %v3088_v31 = vld [vmem:[#allocation3 + $0x28] sm:$0xff] }
 0x1cd   : > { %v2520_v55 = vsel %vm245_vm1, %v1514_v32, %v2076_v13  ;;  %3284 = vmatmul.mubr.bf16.gmra.mrb[36].mxu0 %v2794_v44  ;;  %v6805_v39 = vld [vmem:[#allocation20_spill] sm:$0xff]  ;;  %v2669_v32 = vsel %vm2661_vm8, %v2634_v60, %v6051_v50  ;;  %v1909_v13 = vsel %vm6808_vm12, %v4137_v34, 0  ;;  %v6809_v50 = vld [vmem:[#allocation26_spill] sm:$0xff]  ;;  %vm6822_vm12 = vcmp.ne.s16.totalorder %v6779_v7, 0 }
 0x1ce   : > { %v6163_v56 = vsel %vm2557_vm2, %v2520_v55, %v6074_v51  ;;  %2444 = vrot.lane.b32.xlu0 %v6798_v1, %s4228_s12  ;;  %3776 = vmatprep.mubr.msk.bf16.mxu0 %vm245_vm1, %v3088_v31  ;;  %v6806_v9 = vrot.slane %v6805_v39, 1  ;;  %v2704_v30 = vsel %vm2696_vm15, %v2669_v32, %v5942_v57 }
 0x1cf   : > { %2448 = vrot.lane.b32.xlu1 %v6799_v28, %s4228_s12 }
 0x1d0   : > { %v6170_v40 = vpop.permute.xlu0 %2390  ;;  %v6172_v26 = vpop.permute.xlu1 %2223  ;;  %v2304_v44 = vsel %vm2118_vm10, %v6806_v9, %v6804_v4  ;;  %vm6811_vm10 = vcmp.ne.s16.totalorder %v6810_v8, 0 }
 0x1d2   : > { %2269 = vrot.lane.b32.xlu0 %v6798_v1, %s4229_s13 }
 0x1d3   : > { %2273 = vrot.lane.b32.xlu1 %v6799_v28, %s4229_s13 }
 0x1d4   : > { %v6178_v51 = vpop.permute.xlu0 %2213  ;;  %v6180_v62 = vpop.permute.xlu1 %2345 }
 0x1d6   : > { %2093 = vrot.lane.b32.xlu0 %v6798_v1, %s4223_s27 }
 0x1d7   : > { %2097 = vrot.lane.b32.xlu1 %v6799_v28, %s4223_s27 }
 0x1d8   : > { %v2165_v21 = vpop.permute.xlu0 %2164  ;;  %v6189_v54 = vpop.permute.xlu1 %2170 }
 0x1da   : > { %2253 = vrot.lane.b32.xlu0 %v6802_v18, %s4229_s13 }
 0x1db   : > { %2452 = vrot.lane.b32.xlu1 %v5807_v41, %s4228_s12 }
 0x1dc   : > { %v2163_v11 = vpop.permute.xlu0 %2162  ;;  %v6197_v14 = vpop.permute.xlu1 %2438 }
 0x1de   : > { %2337 = vrot.lane.b32.xlu0 %v2304_v44, %s4227_s11 }
 0x1df   : > { %2450 = vrot.lane.b32.xlu1 %v5811_v61, %s4228_s12 }
 0x1e0   : > { %v2340_v41 = vpop.permute.xlu0 %2339  ;;  %v6210_v24 = vpop.permute.xlu1 %2263 }
 0x1e2   : > { %2388 = vrot.lane.b32.xlu0 %v1909_v13, %s4226_s10 }
 0x1e3   : > { %2275 = vrot.lane.b32.xlu1 %v5811_v61, %s4229_s13  ;;  %v1516_v61 = vsel %vm6811_vm10, %v4137_v34, 0  ;;  %vm6823_vm10 = vmmov %vm6807_vm0 }
 0x1e4   : > { %v2429_v55 = vpop.permute.xlu0 %2428  ;;  %v6221_v1 = vpop.permute.xlu1 %2087 }
 0x1e5   : > { %v2739_v28 = vsel %vm2731_vm7, %v2704_v30, %v2429_v55 }
 0x1e6   : > { %v2803_v31 = vshrl.u32 %v2739_v28, 16  ;;  %2430 = vrot.lane.b32.xlu0 %v6809_v50, %s4228_s12  ;;  %v2806_v33 = vshll.u32 %v2739_v28, 16 }
 0x1e7   : > { %2184 = vrot.lane.b32.xlu1 %v5874_v52, %s4225_s7  ;;  %v6812_v52 = vld [vmem:[#allocation32_spill] sm:$0xff]  ;;  %s229_s7 = sand.u32 1, %s4203_s19  }
 0x1e8   : > { %v6228_v10 = vrot.slane %v2803_v31, 7  ;;  %v2080_v42 = vpop.permute.xlu0 %2079  ;;  %v6232_v57 = vpop.permute.xlu1 %2402  ;;  %s6530_s8 = scalar_lea.sflag [#allocation5], %s229_s7 }
 0x1e9   : > { %v2526_v12 = vsel %vm245_vm1, %v1516_v61, %v2080_v42 }
 0x1ea   : > { %v2808_v15 = vor.u32 %v2806_v33, %v6228_v10  ;;  %v2571_v18 = vsel %vm2557_vm2, %v2526_v12, %v2165_v21  ;;  %2099 = vrot.lane.b32.xlu0 %v5787_v38, %s4223_s27 }
 0x1eb   : > { %2277 = vrot.lane.b32.xlu1 %v6812_v52, %s4229_s13  ;;  %v2606_v36 = vsel %vm2592_vm6, %v2571_v18, %v5966_v45  ;;  %v1884_v45 = vsel %vm1509_vm5, %v5656_v3, 0  ;;  %v2569_v3 = vsel %vm2557_vm2, %v5987_v0, %v2163_v11  ;;  %vm6814_vm5 = vmmov %vm6807_vm0 }
 0x1ec   : > { %v2809_v4 = vsel %vm1704_vm3, %v6146_v46, %v2808_v15  ;;  %v2640_v39 = vsel %vm6813_vm11, %v2606_v36, %v6097_v59  ;;  %v2256_v21 = vpop.permute.xlu0 %2255  ;;  %v6250_v9 = vpop.permute.xlu1 %2227  ;;  %v2419_v59 = vshrl.u32 %v5764_v27, 16  ;;  %v3090_v46 = vld [vmem:[#allocation3 + $0x38] sm:$0xff]  ;;  %v2604_v30 = vsel %vm2592_vm6, %v2569_v3, %v6178_v51  ;;  %v3096_v36 = vld [vmem:[#allocation3 + $0x68] sm:$0xff] }
 0x1ed   : > { %v2675_v38 = vsel %vm2661_vm8, %v2640_v39, %v6053_v17  ;;  %3292 = vmatmul.mubr.bf16.gmra.mrb[40].mxu0 %v2809_v4  ;;  %v6815_v17 = vld [vmem:[#allocation21_spill] sm:$0xff]  ;;  %v2638_v55 = vsel %vm6816_vm14, %v2604_v30, %v2256_v21  ;;  %v1520_v21 = vsel %vm6817_vm13, %v5906_v35, 0  ;;  %vm6827_vm14 = vcmp.ne.s16.totalorder %v5835_v48, 0  ;;  %vm6828_vm13 = vmmov %vm6807_vm0 }
 0x1ee   : > { %v2710_v44 = vsel %vm2696_vm15, %v2675_v38, %v6038_v29  ;;  %2235 = vrot.lane.b32.xlu0 %v1884_v45, %s4224_s29  ;;  %3777 = vmatprep.mubr.msk.bf16.mxu0 %vm245_vm1, %v3090_v46  ;;  %v2421_v27 = vor.u32 %v2419_v59, %v6815_v17  ;;  %v2538_v38 = vsel %vm245_vm1, %v1520_v21, %v6221_v1 }
 0x1ef   : > { %2412 = vrot.lane.b32.xlu1 %v1921_v47, %s4226_s10  ;;  %s3692_s10 = sshll.u32 %s229_s7, 7 }
 0x1f0   : > { %v2218_v60 = vpop.permute.xlu0 %2217  ;;  %v6263_v32 = vpop.permute.xlu1 %2349 }
 0x1f1   : > { %v2608_v43 = vsel %vm2592_vm6, %v6118_v58, %v2218_v60  ;;  %v2745_v58 = vsel %vm2731_vm7, %v2710_v44, %v6121_v25 }
 0x1f2   : > { %2361 = vrot.lane.b32.xlu0 %v5883_v23, %s4227_s11  ;;  %v2642_v29 = vsel %vm6814_vm5, %v2608_v43, %v6135_v49  ;;  %v2848_v11 = vshrl.u32 %v2745_v58, 16  ;;  %v2673_v49 = vsel %vm2661_vm8, %v2638_v55, %v2340_v41  ;;  %v2851_v8 = vshll.u32 %v2745_v58, 16  ;;  %v4138_v43 = vld [vmem:[#allocation2 + $0x40] sm:$0xff]  ;;  %vm6826_vm5 = vmmov %vm6807_vm0  ;;  %s6471_s11 = scalar_lea.vmem [#allocation4], %s3692_s10 }
 0x1f3   : > { %v2708_v31 = vsel %vm2696_vm15, %v2673_v49, %v6170_v40  ;;  %v1518_v17 = vsel %vm1501_vm4, %v4138_v43, 0  ;;  %vm6819_vm4 = vmmov %vm6807_vm0  ;;  %v6821_v43 = vld [vmem:[#allocation33_spill] sm:$0xff]  ;;  %s3612_s16 = sshll.u32 %s6471_s11, 4  ;;  %s6525_s16 = int_to_ptr.vmem [resolvable:$true] %s3612_s16 }
 0x1f4   : > { %v2344_v34 = vpop.permute.xlu0 %2343  ;;  %v2850_v50 = vrot.slane %v2848_v11, 7  ;;  %v2532_v16 = vsel %vm245_vm1, %v1518_v17, %v6148_v53  ;;  %s4141_s9 = scalar_lea.vmem %s6525_s16, 2048 }
 0x1f5   : > { %v6274_v13 = vpop.permute.xlu1 %2174  ;;  %v2677_v59 = vsel %vm2661_vm8, %v2642_v29, %v2344_v34  ;;  %p4142_p12 = scmp.ne.s32.totalorder %s6525_s16, %s4141_s9 }
 0x1f6   : > { %2454 = vrot.lane.b32.xlu0 %v2421_v27, %s4228_s12  ;;  %v2853_v12 = vor.u32 %v2851_v8, %v2850_v50  ;;  %v2712_v1 = vsel %vm2696_vm15, %v2677_v59, %v6007_v63  ;;  %s3860_s12 = sshll.u32 %s4211_s21, 11  ;;  %s4230_s21 = smov [#allocation4]  }
 0x1f7   : > { %s6523_s25 = scalar_lea.hbm %s6583_s5, %s3860_s12  ;;  %p4143_p13 = pnand %p4142_p12, %p4302_p4 }
 0x1f8   : > { %v2169_v0 = vpop.permute.xlu0 %2168  ;;  %s4145_s14 = sshll.u32 %s4230_s21, 4  ;;  %s4146_s14 = int_to_ptr.vmem [resolvable:$false] %s4145_s14 }
 0x1f9   : > { %v6282_v23 = vpop.permute.xlu1 %2442  ;;  %v2575_v29 = vsel %vm2557_vm2, %v2532_v16, %v2169_v0  ;;  %p4144_p0 = pneg %p4143_p13  ;;  %s4147_s15 = scalar_lea.vmem %s4146_s14, 4096 }
 0x1fa   : > { %v2610_v11 = vsel %vm2592_vm6, %v2575_v29, %v6021_v2  ;;  %p4148_p1 = scmp.lt.s32.totalorder %s6525_s16, %s4146_s14  ;;  %p4149_p2 = scmp.lt.s32.totalorder %s4147_s15, %s4141_s9 }
 0x1fc   : > { %v2433_v28 = vpop.permute.xlu0 %2432  ;;  %p4150_p3 = por %p4149_p2, %p4148_p1 }
 0x1fd   : > { %v6287_v33 = vpop.permute.xlu1 %2267  ;;  %v2743_v51 = vsel %vm2731_vm7, %v2708_v31, %v2433_v28 }
 0x1fe   : > { %v2833_v25 = vshrl.u32 %v2743_v51, 16  ;;  %v2836_v42 = vshll.u32 %v2743_v51, 16  ;;  %p4151_p5 = pnand %p4150_p3, %p4144_p0 }
 0x200   : > { %v2835_v61 = vrot.slane %v2833_v25, 7  ;;  %v2397_v15 = vpop.permute.xlu0 %2396  ;;  %v1519_v25 = vsel %vm1502_vm9, %v5928_v20, 0  ;;  %vm6820_vm9 = vmmov %vm6807_vm0 }
 0x201   : > { %v6290_v18 = vpop.permute.xlu1 %2406 }
 0x202   : > { %v6292_v52 = vor.u32 %v2836_v42, %v2835_v61  ;;  %v2854_v41 = vsel %vm1704_vm3, %v2835_v61, %v2853_v12  ;;  %v3098_v12 = vld [vmem:[#allocation3 + $0x78] sm:$0xff] }
 0x203   : > { %3316 = vmatmul.mubr.bf16.vlgmr.msra.gmra.mrb[0].mxu1 %v2854_v41 }
 0x204   : > { %v2222_v40 = vpop.permute.xlu0 %2221  ;;  %3780 = vmatprep.mubr.msk.bf16.mxu1 %vm245_vm1, %v3096_v36 }
 0x205   : > { %v2232_v47 = vpop.permute.xlu1 %2231 }
 0x208   : > { %v2348_v4 = vpop.permute.xlu0 %2347 }
 0x209   : > { %v6296_v39 = vpop.permute.xlu1 %2229 }
 0x20c   : > { %v2173_v45 = vpop.permute.xlu0 %2172 }
 0x20d   : > { %v6303_v44 = vpop.permute.xlu1 %2353  ;;  %v2579_v46 = vsel %vm2557_vm2, %v2538_v38, %v2173_v45 }
 0x20e   : > { %v2614_v60 = vsel %vm2592_vm6, %v2579_v46, %v6172_v26 }
 0x210   : > { %v2437_v35 = vpop.permute.xlu0 %2436 }
 0x211   : > { %v6315_v27 = vpop.permute.xlu1 %2178  ;;  %v2747_v34 = vsel %vm2731_vm7, %v2712_v1, %v2437_v35 }
 0x212   : > { %v2863_v30 = vshrl.u32 %v2747_v34, 16  ;;  %v2866_v26 = vshll.u32 %v2747_v34, 16 }
 0x214   : > { %v2865_v58 = vrot.slane %v2863_v30, 7  ;;  %v2262_v55 = vpop.permute.xlu0 %2261 }
 0x215   : > { %v6321_v49 = vpop.permute.xlu1 %2355  ;;  %v2644_v53 = vsel %vm6819_vm4, %v2610_v11, %v2262_v55  ;;  %vm6829_vm4 = vmmov %vm6807_vm0 }
 0x216   : > { %v2868_v28 = vor.u32 %v2866_v26, %v2865_v58  ;;  %v2679_v63 = vsel %vm2661_vm8, %v2644_v53, %v6180_v62 }
 0x217   : > { %v2714_v31 = vsel %vm2696_vm15, %v2679_v63, %v2397_v15 }
 0x218   : > { %v2869_v0 = vsel %vm1704_vm3, %v2850_v50, %v2868_v28  ;;  %v2749_v51 = vsel %vm2731_vm7, %v2714_v31, %v6197_v14  ;;  %v2086_v2 = vpop.permute.xlu0 %2085 }
 0x219   : > { %v2181_v8 = vpop.permute.xlu1 %2180  ;;  %v2878_v61 = vshrl.u32 %v2749_v51, 16  ;;  %v2535_v42 = vsel %vm245_vm1, %v1519_v25, %v2086_v2  ;;  %3324 = vmatmul.mubr.bf16.gmra.mrb[4].mxu1 %v2869_v0  ;;  %v2881_v15 = vshll.u32 %v2749_v51, 16  ;;  %v1521_v0 = vsel %vm6822_vm12, %v6062_v5, 0  ;;  %vm6832_vm12 = vmmov %vm6807_vm0 }
 0x21a   : > { %v2577_v62 = vsel %vm2557_vm2, %v2535_v42, %v6189_v54  ;;  %3781 = vmatprep.mubr.msk.bf16.mxu1 %vm245_vm1, %v3098_v12  ;;  %v3100_v54 = vld [vmem:[#allocation3 + $0x88] sm:$0xff] }
 0x21b   : > { %v2880_v50 = vrot.slane %v2878_v61, 7  ;;  %v2612_v14 = vsel %vm2592_vm6, %v2577_v62, %v2222_v40 }
 0x21c   : > { %v2401_v41 = vpop.permute.xlu0 %2400  ;;  %v2646_v19 = vsel %vm6820_vm9, %v2612_v14, %v6210_v24  ;;  %vm6831_vm9 = vmmov %vm6807_vm0 }
 0x21d   : > { %v6338_v36 = vpop.permute.xlu1 %2446  ;;  %v2883_v20 = vor.u32 %v2881_v15, %v2880_v50  ;;  %v2681_v35 = vsel %vm2661_vm8, %v2646_v19, %v2348_v4  ;;  %v6824_v19 = vld [vmem:[#allocation22_spill] sm:$0xff] }
 0x21e   : > { %v2716_v29 = vsel %vm2696_vm15, %v2681_v35, %v6158_v22  ;;  %vm6825_vm11 = vcmp.ne.s16.totalorder %v6824_v19, 0 }
 0x21f   : > { %v2884_v21 = vsel %vm1704_vm3, %v2865_v58, %v2883_v20 }
 0x220   : > { %v2226_v38 = vpop.permute.xlu0 %2225 }
 0x221   : > { %v6343_v45 = vpop.permute.xlu1 %2271  ;;  %3332 = vmatmul.mubr.bf16.gmra.mrb[8].mxu1 %v2884_v21  ;;  %v3104_v21 = vld [vmem:[#allocation3 + $0xa8] sm:$0xff] }
 0x222   : > { %3782 = vmatprep.mubr.msk.bf16.mxu1 %vm245_vm1, %v3100_v54 }
 0x224   : > { %v2352_v59 = vpop.permute.xlu0 %2351 }
 0x225   : > { %v2096_v46 = vpop.permute.xlu1 %2095 }
 0x226   : > { %v2550_v40 = vsel %vm245_vm1, %v6821_v43, %v2096_v46 }
 0x227   : > { %v2587_v3 = vsel %vm2557_vm2, %v2550_v40, %v2181_v8  ;;  %v3102_v8 = vld [vmem:[#allocation3 + $0x98] sm:$0xff] }
 0x228   : > { %v6350_v17 = vsel %vm2592_vm6, %v2587_v3, %v2232_v47  ;;  %v2177_v24 = vpop.permute.xlu0 %2176 }
 0x229   : > { %v6352_v16 = vpop.permute.xlu1 %2410 }
 0x22c   : > { %v2441_v1 = vpop.permute.xlu0 %2440 }
 0x22d   : > { %v6357_v34 = vpop.permute.xlu1 %2408  ;;  %v2751_v30 = vsel %vm2731_vm7, %v2716_v29, %v2441_v1 }
 0x22e   : > { %v2893_v58 = vshrl.u32 %v2751_v30, 16  ;;  %v2896_v55 = vshll.u32 %v2751_v30, 16 }
 0x230   : > { %v2895_v26 = vrot.slane %v2893_v58, 7  ;;  %v2266_v11 = vpop.permute.xlu0 %2265 }
 0x231   : > { %v6360_v53 = vpop.permute.xlu1 %2233  ;;  %v2648_v47 = vsel %vm6807_vm0, %v2614_v60, %v2266_v11 }
 0x232   : > { %v2898_v28 = vor.u32 %v2896_v55, %v2895_v26  ;;  %v2683_v4 = vsel %vm2661_vm8, %v2648_v47, %v6263_v32  ;;  %v4140_v47 = vld [vmem:[#allocation2 + $0x68] sm:$0xff] }
 0x233   : > { %v2718_v63 = vsel %vm2696_vm15, %v2683_v4, %v2401_v41  ;;  %v4139_v41 = vld [vmem:[#allocation2 + $0x60] sm:$0xff] }
 0x234   : > { %v2899_v22 = vsel %vm1704_vm3, %v2880_v50, %v2898_v28  ;;  %v2753_v31 = vsel %vm2731_vm7, %v2718_v63, %v6282_v23  ;;  %v2090_v51 = vpop.permute.xlu0 %2089  ;;  %v1523_v28 = vsel %vm6827_vm14, %v4140_v47, 0 }
 0x235   : > { %v2358_v25 = vpop.permute.xlu1 %2357  ;;  %v2908_v2 = vshrl.u32 %v2753_v31, 16  ;;  %v2541_v60 = vsel %vm245_vm1, %v1521_v0, %v2090_v51  ;;  %3340 = vmatmul.mubr.bf16.gmra.mrb[12].mxu1 %v2899_v22  ;;  %v2911_v42 = vshll.u32 %v2753_v31, 16  ;;  %v3106_v31 = vld [vmem:[#allocation3 + $0xb8] sm:$0xff] }
 0x236   : > { %v2581_v32 = vsel %vm2557_vm2, %v2541_v60, %v6274_v13  ;;  %3783 = vmatprep.mubr.msk.bf16.mxu1 %vm245_vm1, %v3102_v8  ;;  %v1522_v13 = vsel %vm6825_vm11, %v4139_v41, 0 }
 0x237   : > { %v2910_v61 = vrot.slane %v2908_v2, 7  ;;  %v2616_v23 = vsel %vm2592_vm6, %v2581_v32, %v2226_v38 }
 0x238   : > { %v2092_v12 = vpop.permute.xlu0 %2091  ;;  %v2650_v7 = vsel %vm6823_vm10, %v2616_v23, %v6287_v33 }
 0x239   : > { %v2183_v62 = vpop.permute.xlu1 %2182  ;;  %v2913_v5 = vor.u32 %v2911_v42, %v2910_v61  ;;  %v2685_v20 = vsel %vm2661_vm8, %v2650_v7, %v2352_v59  ;;  %v2544_v38 = vsel %vm245_vm1, %v1522_v13, %v2092_v12  ;;  %v6830_v42 = vld [vmem:[#allocation34_spill] sm:$0xff] }
 0x23a   : > { %v2720_v33 = vsel %vm2696_vm15, %v2685_v20, %v6232_v57  ;;  %v2583_v43 = vsel %vm2557_vm2, %v2544_v38, %v2177_v24 }
 0x23b   : > { %v2914_v50 = vsel %vm1704_vm3, %v2895_v26, %v2913_v5  ;;  %v2618_v59 = vsel %vm2592_vm6, %v2583_v43, %v6250_v9 }
 0x23c   : > { %v2405_v15 = vpop.permute.xlu0 %2404 }
 0x23d   : > { %v6380_v14 = vpop.permute.xlu1 %2359  ;;  %3348 = vmatmul.mubr.bf16.gmra.mrb[16].mxu1 %v2914_v50 }
 0x23e   : > { %3784 = vmatprep.mubr.msk.bf16.mxu1 %vm245_vm1, %v3104_v21 }
 0x240   : > { %v2445_v54 = vpop.permute.xlu0 %2444 }
 0x241   : > { %v2449_v46 = vpop.permute.xlu1 %2448  ;;  %v2755_v40 = vsel %vm2731_vm7, %v2720_v33, %v2445_v54 }
 0x242   : > { %v2923_v3 = vshrl.u32 %v2755_v40, 16  ;;  %v2926_v1 = vshll.u32 %v2755_v40, 16 }
 0x244   : > { %v2925_v35 = vrot.slane %v2923_v3, 7  ;;  %v2270_v29 = vpop.permute.xlu0 %2269 }
 0x245   : > { %v2274_v30 = vpop.permute.xlu1 %2273  ;;  %v2652_v58 = vsel %vm6826_vm5, %v2618_v59, %v2270_v29 }
 0x246   : > { %v2928_v26 = vor.u32 %v2926_v1, %v2925_v35  ;;  %v2687_v55 = vsel %vm2661_vm8, %v2652_v58, %v6303_v44  ;;  %v2656_v44 = vsel %vm6828_vm13, %v6350_v17, %v2274_v30  ;;  %v3110_v58 = vld [vmem:[#allocation3 + $0xd8] sm:$0xff] }
 0x247   : > { %v2722_v57 = vsel %vm2696_vm15, %v2687_v55, %v2405_v15  ;;  %v3108_v15 = vld [vmem:[#allocation3 + $0xc8] sm:$0xff] }
 0x248   : > { %v2929_v24 = vsel %vm1704_vm3, %v2910_v61, %v2928_v26  ;;  %v2757_v11 = vsel %vm2731_vm7, %v2722_v57, %v6338_v36  ;;  %v2094_v4 = vpop.permute.xlu0 %2093  ;;  %v2691_v61 = vsel %vm2661_vm8, %v2656_v44, %v2358_v25 }
 0x249   : > { %v2098_v9 = vpop.permute.xlu1 %2097  ;;  %v2938_v63 = vshrl.u32 %v2757_v11, 16  ;;  %v2547_v22 = vsel %vm245_vm1, %v1523_v28, %v2094_v4  ;;  %3356 = vmatmul.mubr.bf16.gmra.mrb[20].mxu1 %v2929_v24  ;;  %v2941_v51 = vshll.u32 %v2757_v11, 16 }
 0x24a   : > { %v2585_v0 = vsel %vm2557_vm2, %v2547_v22, %v6315_v27  ;;  %3785 = vmatprep.mubr.msk.bf16.mxu1 %vm245_vm1, %v3106_v31  ;;  %v2553_v23 = vsel %vm245_vm1, %v6830_v42, %v2098_v9 }
 0x24b   : > { %v2940_v36 = vrot.slane %v2938_v63, 7  ;;  %v2620_v48 = vsel %vm2592_vm6, %v2585_v0, %v6296_v39  ;;  %v2589_v25 = vsel %vm2557_vm2, %v2553_v23, %v2183_v62  ;;  %v2602_v62 = vsel %vm2592_vm6, %v6163_v56, %v5964_v37 }
 0x24c   : > { %v2654_v2 = vsel %vm6829_vm4, %v2620_v48, %v6343_v45  ;;  %v2254_v60 = vpop.permute.xlu0 %2253  ;;  %v2726_v45 = vsel %vm2696_vm15, %v2691_v61, %v6357_v34  ;;  %v2624_v34 = vsel %vm2592_vm6, %v2589_v25, %v6360_v53  ;;  %v3112_v48 = vld [vmem:[#allocation3 + $0xe8] sm:$0xff]  ;;  %v3114_v61 = vld [vmem:[#allocation3 + $0xf8] sm:$0xff] }
 0x24d   : > { %v2453_v8 = vpop.permute.xlu1 %2452  ;;  %v2943_v32 = vor.u32 %v2941_v51, %v2940_v36  ;;  %v2689_v17 = vsel %vm2661_vm8, %v2654_v2, %v6321_v49  ;;  %v3092_v51 = vld [vmem:[#allocation3 + $0x48] sm:$0xff] }
 0x24e   : > { %v2724_v27 = vsel %vm2696_vm15, %v2689_v17, %v6290_v18 }
 0x24f   : > { %v2944_v12 = vsel %vm1704_vm3, %v2925_v35, %v2943_v32  ;;  %v2759_v39 = vsel %vm2731_vm7, %v2724_v27, %v2449_v46  ;;  %v2636_v46 = vsel %vm6807_vm0, %v2602_v62, %v2254_v60 }
 0x250   : > { %v2338_v7 = vpop.permute.xlu0 %2337  ;;  %v2953_v5 = vshrl.u32 %v2759_v39, 16  ;;  %v2956_v41 = vshll.u32 %v2759_v39, 16  ;;  %v6464_v39 = vld [vmem:[%s6582_s4] ss:$0 sm:$0xff] }
 0x251   : > { %v2451_v50 = vpop.permute.xlu1 %2450  ;;  %3364 = vmatmul.mubr.bf16.gmra.mrb[24].mxu1 %v2944_v12  ;;  %v2671_v35 = vsel %vm2661_vm8, %v2636_v46, %v2338_v7 }
 0x252   : > { %v2761_v49 = vsel %vm2731_vm7, %v2726_v45, %v2451_v50  ;;  %v2955_v18 = vrot.slane %v2953_v5, 7  ;;  %3786 = vmatprep.mubr.msk.bf16.mxu1 %vm245_vm1, %v3108_v15 }
 0x253   : > { %v2968_v19 = vshrl.u32 %v2761_v49, 16  ;;  %v2971_v21 = vshll.u32 %v2761_v49, 16 }
 0x254   : > { %v2958_v13 = vor.u32 %v2956_v41, %v2955_v18  ;;  %v2389_v38 = vpop.permute.xlu0 %2388 }
 0x255   : > { %v2970_v20 = vrot.slane %v2968_v19, 7  ;;  %v2276_v54 = vpop.permute.xlu1 %2275  ;;  %v2706_v29 = vsel %vm2696_vm15, %v2671_v35, %v2389_v38 }
 0x256   : > { %v2658_v33 = vsel %vm6831_vm9, %v2624_v34, %v2276_v54  ;;  %v2959_v43 = vsel %vm1704_vm3, %v2940_v36, %v2958_v13 }
 0x257   : > { %v2973_v40 = vor.u32 %v2971_v21, %v2970_v20  ;;  %v2693_v3 = vsel %vm2661_vm8, %v2658_v33, %v6380_v14 }
 0x258   : > { %v2728_v53 = vsel %vm2696_vm15, %v2693_v3, %v6352_v16  ;;  %v2431_v56 = vpop.permute.xlu0 %2430 }
 0x259   : > { %v2974_v1 = vsel %vm1704_vm3, %v2955_v18, %v2973_v40  ;;  %v2763_v37 = vsel %vm2731_vm7, %v2728_v53, %v2453_v8  ;;  %v2741_v30 = vsel %vm2731_vm7, %v2706_v29, %v2431_v56  ;;  %3372 = vmatmul.mubr.bf16.gmra.mrb[28].mxu1 %v2959_v43  ;;  %v2185_v57 = vpop.permute.xlu1 %2184 }
 0x25a   : > { %v2983_v59 = vshrl.u32 %v2763_v37, 16  ;;  %v2818_v26 = vshrl.u32 %v2741_v30, 16  ;;  %3787 = vmatprep.mubr.msk.bf16.mxu1 %vm245_vm1, %v3110_v58  ;;  %v2986_v55 = vshll.u32 %v2763_v37, 16  ;;  %v2821_v16 = vshll.u32 %v2741_v30, 16 }
 0x25c   : > { %v2985_v14 = vrot.slane %v2983_v59, 7  ;;  %v2820_v24 = vrot.slane %v2818_v26, 7  ;;  %v2100_v11 = vpop.permute.xlu0 %2099 }
 0x25d   : > { %v2556_v28 = vsel %vm245_vm1, %v6001_v6, %v2100_v11  ;;  %v2278_v0 = vpop.permute.xlu1 %2277 }
 0x25e   : > { %v2988_v47 = vor.u32 %v2986_v55, %v2985_v14  ;;  %v2823_v4 = vor.u32 %v2821_v16, %v2820_v24  ;;  %v2839_v9 = vsel %vm1704_vm3, %v2820_v24, %v6292_v52  ;;  %v2591_v44 = vsel %vm2557_vm2, %v2556_v28, %v2185_v57 }
 0x260   : > { %v2989_v63 = vsel %vm1704_vm3, %v2970_v20, %v2988_v47  ;;  %v2824_v22 = vsel %vm1704_vm3, %v6228_v10, %v2823_v4  ;;  %v2236_v31 = vpop.permute.xlu0 %2235 }
 0x261   : > { %v2626_v36 = vsel %vm2592_vm6, %v2591_v44, %v2236_v31  ;;  %3300 = vmatmul.mubr.bf16.gmra.mrb[44].mxu0 %v2824_v22  ;;  %3380 = vmatmul.mubr.bf16.gmra.mrb[32].mxu1 %v2974_v1  ;;  %v2413_v10 = vpop.permute.xlu1 %2412 }
 0x262   : > { %3778 = vmatprep.mubr.msk.bf16.mxu0 %vm245_vm1, %v3092_v51  ;;  %3788 = vmatprep.mubr.msk.bf16.mxu1 %vm245_vm1, %v3112_v48  ;;  %v2660_v52 = vsel %vm6832_vm12, %v2626_v36, %v2278_v0 }
 0x264   : > { %v2362_v6 = vpop.permute.xlu0 %2361 }
 0x265   : > { %v2695_v2 = vsel %vm2661_vm8, %v2660_v52, %v2362_v6 }
 0x266   : > { %v2730_v60 = vsel %vm2696_vm15, %v2695_v2, %v2413_v10 }
 0x268   : > { %v2455_v8 = vpop.permute.xlu0 %2454 }
 0x269   : > { %v2765_v32 = vsel %vm2731_vm7, %v2730_v60, %v2455_v8  ;;  %3308 = vmatmul.mubr.bf16.gmra.mrb[48].mxu0 %v2839_v9  ;;  %3388 = vmatmul.mubr.bf16.gmra.mrb[36].mxu1 %v2989_v63 }
 0x26a   : > { %v2998_v17 = vshrl.u32 %v2765_v32, 16  ;;  %3789 = vmatprep.mubr.msk.bf16.mxu1 %vm245_vm1, %v3114_v61  ;;  %v3001_v42 = vshll.u32 %v2765_v32, 16 }
 0x26c   : > { %v3000_v27 = vrot.slane %v2998_v17, 7 }
 0x26e   : > { %v3003_v23 = vor.u32 %v3001_v42, %v3000_v27 }
 0x270   : > { %v3004_v12 = vsel %vm1704_vm3, %v2985_v14, %v3003_v23 }
 0x271   : > { %3396 = vmatmul.mubr.bf16.gmra.mrb[40].mxu1 %v3004_v12 }
 0x293   : > { %v3277_v7 = vpop.f32.mrb[32].mxu0 }
 0x294   : > { %v3278_v45 = vadd.f32 %v6464_v39, %v3277_v7  ;;  %v3279_v5 = vpop.f32.mrb[33].mxu0 }
 0x295   : > { %v3280_v50 = vpop.f32.mrb[34].mxu0 }
 0x296   : > { %v3281_v25 = vadd.f32 %v6464_v39, %v3280_v50  ;;  %v3282_v49 = vpop.f32.mrb[35].mxu0  ;;  %v3404_v15 = vmax.f32 %v3278_v45, 0.0 }
 0x298   : > { %v3405_v18 = vmax.f32 %v3281_v25, 0.0 }
 0x29a   : > { %v3864_v41 = vpack.c.bf16 %v3405_v18, %v3404_v15 }
 0x29c   : > { %3865 = vst [vmem:[%s6471_s11] sm:$0xff] %v3864_v41  }
 0x2a0   : > { %v3285_v19 = vpop.f32.mrb[36].mxu0 }
 0x2a1   : > { %v3286_v13 = vadd.f32 %v6464_v39, %v3285_v19  ;;  %v3287_v20 = vpop.f32.mrb[37].mxu0 }
 0x2a2   : > { %v3288_v21 = vpop.f32.mrb[38].mxu0 }
 0x2a3   : > { %v3289_v38 = vadd.f32 %v6464_v39, %v3288_v21  ;;  %v3290_v34 = vpop.f32.mrb[39].mxu0  ;;  %v3406_v54 = vmax.f32 %v3286_v13, 0.0 }
 0x2a5   : > { %v3407_v62 = vmax.f32 %v3289_v38, 0.0 }
 0x2a7   : > { %v3869_v33 = vpack.c.bf16 %v3407_v62, %v3406_v54 }
 0x2a9   : > { %3941 = vst [vmem:[%s6471_s11 + $0x8] sm:$0xff] %v3869_v33  }
 0x2c0   : > { %v3293_v46 = vpop.f32.mrb[40].mxu0 }
 0x2c1   : > { %v3294_v43 = vadd.f32 %v6464_v39, %v3293_v46  ;;  %v3295_v40 = vpop.f32.mrb[41].mxu0 }
 0x2c2   : > { %v3296_v3 = vpop.f32.mrb[42].mxu0 }
 0x2c3   : > { %v3297_v35 = vadd.f32 %v6464_v39, %v3296_v3  ;;  %v3298_v53 = vpop.f32.mrb[43].mxu0  ;;  %v3408_v1 = vmax.f32 %v3294_v43, 0.0 }
 0x2c5   : > { %v3409_v29 = vmax.f32 %v3297_v35, 0.0 }
 0x2c7   : > { %v3874_v37 = vpack.c.bf16 %v3409_v29, %v3408_v1 }
 0x2c9   : > { %3942 = vst [vmem:[%s6471_s11 + $0x10] sm:$0xff] %v3874_v37  }
 0x2d6   : > { %v3317_v56 = vpop.f32.mrb[0].mxu1 }
 0x2d7   : > { %v3318_v59 = vadd.f32 %v6464_v39, %v3317_v56  ;;  %v3319_v30 = vpop.f32.mrb[1].mxu1 }
 0x2d8   : > { %v3320_v58 = vpop.f32.mrb[2].mxu1 }
 0x2d9   : > { %v3321_v26 = vadd.f32 %v6464_v39, %v3320_v58  ;;  %v3322_v14 = vpop.f32.mrb[3].mxu1  ;;  %v3414_v55 = vmax.f32 %v3318_v59, 0.0 }
 0x2db   : > { %v3415_v57 = vmax.f32 %v3321_v26, 0.0 }
 0x2dd   : > { %v3889_v24 = vpack.c.bf16 %v3415_v57, %v3414_v55 }
 0x2df   : > { %3945 = vst [vmem:[%s6471_s11 + $0x28] sm:$0xff] %v3889_v24  }
 0x2ec   : > { %v3325_v16 = vpop.f32.mrb[4].mxu1 }
 0x2ed   : > { %v3326_v11 = vadd.f32 %v6464_v39, %v3325_v16  ;;  %v3327_v47 = vpop.f32.mrb[5].mxu1 }
 0x2ee   : > { %v3328_v28 = vpop.f32.mrb[6].mxu1 }
 0x2ef   : > { %v3329_v4 = vadd.f32 %v6464_v39, %v3328_v28  ;;  %v3330_v9 = vpop.f32.mrb[7].mxu1  ;;  %v3416_v63 = vmax.f32 %v3326_v11, 0.0 }
 0x2f1   : > { %v3417_v22 = vmax.f32 %v3329_v4, 0.0 }
 0x2f3   : > { %v3894_v31 = vpack.c.bf16 %v3417_v22, %v3416_v63 }
 0x2f4   : > { %v3333_v44 = vpop.f32.mrb[8].mxu1 }
 0x2f5   : > { %3946 = vst [vmem:[%s6471_s11 + $0x30] sm:$0xff] %v3894_v31   ;;  %v3334_v0 = vadd.f32 %v6464_v39, %v3333_v44  ;;  %v3335_v36 = vpop.f32.mrb[9].mxu1 }
 0x2f6   : > { %v3336_v51 = vpop.f32.mrb[10].mxu1 }
 0x2f7   : > { %v3337_v48 = vadd.f32 %v6464_v39, %v3336_v51  ;;  %v3338_v6 = vpop.f32.mrb[11].mxu1  ;;  %v3418_v52 = vmax.f32 %v3334_v0, 0.0 }
 0x2f9   : > { %v3419_v2 = vmax.f32 %v3337_v48, 0.0 }
 0x2fb   : > { %v3899_v10 = vpack.c.bf16 %v3419_v2, %v3418_v52 }
 0x2fd   : > { %3947 = vst [vmem:[%s6471_s11 + $0x38] sm:$0xff] %v3899_v10  }
 0x308   : > { %v3341_v60 = vpop.f32.mrb[12].mxu1 }
 0x309   : > { %v3342_v8 = vadd.f32 %v6464_v39, %v3341_v60  ;;  %v3343_v32 = vpop.f32.mrb[13].mxu1 }
 0x30a   : > { %v3344_v61 = vpop.f32.mrb[14].mxu1 }
 0x30b   : > { %v3345_v17 = vadd.f32 %v6464_v39, %v3344_v61  ;;  %v3346_v27 = vpop.f32.mrb[15].mxu1  ;;  %v3420_v42 = vmax.f32 %v3342_v8, 0.0 }
 0x30d   : > { %v3421_v23 = vmax.f32 %v3345_v17, 0.0 }
 0x30f   : > { %v3904_v12 = vpack.c.bf16 %v3421_v23, %v3420_v42 }
 0x310   : > { %v3349_v7 = vpop.f32.mrb[16].mxu1 }
 0x311   : > { %3948 = vst [vmem:[%s6471_s11 + $0x40] sm:$0xff] %v3904_v12   ;;  %v3350_v45 = vadd.f32 %v6464_v39, %v3349_v7  ;;  %v3351_v5 = vpop.f32.mrb[17].mxu1 }
 0x312   : > { %v3352_v50 = vpop.f32.mrb[18].mxu1 }
 0x313   : > { %v3353_v25 = vadd.f32 %v6464_v39, %v3352_v50  ;;  %v3354_v49 = vpop.f32.mrb[19].mxu1  ;;  %v3422_v15 = vmax.f32 %v3350_v45, 0.0 }
 0x315   : > { %v3423_v18 = vmax.f32 %v3353_v25, 0.0 }
 0x317   : > { %v3909_v41 = vpack.c.bf16 %v3423_v18, %v3422_v15 }
 0x319   : > { %3949 = vst [vmem:[%s6471_s11 + $0x48] sm:$0xff] %v3909_v41  }
 0x31c   : > { %v3357_v19 = vpop.f32.mrb[20].mxu1 }
 0x31d   : > { %v3358_v13 = vadd.f32 %v6464_v39, %v3357_v19  ;;  %v3359_v20 = vpop.f32.mrb[21].mxu1 }
 0x31e   : > { %v3360_v21 = vpop.f32.mrb[22].mxu1 }
 0x31f   : > { %v3361_v38 = vadd.f32 %v6464_v39, %v3360_v21  ;;  %v3362_v34 = vpop.f32.mrb[23].mxu1  ;;  %v3424_v54 = vmax.f32 %v3358_v13, 0.0 }
 0x321   : > { %v3425_v62 = vmax.f32 %v3361_v38, 0.0 }
 0x323   : > { %v3914_v33 = vpack.c.bf16 %v3425_v62, %v3424_v54 }
 0x324   : > { %v3365_v46 = vpop.f32.mrb[24].mxu1 }
 0x325   : > { %3950 = vst [vmem:[%s6471_s11 + $0x50] sm:$0xff] %v3914_v33   ;;  %v3366_v43 = vadd.f32 %v6464_v39, %v3365_v46  ;;  %v3367_v40 = vpop.f32.mrb[25].mxu1 }
 0x326   : > { %v3368_v3 = vpop.f32.mrb[26].mxu1 }
 0x327   : > { %v3369_v35 = vadd.f32 %v6464_v39, %v3368_v3  ;;  %v3370_v53 = vpop.f32.mrb[27].mxu1  ;;  %v3426_v1 = vmax.f32 %v3366_v43, 0.0 }
 0x329   : > { %v3427_v29 = vmax.f32 %v3369_v35, 0.0 }
 0x32b   : > { %v3919_v37 = vpack.c.bf16 %v3427_v29, %v3426_v1 }
 0x32c   : > { %v3373_v56 = vpop.f32.mrb[28].mxu1 }
 0x32d   : > { %3951 = vst [vmem:[%s6471_s11 + $0x58] sm:$0xff] %v3919_v37   ;;  %v3374_v59 = vadd.f32 %v6464_v39, %v3373_v56  ;;  %v3375_v30 = vpop.f32.mrb[29].mxu1 }
 0x32e   : > { %v3376_v58 = vpop.f32.mrb[30].mxu1 }
 0x32f   : > { %v3377_v26 = vadd.f32 %v6464_v39, %v3376_v58  ;;  %v3378_v14 = vpop.f32.mrb[31].mxu1  ;;  %v3428_v55 = vmax.f32 %v3374_v59, 0.0 }
 0x331   : > { %v3429_v57 = vmax.f32 %v3377_v26, 0.0 }
 0x333   : > { %v3924_v24 = vpack.c.bf16 %v3429_v57, %v3428_v55 }
 0x334   : > { %v3301_v16 = vpop.f32.mrb[44].mxu0  ;;  %v3381_v11 = vpop.f32.mrb[32].mxu1 }
 0x335   : > { %3952 = vst [vmem:[%s6471_s11 + $0x60] sm:$0xff] %v3924_v24   ;;  %v3302_v47 = vadd.f32 %v6464_v39, %v3301_v16  ;;  %v3382_v28 = vadd.f32 %v6464_v39, %v3381_v11  ;;  %v3303_v4 = vpop.f32.mrb[45].mxu0  ;;  %v3383_v9 = vpop.f32.mrb[33].mxu1 }
 0x336   : > { %v3304_v63 = vpop.f32.mrb[46].mxu0  ;;  %v3384_v22 = vpop.f32.mrb[34].mxu1 }
 0x337   : > { %v3305_v31 = vadd.f32 %v6464_v39, %v3304_v63  ;;  %v3385_v44 = vadd.f32 %v6464_v39, %v3384_v22  ;;  %v3306_v0 = vpop.f32.mrb[47].mxu0  ;;  %v3386_v36 = vpop.f32.mrb[35].mxu1  ;;  %v3410_v51 = vmax.f32 %v3302_v47, 0.0  ;;  %v3430_v48 = vmax.f32 %v3382_v28, 0.0 }
 0x339   : > { %v3411_v6 = vmax.f32 %v3305_v31, 0.0  ;;  %v3431_v52 = vmax.f32 %v3385_v44, 0.0 }
 0x33b   : > { %v3879_v2 = vpack.c.bf16 %v3411_v6, %v3410_v51  ;;  %v3929_v10 = vpack.c.bf16 %v3431_v52, %v3430_v48 }
 0x33c   : > { %v3309_v60 = vpop.f32.mrb[48].mxu0  ;;  %v3389_v8 = vpop.f32.mrb[36].mxu1 }
 0x33d   : > { %3943 = vst [vmem:[%s6471_s11 + $0x18] sm:$0xff] %v3879_v2   ;;  %3953 = vst [vmem:[%s6471_s11 + $0x68] sm:$0xff] %v3929_v10   ;;  %v3310_v32 = vadd.f32 %v6464_v39, %v3309_v60  ;;  %v3390_v61 = vadd.f32 %v6464_v39, %v3389_v8  ;;  %v3311_v17 = vpop.f32.mrb[49].mxu0  ;;  %v3391_v27 = vpop.f32.mrb[37].mxu1 }
 0x33e   : > { %v3312_v42 = vpop.f32.mrb[50].mxu0  ;;  %v3392_v23 = vpop.f32.mrb[38].mxu1 }
 0x33f   : > { %v3313_v12 = vadd.f32 %v6464_v39, %v3312_v42  ;;  %v3393_v7 = vadd.f32 %v6464_v39, %v3392_v23  ;;  %v3314_v45 = vpop.f32.mrb[51].mxu0  ;;  %v3394_v5 = vpop.f32.mrb[39].mxu1  ;;  %v3412_v50 = vmax.f32 %v3310_v32, 0.0  ;;  %v3432_v25 = vmax.f32 %v3390_v61, 0.0 }
 0x341   : > { %v3413_v49 = vmax.f32 %v3313_v12, 0.0  ;;  %v3433_v15 = vmax.f32 %v3393_v7, 0.0 }
 0x343   : > { %v3884_v18 = vpack.c.bf16 %v3413_v49, %v3412_v50  ;;  %v3934_v41 = vpack.c.bf16 %v3433_v15, %v3432_v25 }
 0x344   : > { %v3397_v19 = vpop.f32.mrb[40].mxu1 }
 0x345   : > { %3944 = vst [vmem:[%s6471_s11 + $0x20] sm:$0xff] %v3884_v18   ;;  %3954 = vst [vmem:[%s6471_s11 + $0x70] sm:$0xff] %v3934_v41   ;;  %v3398_v13 = vadd.f32 %v6464_v39, %v3397_v19  ;;  %v3399_v20 = vpop.f32.mrb[41].mxu1 }
 0x346   : > { %v3400_v21 = vpop.f32.mrb[42].mxu1 }
 0x347   : > { %v3401_v38 = vadd.f32 %v6464_v39, %v3400_v21  ;;  %v3402_v34 = vpop.f32.mrb[43].mxu1  ;;  %v3434_v54 = vmax.f32 %v3398_v13, 0.0 }
 0x349   : > { %v3435_v62 = vmax.f32 %v3401_v38, 0.0 }
 0x34b   : > { %v3939_v33 = vpack.c.bf16 %v3435_v62, %v3434_v54 }
 0x34d   : > { %3955 = vst [vmem:[%s6471_s11 + $0x78] sm:$0xff] %v3939_v33  }
 0x34e   : > { %4154 = shalt.err (!%p4151_p5)
}
 0x34f   : > { %s4155_s27 = scalar_lea.hbm %s6523_s25, 2048  ;;  %s4159_s10 = scalar_lea.hbm %s6583_s5, 4096 }
 0x350   : > { %p4156_p6 = scmp.ne.s32.totalorder %s6523_s25, %s4155_s27  ;;  %p4160_p10 = scmp.lt.u32.totalorder %s6523_s25, %s6583_s5 }
 0x351   : > { %p4161_p11 = scmp.lt.u32.totalorder %s4159_s10, %s4155_s27  ;;  %p4163_p13 = scmp.lt.u32.totalorder %s4155_s27, %s6523_s25 }
 0x352   : > { %p4157_p7 = pnand %p4156_p6, %p4302_p4 }
 0x353   : > { %p4162_p12 = por %p4161_p11, %p4160_p10 }
 0x354   : > { %p4158_p9 = pneg %p4157_p7 }
 0x355   : > { %p4164_p0 = por %p4163_p13, %p4162_p12 }
 0x357   : > { %p4165_p1 = pnand %p4164_p0, %p4158_p9 }
 0x359   : > { %4168 = shalt.err (!%p4165_p1)
}
 0x35a   : > { %s4231_s17 = smov 4  }
 0x35b   : > { %4034 = dma.vmem_to_hbm [thread:$0]  (%p4302_p4), %s6525_s16, 2048, %s6523_s25, %s6530_s8, %s4229_s13, %s4229_s13, %s4231_s17  }
 0x35c PF: > { %p4040_p2 = scmp.ge.s32.totalorder %s4219_s23, 2  ;;  %s3627_s24 = sand.u32 1, %s4199_s18  }
 0x35d   : > { %s3628_s9 = scalar_lea.sflag [#allocation5], %s3627_s24 }
 0x35e   : > { %p4037_p3 = pnand %p4040_p2, %p4309_p8 }
 0x360   : > { %4194 = dma.done.wait (!%p4037_p3), %s3628_s9, 2048  }
 0x361   : > { %4196 = vsyncadd (!%p4037_p3), %s3628_s9, 4294965248  ;;  %s18_s23 = sadd.s32 1, %s4219_s23   ;;  %s6833_s18 = smov %s4203_s19 }
 0x362   : > { %p15_p5 = scmp.ge.s32.totalorder %s18_s23, 4   ;;  %s6834_s19 = smov %s4207_s20 }
 0x363   : > { %s6835_s20 = smov %s4315_s6  ;;  %s6836_s21 = smov %s4215_s22 }
 0x364   : > { %s6837_s22 = smov %s6839_s26  ;;  %17 = sbr.rel (!%p15_p5) target bundleno = 4 (0x4), region = 80 }
 0x36b   :  { %3633 = vsyncpa [#allocation5], 1 }
 0x36c   :  { %3635 = vsyncpa [#allocation5 + $0x1], 1 }

</bundles_post_ra>
